<compile_context>
chip_gen: v7x
topology: tpu7x:2x2x1
jax: 0.10.0
libtpu: 0.0.40
codegen_flags: <defaults>
</compile_context>

<pallas_src>
import numpy as np

import jax
import jax.numpy as jnp
from jax import lax
from jax.experimental import pallas as pl
from jax.experimental.pallas import tpu as pltpu


# ------------------------------ model dims ---------------------------------
_IN_HW = 32                       # forward needs 32x32 so the 16*5*5 flatten is valid
_C1_OUT, _C1_K = 6, 5
_C2_OUT, _C2_K = 16, 5
_H1 = _IN_HW - _C1_K + 1          # 28  (conv1 output spatial)
_P1 = _H1 // 2                    # 14  (pool1 output spatial)
_H2 = _P1 - _C2_K + 1             # 10  (conv2 output spatial)
_P2 = _H2 // 2                    # 5   (pool2 output spatial)
_FC1, _FC2 = 120, 84


# ---------------------------------------------------------------------------
# Fused whole-network kernel: one grid step == TB samples
# ---------------------------------------------------------------------------
def _cnn_cifar_kernel(x_ref, band1_ref, bias1_ref, rowsel1_ref, sell1_ref,
                      band2_ref, bias2_ref, rowsel2_ref, sell2_ref,
                      pick0_ref, w3p_ref, b3_ref, w4t_ref, b4_ref,
                      w5t_ref, b5_ref, out_ref):
    f32 = jnp.float32

    # ---- conv1 (1->6, 5x5) + ReLU -----------------------------------------
    # Rows are packed as s*32 + r (s = sample in tile), lanes = image width.
    # Tap kh needs input row r+kh -> cheap sublane shift (slice+concat); rows
    # r >= 28 of each sample hold garbage and are never selected downstream.
    xf = x_ref[...]                                              # (TB*32, 32)
    c1 = jnp.dot(xf, band1_ref[0], preferred_element_type=f32)
    for kh in range(1, _C1_K):
        c1 = c1 + jnp.dot(jnp.roll(xf, -kh, axis=0), band1_ref[kh],
                          preferred_element_type=f32)
    c1 = jnp.maximum(c1 + bias1_ref[...], 0.0)                   # (TB*32, 168)

    # ---- maxpool 2x2 #1 -----------------------------------------------------
    # Row pairs: elementwise max against a 1-row shift, then ONE block-diagonal
    # selection matmul picks rows s*32 + 2p.  Lane (width) pairs: two 0/1
    # selection matmuls (even/odd columns) + elementwise max.
    m1 = jnp.maximum(c1, jnp.roll(c1, -1, axis=0))
    r1 = jnp.dot(rowsel1_ref[...], m1, preferred_element_type=f32)      # (TB*14, 168)
    p1 = jnp.maximum(jnp.dot(r1, sell1_ref[0], preferred_element_type=f32),
                     jnp.dot(r1, sell1_ref[1], preferred_element_type=f32))  # (TB*14, 84)

    # ---- conv2 (6->16, 5x5) + ReLU ------------------------------------------
    c2 = jnp.dot(p1, band2_ref[0], preferred_element_type=f32)
    for kh in range(1, _C2_K):
        c2 = c2 + jnp.dot(jnp.roll(p1, -kh, axis=0), band2_ref[kh],
                          preferred_element_type=f32)
    c2 = jnp.maximum(c2 + bias2_ref[...], 0.0)                   # (TB*14, 160)

    # ---- maxpool 2x2 #2 -----------------------------------------------------
    m2 = jnp.maximum(c2, jnp.roll(c2, -1, axis=0))
    r2 = jnp.dot(rowsel2_ref[...], m2, preferred_element_type=f32)      # (TB*5, 160)
    p2 = jnp.maximum(jnp.dot(r2, sell2_ref[0], preferred_element_type=f32),
                     jnp.dot(r2, sell2_ref[1], preferred_element_type=f32))  # (TB*5, 80)

    # ---- fc1 (400 -> 120) + ReLU --------------------------------------------
    # Batched: accumulate the 5 per-pooled-row weight blocks over all TB*5 rows
    # (M = TB*5, no M=1 matmuls), then a single pick matmul gathers row s*5 of
    # each sample.  The PyTorch NCHW flatten order is folded into w3p host-side.
    z = jnp.dot(p2, w3p_ref[0], preferred_element_type=f32)
    for ph in range(1, _P2):
        z = z + jnp.dot(jnp.roll(p2, -ph, axis=0), w3p_ref[ph],
                        preferred_element_type=f32)
    z1 = jnp.maximum(jnp.dot(pick0_ref[...], z, preferred_element_type=f32)
                     + b3_ref[...], 0.0)                          # (TB, 120)

    # ---- fc2 (120 -> 84) + ReLU, fc3 (84 -> NC padded to 128 lanes) ---------
    z2 = jnp.maximum(jnp.dot(z1, w4t_ref[...], preferred_element_type=f32)
                     + b4_ref[...], 0.0)
    out_ref[...] = (jnp.dot(z2, w5t_ref[...], preferred_element_type=f32)
                    + b5_ref[...])                                # (TB, 128)


# ---------------------------------------------------------------------------
# Host-side (outside jit) weight preprocessing
# ---------------------------------------------------------------------------
def _conv_band(w, in_w):
    """w: (C_out, C_in, KH, KW) PyTorch conv weight ->
    band (KH, in_w*C_in, out_w*C_out) with
    band[kh, iw*C_in + ci, ow*C_out + co] = w[co, ci, kh, iw - ow] for valid taps."""
    w = np.asarray(w, np.float32)
    co_n, ci_n, kh_n, kw_n = w.shape
    out_w = in_w - kw_n + 1
    band = np.zeros((kh_n, in_w * ci_n, out_w * co_n), np.float32)
    for kh in range(kh_n):
        for kw in range(kw_n):
            blk = w[:, :, kh, kw].T                      # (C_in, C_out)
            for ow in range(out_w):
                iw = ow + kw
                band[kh, iw * ci_n:(iw + 1) * ci_n,
                     ow * co_n:(ow + 1) * co_n] = blk
    return jnp.asarray(band)


def _pool_lane_select(out_w, c):
    """Even/odd width-column selectors: (2, 2*out_w*c, out_w*c)."""
    s = np.zeros((2, 2 * out_w * c, out_w * c), np.float32)
    for p in range(out_w):
        for ci in range(c):
            s[0, (2 * p) * c + ci, p * c + ci] = 1.0
            s[1, (2 * p + 1) * c + ci, p * c + ci] = 1.0
    return jnp.asarray(s)


def _pool_row_select_batched(tb, in_rows, out_rows):
    """Block-diagonal selector picking row s*in_rows + 2p -> row s*out_rows + p."""
    s = np.zeros((tb * out_rows, tb * in_rows), np.float32)
    for b in range(tb):
        for p in range(out_rows):
            s[b * out_rows + p, b * in_rows + 2 * p] = 1.0
    return jnp.asarray(s)


def _sample_pick(tb, in_rows):
    """Selector picking row s*in_rows -> row s."""
    s = np.zeros((tb, tb * in_rows), np.float32)
    for b in range(tb):
        s[b, b * in_rows] = 1.0
    return jnp.asarray(s)


def prepare_params(params, tb=8):
    """Build band / selection matrices and pre-transposed FC weights (host-side)."""
    w3 = np.asarray(params["w3"], np.float32)            # (120, 400); cols over (c,h,w)
    # fc1 weight blocks indexed by pooled row ph:
    #   w3p[ph, pw*16+co, n] = w3[n, co*25 + ph*5 + pw]
    w3p = np.transpose(w3.reshape(_FC1, _C2_OUT, _P2, _P2),
                       (2, 3, 1, 0)).reshape(_P2, _P2 * _C2_OUT, _FC1)

    num_classes = int(np.asarray(params["w5"]).shape[0])
    nc_pad = max(128, ((num_classes + 127) // 128) * 128)   # lane-friendly logits
    w5t = np.zeros((_FC2, nc_pad), np.float32)
    w5t[:, :num_classes] = np.asarray(params["w5"], np.float32).T
    b5 = np.zeros((1, nc_pad), np.float32)
    b5[0, :num_classes] = np.asarray(params["b5"], np.float32)

    out_w1 = _IN_HW - _C1_K + 1     # conv1 output WIDTH (bias is tiled per width col)
    out_w2 = _P1 - _C2_K + 1        # conv2 output WIDTH

    return {
        "band1": _conv_band(params["w1"], _IN_HW),                    # (5, 32, 168)
        "bias1": jnp.asarray(np.tile(np.asarray(params["b1"], np.float32),
                                     out_w1).reshape(1, out_w1 * _C1_OUT)),
        "rowsel1": _pool_row_select_batched(tb, _IN_HW, _P1),         # (tb*14, tb*32)
        "sell1": _pool_lane_select(_P1, _C1_OUT),                     # (2, 168, 84)
        "band2": _conv_band(params["w2"], _P1),                       # (5, 84, 160)
        "bias2": jnp.asarray(np.tile(np.asarray(params["b2"], np.float32),
                                     out_w2).reshape(1, out_w2 * _C2_OUT)),
        "rowsel2": _pool_row_select_batched(tb, _P1, _P2),            # (tb*5, tb*14)
        "sell2": _pool_lane_select(_P2, _C2_OUT),                     # (2, 160, 80)
        "pick0": _sample_pick(tb, _P2),                               # (tb, tb*5)
        "w3p": jnp.asarray(w3p),                                      # (5, 80, 120)
        "b3": jnp.reshape(jnp.asarray(params["b3"], jnp.float32), (1, _FC1)),
        "w4t": jnp.asarray(np.asarray(params["w4"], np.float32).T),   # (120, 84)
        "b4": jnp.reshape(jnp.asarray(params["b4"], jnp.float32), (1, _FC2)),
        "w5t": jnp.asarray(w5t),                                      # (84, 128)
        "b5": jnp.asarray(b5),                                        # (1, 128)
        # Carries the un-padded num_classes via its static shape (jit-friendly).
        "b5_raw": jnp.reshape(jnp.asarray(params["b5"], jnp.float32),
                              (1, num_classes)),
    }


# ---------------------------------------------------------------------------
# Forward pass (matches CNNCifar.forward)
# ---------------------------------------------------------------------------
def cnn_cifar_forward(x, prep):
    """x: (B, 32, 32) -> logits (B, num_classes), one fused batch-tiled kernel."""
    B = x.shape[0]
    assert x.shape[1] == _IN_HW and x.shape[2] == _IN_HW, x.shape
    tb = prep["pick0"].shape[0]                       # samples per grid step
    nc = prep["b5_raw"].shape[1]                      # true num_classes
    nc_pad = prep["w5t"].shape[1]                     # lane-padded (128)

    x = x.astype(jnp.float32)
    b_pad = ((B + tb - 1) // tb) * tb
    if b_pad != B:
        x = jnp.pad(x, ((0, b_pad - B), (0, 0), (0, 0)))
    # Pack (sample, row) onto the sublane axis once in the wrapper (free reshape).
    x2 = x.reshape(b_pad * _IN_HW, _IN_HW)
    n_steps = b_pad // tb

    consts = (prep["band1"], prep["bias1"], prep["rowsel1"], prep["sell1"],
              prep["band2"], prep["bias2"], prep["rowsel2"], prep["sell2"],
              prep["pick0"], prep["w3p"], prep["b3"], prep["w4t"], prep["b4"],
              prep["w5t"], prep["b5"])

    def _const_spec(a):
        nd = a.ndim
        return pl.BlockSpec(a.shape, lambda b, _nd=nd: (0,) * _nd)   # VMEM-resident

    weight_bytes = int(sum(int(np.prod(a.shape)) * 4 for a in consts))
    per_step_flops = 2 * (
        (tb * _IN_HW) * _IN_HW * (_H1 * _C1_OUT) * _C1_K            # conv1 taps
        + (tb * _P1) * (tb * _IN_HW) * (_H1 * _C1_OUT)              # pool1 row select
        + 2 * (tb * _P1) * (_H1 * _C1_OUT) * (_P1 * _C1_OUT)        # pool1 lane select
        + (tb * _P1) * (_P1 * _C1_OUT) * (_H2 * _C2_OUT) * _C2_K    # conv2 taps
        + (tb * _P2) * (tb * _P1) * (_H2 * _C2_OUT)                 # pool2 row select
        + 2 * (tb * _P2) * (_H2 * _C2_OUT) * (_P2 * _C2_OUT)        # pool2 lane select
        + (tb * _P2) * (_P2 * _C2_OUT) * _FC1 * _P2                 # fc1 taps
        + tb * (tb * _P2) * _FC1                                    # fc1 pick
        + tb * _FC1 * _FC2 + tb * _FC2 * nc_pad)                    # fc2, fc3
    cost = pl.CostEstimate(
        flops=int(per_step_flops * n_steps), transcendentals=0,
        bytes_accessed=int(b_pad * _IN_HW * _IN_HW * 4 + weight_bytes
                           + b_pad * nc_pad * 4))

    out = pl.pallas_call(
        _cnn_cifar_kernel,
        out_shape=jax.ShapeDtypeStruct((b_pad, nc_pad), jnp.float32),
        grid=(n_steps,),
        in_specs=[pl.BlockSpec((tb * _IN_HW, _IN_HW), lambda b: (b, 0))]
                 + [_const_spec(a) for a in consts],
        out_specs=pl.BlockSpec((tb, nc_pad), lambda b: (b, 0)),
        compiler_params=pltpu.CompilerParams(
            dimension_semantics=("parallel",)),
        cost_estimate=cost,
    )(x2, *consts)
    return out[:B, :nc]


# ---------------------------------------------------------------------------
# Parameters (deterministic xavier-uniform weights, zero biases)
# ---------------------------------------------------------------------------
def _xavier_uniform(key, shape, fan_in, fan_out):
    bound = (6.0 / (fan_in + fan_out)) ** 0.5
    return jax.random.uniform(key, shape, jnp.float32, -bound, bound)


def init_params(key, n_in_channels=1, num_classes=10):
    ks = jax.random.split(key, 5)
    return {
        "w1": _xavier_uniform(ks[0], (6, n_in_channels, 5, 5),
                              n_in_channels * 25, 6 * 25),
        "b1": jnp.zeros((6,), jnp.float32),
        "w2": _xavier_uniform(ks[1], (16, 6, 5, 5), 6 * 25, 16 * 25),
        "b2": jnp.zeros((16,), jnp.float32),
        "w3": _xavier_uniform(ks[2], (120, 400), 400, 120),
        "b3": jnp.zeros((120,), jnp.float32),
        "w4": _xavier_uniform(ks[3], (84, 120), 120, 84),
        "b4": jnp.zeros((84,), jnp.float32),
        "w5": _xavier_uniform(ks[4], (num_classes, 84), 84, num_classes),
        "b5": jnp.zeros((num_classes,), jnp.float32),
    }


# ---------------------------------------------------------------------------
# Pure-JAX reference (validation only; HIGHEST precision so the 1e-4 check is fair)
# ---------------------------------------------------------------------------
def reference_forward(x, params):
    hp = jax.lax.Precision.HIGHEST
    x = x[:, None, :, :].astype(jnp.float32)

    def conv_relu(v, w, b):
        y = lax.conv_general_dilated(
            v, w, window_strides=(1, 1), padding="VALID",
            dimension_numbers=("NCHW", "OIHW", "NCHW"), precision=hp)
        return jnp.maximum(y + b[None, :, None, None], 0.0)

    def pool(v):
        B, C, H, W = v.shape
        return v.reshape(B, C, H // 2, 2, W // 2, 2).max(axis=(3, 5))

    x = pool(conv_relu(x, params["w1"], params["b1"]))
    x = pool(conv_relu(x, params["w2"], params["b2"]))
    x = x.reshape(x.shape[0], -1)                       # NCHW flatten (c, h, w)
    x = jnp.maximum(jnp.dot(x, params["w3"].T, precision=hp) + params["b3"], 0.0)
    x = jnp.maximum(jnp.dot(x, params["w4"].T, precision=hp) + params["b4"], 0.0)
    return jnp.dot(x, params["w5"].T, precision=hp) + params["b5"]


if __name__ == "__main__":
    key = jax.random.PRNGKey(0)
    k_param, k_x = jax.random.split(key)

    num_classes = 10
    params = init_params(k_param, n_in_channels=1, num_classes=num_classes)
    prep = prepare_params(params, tb=8)          # host-side weight prep (outside jit)

    # Forward requires 32x32 spatial so that the 16*5*5 flatten is valid.
    # B=12 with TB=8 exercises both the batch-padding path and a 2-step grid.
    B = 12
    x = jax.random.normal(k_x, (B, 32, 32), dtype=jnp.float32)

    fwd = jax.jit(cnn_cifar_forward)
    out = jax.block_until_ready(fwd(x, prep))

    assert out.shape == (B, num_classes), out.shape
    assert bool(jnp.all(jnp.isfinite(out)))

    ref = reference_forward(x, params)
    max_err = float(jnp.max(jnp.abs(out - ref)))
    assert max_err < 1e-4, f"mismatch vs pure-JAX reference: {max_err}"

    print("KERNEL_OK")
</pallas_src>

<mosaic_0001>
module attributes {stable_mosaic.version = 11 : i64} {
  func.func @_cnn_cifar_kernel(%arg0: i32, %arg1: memref<256x32xf32, #tpu.memory_space<vmem>>, %arg2: memref<5x32x168xf32, #tpu.memory_space<vmem>>, %arg3: memref<1x168xf32, #tpu.memory_space<vmem>>, %arg4: memref<112x256xf32, #tpu.memory_space<vmem>>, %arg5: memref<2x168x84xf32, #tpu.memory_space<vmem>>, %arg6: memref<5x84x160xf32, #tpu.memory_space<vmem>>, %arg7: memref<1x160xf32, #tpu.memory_space<vmem>>, %arg8: memref<40x112xf32, #tpu.memory_space<vmem>>, %arg9: memref<2x160x80xf32, #tpu.memory_space<vmem>>, %arg10: memref<8x40xf32, #tpu.memory_space<vmem>>, %arg11: memref<5x80x120xf32, #tpu.memory_space<vmem>>, %arg12: memref<1x120xf32, #tpu.memory_space<vmem>>, %arg13: memref<120x84xf32, #tpu.memory_space<vmem>>, %arg14: memref<1x84xf32, #tpu.memory_space<vmem>>, %arg15: memref<84x128xf32, #tpu.memory_space<vmem>>, %arg16: memref<1x128xf32, #tpu.memory_space<vmem>>, %arg17: memref<8x128xf32, #tpu.memory_space<vmem>>) attributes {dimension_semantics = [#tpu.dimension_semantics<parallel>], iteration_bounds = array<i64: 2>, scalar_prefetch = 0 : i64, scratch_operands = 0 : i64, tpu.core_type = #tpu.core_type<tc>, window_params = [{transform_indices = @transform_0, window_bounds = array<i64: 256, 32>}, {pipeline_mode = #tpu.pipeline_mode<synchronous>, transform_indices = @transform_1, window_bounds = array<i64: 5, 32, 168>}, {pipeline_mode = #tpu.pipeline_mode<synchronous>, transform_indices = @transform_2, window_bounds = array<i64: 1, 168>}, {pipeline_mode = #tpu.pipeline_mode<synchronous>, transform_indices = @transform_3, window_bounds = array<i64: 112, 256>}, {pipeline_mode = #tpu.pipeline_mode<synchronous>, transform_indices = @transform_4, window_bounds = array<i64: 2, 168, 84>}, {pipeline_mode = #tpu.pipeline_mode<synchronous>, transform_indices = @transform_5, window_bounds = array<i64: 5, 84, 160>}, {pipeline_mode = #tpu.pipeline_mode<synchronous>, transform_indices = @transform_6, window_bounds = array<i64: 1, 160>}, {pipeline_mode = #tpu.pipeline_mode<synchronous>, transform_indices = @transform_7, window_bounds = array<i64: 40, 112>}, {pipeline_mode = #tpu.pipeline_mode<synchronous>, transform_indices = @transform_8, window_bounds = array<i64: 2, 160, 80>}, {pipeline_mode = #tpu.pipeline_mode<synchronous>, transform_indices = @transform_9, window_bounds = array<i64: 8, 40>}, {pipeline_mode = #tpu.pipeline_mode<synchronous>, transform_indices = @transform_10, window_bounds = array<i64: 5, 80, 120>}, {pipeline_mode = #tpu.pipeline_mode<synchronous>, transform_indices = @transform_11, window_bounds = array<i64: 1, 120>}, {pipeline_mode = #tpu.pipeline_mode<synchronous>, transform_indices = @transform_12, window_bounds = array<i64: 120, 84>}, {pipeline_mode = #tpu.pipeline_mode<synchronous>, transform_indices = @transform_13, window_bounds = array<i64: 1, 84>}, {pipeline_mode = #tpu.pipeline_mode<synchronous>, transform_indices = @transform_14, window_bounds = array<i64: 84, 128>}, {pipeline_mode = #tpu.pipeline_mode<synchronous>, transform_indices = @transform_15, window_bounds = array<i64: 1, 128>}, {transform_indices = @transform_16, window_bounds = array<i64: 8, 128>}]} {
    %c0 = arith.constant 0 : index
    %c0_0 = arith.constant 0 : index
    %0 = vector.load %arg1[%c0, %c0_0] : memref<256x32xf32, #tpu.memory_space<vmem>>, vector<256x32xf32>
    %c0_1 = arith.constant 0 : index
    %c0_2 = arith.constant 0 : index
    %c0_3 = arith.constant 0 : index
    %1 = vector.load %arg2[%c0_1, %c0_2, %c0_3] : memref<5x32x168xf32, #tpu.memory_space<vmem>>, vector<1x32x168xf32>
    %2 = vector.shape_cast %1 : vector<1x32x168xf32> to vector<32x168xf32>
    %cst = arith.constant dense<0.000000e+00> : vector<256x168xf32>
    %3 = tpu.matmul %0, %2, %cst {dimension_numbers = #tpu.dot_dimension_numbers<[1], [0], [0], [1], [0, 0, 1, 1], [], []>} : vector<256x32xf32>, vector<32x168xf32>, vector<256x168xf32> -> vector<256x168xf32>
    %4 = vector.extract_strided_slice %0 {offsets = [1, 0], sizes = [255, 32], strides = [1, 1]} : vector<256x32xf32> to vector<255x32xf32>
    %5 = vector.extract_strided_slice %0 {offsets = [0, 0], sizes = [1, 32], strides = [1, 1]} : vector<256x32xf32> to vector<1x32xf32>
    %6 = tpu.concatenate %4, %5 in 0 : vector<255x32xf32>, vector<1x32xf32> -> vector<256x32xf32>
    %c1 = arith.constant 1 : index
    %c0_4 = arith.constant 0 : index
    %c0_5 = arith.constant 0 : index
    %7 = vector.load %arg2[%c1, %c0_4, %c0_5] : memref<5x32x168xf32, #tpu.memory_space<vmem>>, vector<1x32x168xf32>
    %8 = vector.shape_cast %7 : vector<1x32x168xf32> to vector<32x168xf32>
    %cst_6 = arith.constant dense<0.000000e+00> : vector<256x168xf32>
    %9 = tpu.matmul %6, %8, %cst_6 {dimension_numbers = #tpu.dot_dimension_numbers<[1], [0], [0], [1], [0, 0, 1, 1], [], []>} : vector<256x32xf32>, vector<32x168xf32>, vector<256x168xf32> -> vector<256x168xf32>
    %10 = arith.addf %3, %9 : vector<256x168xf32>
    %11 = vector.extract_strided_slice %0 {offsets = [2, 0], sizes = [254, 32], strides = [1, 1]} : vector<256x32xf32> to vector<254x32xf32>
    %12 = vector.extract_strided_slice %0 {offsets = [0, 0], sizes = [2, 32], strides = [1, 1]} : vector<256x32xf32> to vector<2x32xf32>
    %13 = tpu.concatenate %11, %12 in 0 : vector<254x32xf32>, vector<2x32xf32> -> vector<256x32xf32>
    %c2 = arith.constant 2 : index
    %c0_7 = arith.constant 0 : index
    %c0_8 = arith.constant 0 : index
    %14 = vector.load %arg2[%c2, %c0_7, %c0_8] : memref<5x32x168xf32, #tpu.memory_space<vmem>>, vector<1x32x168xf32>
    %15 = vector.shape_cast %14 : vector<1x32x168xf32> to vector<32x168xf32>
    %cst_9 = arith.constant dense<0.000000e+00> : vector<256x168xf32>
    %16 = tpu.matmul %13, %15, %cst_9 {dimension_numbers = #tpu.dot_dimension_numbers<[1], [0], [0], [1], [0, 0, 1, 1], [], []>} : vector<256x32xf32>, vector<32x168xf32>, vector<256x168xf32> -> vector<256x168xf32>
    %17 = arith.addf %10, %16 : vector<256x168xf32>
    %18 = vector.extract_strided_slice %0 {offsets = [3, 0], sizes = [253, 32], strides = [1, 1]} : vector<256x32xf32> to vector<253x32xf32>
    %19 = vector.extract_strided_slice %0 {offsets = [0, 0], sizes = [3, 32], strides = [1, 1]} : vector<256x32xf32> to vector<3x32xf32>
    %20 = tpu.concatenate %18, %19 in 0 : vector<253x32xf32>, vector<3x32xf32> -> vector<256x32xf32>
    %c3 = arith.constant 3 : index
    %c0_10 = arith.constant 0 : index
    %c0_11 = arith.constant 0 : index
    %21 = vector.load %arg2[%c3, %c0_10, %c0_11] : memref<5x32x168xf32, #tpu.memory_space<vmem>>, vector<1x32x168xf32>
    %22 = vector.shape_cast %21 : vector<1x32x168xf32> to vector<32x168xf32>
    %cst_12 = arith.constant dense<0.000000e+00> : vector<256x168xf32>
    %23 = tpu.matmul %20, %22, %cst_12 {dimension_numbers = #tpu.dot_dimension_numbers<[1], [0], [0], [1], [0, 0, 1, 1], [], []>} : vector<256x32xf32>, vector<32x168xf32>, vector<256x168xf32> -> vector<256x168xf32>
    %24 = arith.addf %17, %23 : vector<256x168xf32>
    %25 = vector.extract_strided_slice %0 {offsets = [4, 0], sizes = [252, 32], strides = [1, 1]} : vector<256x32xf32> to vector<252x32xf32>
    %26 = vector.extract_strided_slice %0 {offsets = [0, 0], sizes = [4, 32], strides = [1, 1]} : vector<256x32xf32> to vector<4x32xf32>
    %27 = tpu.concatenate %25, %26 in 0 : vector<252x32xf32>, vector<4x32xf32> -> vector<256x32xf32>
    %c4 = arith.constant 4 : index
    %c0_13 = arith.constant 0 : index
    %c0_14 = arith.constant 0 : index
    %28 = vector.load %arg2[%c4, %c0_13, %c0_14] : memref<5x32x168xf32, #tpu.memory_space<vmem>>, vector<1x32x168xf32>
    %29 = vector.shape_cast %28 : vector<1x32x168xf32> to vector<32x168xf32>
    %cst_15 = arith.constant dense<0.000000e+00> : vector<256x168xf32>
    %30 = tpu.matmul %27, %29, %cst_15 {dimension_numbers = #tpu.dot_dimension_numbers<[1], [0], [0], [1], [0, 0, 1, 1], [], []>} : vector<256x32xf32>, vector<32x168xf32>, vector<256x168xf32> -> vector<256x168xf32>
    %31 = arith.addf %24, %30 : vector<256x168xf32>
    %c0_16 = arith.constant 0 : index
    %c0_17 = arith.constant 0 : index
    %32 = vector.load %arg3[%c0_16, %c0_17] : memref<1x168xf32, #tpu.memory_space<vmem>>, vector<1x168xf32>
    %33 = vector.broadcast %32 : vector<1x168xf32> to vector<256x168xf32>
    %34 = arith.addf %31, %33 : vector<256x168xf32>
    %cst_18 = arith.constant 0.000000e+00 : f32
    %35 = vector.broadcast %cst_18 : f32 to vector<256x168xf32>
    %36 = arith.maximumf %34, %35 : vector<256x168xf32>
    %37 = vector.extract_strided_slice %36 {offsets = [1, 0], sizes = [255, 168], strides = [1, 1]} : vector<256x168xf32> to vector<255x168xf32>
    %38 = vector.extract_strided_slice %36 {offsets = [0, 0], sizes = [1, 168], strides = [1, 1]} : vector<256x168xf32> to vector<1x168xf32>
    %39 = tpu.concatenate %37, %38 in 0 : vector<255x168xf32>, vector<1x168xf32> -> vector<256x168xf32>
    %40 = arith.maximumf %36, %39 : vector<256x168xf32>
    %c0_19 = arith.constant 0 : index
    %c0_20 = arith.constant 0 : index
    %41 = vector.load %arg4[%c0_19, %c0_20] : memref<112x256xf32, #tpu.memory_space<vmem>>, vector<112x256xf32>
    %cst_21 = arith.constant dense<0.000000e+00> : vector<112x168xf32>
    %42 = tpu.matmul %41, %40, %cst_21 {dimension_numbers = #tpu.dot_dimension_numbers<[1], [0], [0], [1], [0, 0, 1, 1], [], []>} : vector<112x256xf32>, vector<256x168xf32>, vector<112x168xf32> -> vector<112x168xf32>
    %c0_22 = arith.constant 0 : index
    %c0_23 = arith.constant 0 : index
    %c0_24 = arith.constant 0 : index
    %43 = vector.load %arg5[%c0_22, %c0_23, %c0_24] : memref<2x168x84xf32, #tpu.memory_space<vmem>>, vector<1x168x84xf32>
    %44 = vector.shape_cast %43 : vector<1x168x84xf32> to vector<168x84xf32>
    %cst_25 = arith.constant dense<0.000000e+00> : vector<112x84xf32>
    %45 = tpu.matmul %42, %44, %cst_25 {dimension_numbers = #tpu.dot_dimension_numbers<[1], [0], [0], [1], [0, 0, 1, 1], [], []>} : vector<112x168xf32>, vector<168x84xf32>, vector<112x84xf32> -> vector<112x84xf32>
    %c1_26 = arith.constant 1 : index
    %c0_27 = arith.constant 0 : index
    %c0_28 = arith.constant 0 : index
    %46 = vector.load %arg5[%c1_26, %c0_27, %c0_28] : memref<2x168x84xf32, #tpu.memory_space<vmem>>, vector<1x168x84xf32>
    %47 = vector.shape_cast %46 : vector<1x168x84xf32> to vector<168x84xf32>
    %cst_29 = arith.constant dense<0.000000e+00> : vector<112x84xf32>
    %48 = tpu.matmul %42, %47, %cst_29 {dimension_numbers = #tpu.dot_dimension_numbers<[1], [0], [0], [1], [0, 0, 1, 1], [], []>} : vector<112x168xf32>, vector<168x84xf32>, vector<112x84xf32> -> vector<112x84xf32>
    %49 = arith.maximumf %45, %48 : vector<112x84xf32>
    %c0_30 = arith.constant 0 : index
    %c0_31 = arith.constant 0 : index
    %c0_32 = arith.constant 0 : index
    %50 = vector.load %arg6[%c0_30, %c0_31, %c0_32] : memref<5x84x160xf32, #tpu.memory_space<vmem>>, vector<1x84x160xf32>
    %51 = vector.shape_cast %50 : vector<1x84x160xf32> to vector<84x160xf32>
    %cst_33 = arith.constant dense<0.000000e+00> : vector<112x160xf32>
    %52 = tpu.matmul %49, %51, %cst_33 {dimension_numbers = #tpu.dot_dimension_numbers<[1], [0], [0], [1], [0, 0, 1, 1], [], []>} : vector<112x84xf32>, vector<84x160xf32>, vector<112x160xf32> -> vector<112x160xf32>
    %53 = vector.extract_strided_slice %49 {offsets = [1, 0], sizes = [111, 84], strides = [1, 1]} : vector<112x84xf32> to vector<111x84xf32>
    %54 = vector.extract_strided_slice %49 {offsets = [0, 0], sizes = [1, 84], strides = [1, 1]} : vector<112x84xf32> to vector<1x84xf32>
    %55 = tpu.concatenate %53, %54 in 0 : vector<111x84xf32>, vector<1x84xf32> -> vector<112x84xf32>
    %c1_34 = arith.constant 1 : index
    %c0_35 = arith.constant 0 : index
    %c0_36 = arith.constant 0 : index
    %56 = vector.load %arg6[%c1_34, %c0_35, %c0_36] : memref<5x84x160xf32, #tpu.memory_space<vmem>>, vector<1x84x160xf32>
    %57 = vector.shape_cast %56 : vector<1x84x160xf32> to vector<84x160xf32>
    %cst_37 = arith.constant dense<0.000000e+00> : vector<112x160xf32>
    %58 = tpu.matmul %55, %57, %cst_37 {dimension_numbers = #tpu.dot_dimension_numbers<[1], [0], [0], [1], [0, 0, 1, 1], [], []>} : vector<112x84xf32>, vector<84x160xf32>, vector<112x160xf32> -> vector<112x160xf32>
    %59 = arith.addf %52, %58 : vector<112x160xf32>
    %60 = vector.extract_strided_slice %49 {offsets = [2, 0], sizes = [110, 84], strides = [1, 1]} : vector<112x84xf32> to vector<110x84xf32>
    %61 = vector.extract_strided_slice %49 {offsets = [0, 0], sizes = [2, 84], strides = [1, 1]} : vector<112x84xf32> to vector<2x84xf32>
    %62 = tpu.concatenate %60, %61 in 0 : vector<110x84xf32>, vector<2x84xf32> -> vector<112x84xf32>
    %c2_38 = arith.constant 2 : index
    %c0_39 = arith.constant 0 : index
    %c0_40 = arith.constant 0 : index
    %63 = vector.load %arg6[%c2_38, %c0_39, %c0_40] : memref<5x84x160xf32, #tpu.memory_space<vmem>>, vector<1x84x160xf32>
    %64 = vector.shape_cast %63 : vector<1x84x160xf32> to vector<84x160xf32>
    %cst_41 = arith.constant dense<0.000000e+00> : vector<112x160xf32>
    %65 = tpu.matmul %62, %64, %cst_41 {dimension_numbers = #tpu.dot_dimension_numbers<[1], [0], [0], [1], [0, 0, 1, 1], [], []>} : vector<112x84xf32>, vector<84x160xf32>, vector<112x160xf32> -> vector<112x160xf32>
    %66 = arith.addf %59, %65 : vector<112x160xf32>
    %67 = vector.extract_strided_slice %49 {offsets = [3, 0], sizes = [109, 84], strides = [1, 1]} : vector<112x84xf32> to vector<109x84xf32>
    %68 = vector.extract_strided_slice %49 {offsets = [0, 0], sizes = [3, 84], strides = [1, 1]} : vector<112x84xf32> to vector<3x84xf32>
    %69 = tpu.concatenate %67, %68 in 0 : vector<109x84xf32>, vector<3x84xf32> -> vector<112x84xf32>
    %c3_42 = arith.constant 3 : index
    %c0_43 = arith.constant 0 : index
    %c0_44 = arith.constant 0 : index
    %70 = vector.load %arg6[%c3_42, %c0_43, %c0_44] : memref<5x84x160xf32, #tpu.memory_space<vmem>>, vector<1x84x160xf32>
    %71 = vector.shape_cast %70 : vector<1x84x160xf32> to vector<84x160xf32>
    %cst_45 = arith.constant dense<0.000000e+00> : vector<112x160xf32>
    %72 = tpu.matmul %69, %71, %cst_45 {dimension_numbers = #tpu.dot_dimension_numbers<[1], [0], [0], [1], [0, 0, 1, 1], [], []>} : vector<112x84xf32>, vector<84x160xf32>, vector<112x160xf32> -> vector<112x160xf32>
    %73 = arith.addf %66, %72 : vector<112x160xf32>
    %74 = vector.extract_strided_slice %49 {offsets = [4, 0], sizes = [108, 84], strides = [1, 1]} : vector<112x84xf32> to vector<108x84xf32>
    %75 = vector.extract_strided_slice %49 {offsets = [0, 0], sizes = [4, 84], strides = [1, 1]} : vector<112x84xf32> to vector<4x84xf32>
    %76 = tpu.concatenate %74, %75 in 0 : vector<108x84xf32>, vector<4x84xf32> -> vector<112x84xf32>
    %c4_46 = arith.constant 4 : index
    %c0_47 = arith.constant 0 : index
    %c0_48 = arith.constant 0 : index
    %77 = vector.load %arg6[%c4_46, %c0_47, %c0_48] : memref<5x84x160xf32, #tpu.memory_space<vmem>>, vector<1x84x160xf32>
    %78 = vector.shape_cast %77 : vector<1x84x160xf32> to vector<84x160xf32>
    %cst_49 = arith.constant dense<0.000000e+00> : vector<112x160xf32>
    %79 = tpu.matmul %76, %78, %cst_49 {dimension_numbers = #tpu.dot_dimension_numbers<[1], [0], [0], [1], [0, 0, 1, 1], [], []>} : vector<112x84xf32>, vector<84x160xf32>, vector<112x160xf32> -> vector<112x160xf32>
    %80 = arith.addf %73, %79 : vector<112x160xf32>
    %c0_50 = arith.constant 0 : index
    %c0_51 = arith.constant 0 : index
    %81 = vector.load %arg7[%c0_50, %c0_51] : memref<1x160xf32, #tpu.memory_space<vmem>>, vector<1x160xf32>
    %82 = vector.broadcast %81 : vector<1x160xf32> to vector<112x160xf32>
    %83 = arith.addf %80, %82 : vector<112x160xf32>
    %cst_52 = arith.constant 0.000000e+00 : f32
    %84 = vector.broadcast %cst_52 : f32 to vector<112x160xf32>
    %85 = arith.maximumf %83, %84 : vector<112x160xf32>
    %86 = vector.extract_strided_slice %85 {offsets = [1, 0], sizes = [111, 160], strides = [1, 1]} : vector<112x160xf32> to vector<111x160xf32>
    %87 = vector.extract_strided_slice %85 {offsets = [0, 0], sizes = [1, 160], strides = [1, 1]} : vector<112x160xf32> to vector<1x160xf32>
    %88 = tpu.concatenate %86, %87 in 0 : vector<111x160xf32>, vector<1x160xf32> -> vector<112x160xf32>
    %89 = arith.maximumf %85, %88 : vector<112x160xf32>
    %c0_53 = arith.constant 0 : index
    %c0_54 = arith.constant 0 : index
    %90 = vector.load %arg8[%c0_53, %c0_54] : memref<40x112xf32, #tpu.memory_space<vmem>>, vector<40x112xf32>
    %cst_55 = arith.constant dense<0.000000e+00> : vector<40x160xf32>
    %91 = tpu.matmul %90, %89, %cst_55 {dimension_numbers = #tpu.dot_dimension_numbers<[1], [0], [0], [1], [0, 0, 1, 1], [], []>} : vector<40x112xf32>, vector<112x160xf32>, vector<40x160xf32> -> vector<40x160xf32>
    %c0_56 = arith.constant 0 : index
    %c0_57 = arith.constant 0 : index
    %c0_58 = arith.constant 0 : index
    %92 = vector.load %arg9[%c0_56, %c0_57, %c0_58] : memref<2x160x80xf32, #tpu.memory_space<vmem>>, vector<1x160x80xf32>
    %93 = vector.shape_cast %92 : vector<1x160x80xf32> to vector<160x80xf32>
    %cst_59 = arith.constant dense<0.000000e+00> : vector<40x80xf32>
    %94 = tpu.matmul %91, %93, %cst_59 {dimension_numbers = #tpu.dot_dimension_numbers<[1], [0], [0], [1], [0, 0, 1, 1], [], []>} : vector<40x160xf32>, vector<160x80xf32>, vector<40x80xf32> -> vector<40x80xf32>
    %c1_60 = arith.constant 1 : index
    %c0_61 = arith.constant 0 : index
    %c0_62 = arith.constant 0 : index
    %95 = vector.load %arg9[%c1_60, %c0_61, %c0_62] : memref<2x160x80xf32, #tpu.memory_space<vmem>>, vector<1x160x80xf32>
    %96 = vector.shape_cast %95 : vector<1x160x80xf32> to vector<160x80xf32>
    %cst_63 = arith.constant dense<0.000000e+00> : vector<40x80xf32>
    %97 = tpu.matmul %91, %96, %cst_63 {dimension_numbers = #tpu.dot_dimension_numbers<[1], [0], [0], [1], [0, 0, 1, 1], [], []>} : vector<40x160xf32>, vector<160x80xf32>, vector<40x80xf32> -> vector<40x80xf32>
    %98 = arith.maximumf %94, %97 : vector<40x80xf32>
    %c0_64 = arith.constant 0 : index
    %c0_65 = arith.constant 0 : index
    %c0_66 = arith.constant 0 : index
    %99 = vector.load %arg11[%c0_64, %c0_65, %c0_66] : memref<5x80x120xf32, #tpu.memory_space<vmem>>, vector<1x80x120xf32>
    %100 = vector.shape_cast %99 : vector<1x80x120xf32> to vector<80x120xf32>
    %cst_67 = arith.constant dense<0.000000e+00> : vector<40x120xf32>
    %101 = tpu.matmul %98, %100, %cst_67 {dimension_numbers = #tpu.dot_dimension_numbers<[1], [0], [0], [1], [0, 0, 1, 1], [], []>} : vector<40x80xf32>, vector<80x120xf32>, vector<40x120xf32> -> vector<40x120xf32>
    %102 = vector.extract_strided_slice %98 {offsets = [1, 0], sizes = [39, 80], strides = [1, 1]} : vector<40x80xf32> to vector<39x80xf32>
    %103 = vector.extract_strided_slice %98 {offsets = [0, 0], sizes = [1, 80], strides = [1, 1]} : vector<40x80xf32> to vector<1x80xf32>
    %104 = tpu.concatenate %102, %103 in 0 : vector<39x80xf32>, vector<1x80xf32> -> vector<40x80xf32>
    %c1_68 = arith.constant 1 : index
    %c0_69 = arith.constant 0 : index
    %c0_70 = arith.constant 0 : index
    %105 = vector.load %arg11[%c1_68, %c0_69, %c0_70] : memref<5x80x120xf32, #tpu.memory_space<vmem>>, vector<1x80x120xf32>
    %106 = vector.shape_cast %105 : vector<1x80x120xf32> to vector<80x120xf32>
    %cst_71 = arith.constant dense<0.000000e+00> : vector<40x120xf32>
    %107 = tpu.matmul %104, %106, %cst_71 {dimension_numbers = #tpu.dot_dimension_numbers<[1], [0], [0], [1], [0, 0, 1, 1], [], []>} : vector<40x80xf32>, vector<80x120xf32>, vector<40x120xf32> -> vector<40x120xf32>
    %108 = arith.addf %101, %107 : vector<40x120xf32>
    %109 = vector.extract_strided_slice %98 {offsets = [2, 0], sizes = [38, 80], strides = [1, 1]} : vector<40x80xf32> to vector<38x80xf32>
    %110 = vector.extract_strided_slice %98 {offsets = [0, 0], sizes = [2, 80], strides = [1, 1]} : vector<40x80xf32> to vector<2x80xf32>
    %111 = tpu.concatenate %109, %110 in 0 : vector<38x80xf32>, vector<2x80xf32> -> vector<40x80xf32>
    %c2_72 = arith.constant 2 : index
    %c0_73 = arith.constant 0 : index
    %c0_74 = arith.constant 0 : index
    %112 = vector.load %arg11[%c2_72, %c0_73, %c0_74] : memref<5x80x120xf32, #tpu.memory_space<vmem>>, vector<1x80x120xf32>
    %113 = vector.shape_cast %112 : vector<1x80x120xf32> to vector<80x120xf32>
    %cst_75 = arith.constant dense<0.000000e+00> : vector<40x120xf32>
    %114 = tpu.matmul %111, %113, %cst_75 {dimension_numbers = #tpu.dot_dimension_numbers<[1], [0], [0], [1], [0, 0, 1, 1], [], []>} : vector<40x80xf32>, vector<80x120xf32>, vector<40x120xf32> -> vector<40x120xf32>
    %115 = arith.addf %108, %114 : vector<40x120xf32>
    %116 = vector.extract_strided_slice %98 {offsets = [3, 0], sizes = [37, 80], strides = [1, 1]} : vector<40x80xf32> to vector<37x80xf32>
    %117 = vector.extract_strided_slice %98 {offsets = [0, 0], sizes = [3, 80], strides = [1, 1]} : vector<40x80xf32> to vector<3x80xf32>
    %118 = tpu.concatenate %116, %117 in 0 : vector<37x80xf32>, vector<3x80xf32> -> vector<40x80xf32>
    %c3_76 = arith.constant 3 : index
    %c0_77 = arith.constant 0 : index
    %c0_78 = arith.constant 0 : index
    %119 = vector.load %arg11[%c3_76, %c0_77, %c0_78] : memref<5x80x120xf32, #tpu.memory_space<vmem>>, vector<1x80x120xf32>
    %120 = vector.shape_cast %119 : vector<1x80x120xf32> to vector<80x120xf32>
    %cst_79 = arith.constant dense<0.000000e+00> : vector<40x120xf32>
    %121 = tpu.matmul %118, %120, %cst_79 {dimension_numbers = #tpu.dot_dimension_numbers<[1], [0], [0], [1], [0, 0, 1, 1], [], []>} : vector<40x80xf32>, vector<80x120xf32>, vector<40x120xf32> -> vector<40x120xf32>
    %122 = arith.addf %115, %121 : vector<40x120xf32>
    %123 = vector.extract_strided_slice %98 {offsets = [4, 0], sizes = [36, 80], strides = [1, 1]} : vector<40x80xf32> to vector<36x80xf32>
    %124 = vector.extract_strided_slice %98 {offsets = [0, 0], sizes = [4, 80], strides = [1, 1]} : vector<40x80xf32> to vector<4x80xf32>
    %125 = tpu.concatenate %123, %124 in 0 : vector<36x80xf32>, vector<4x80xf32> -> vector<40x80xf32>
    %c4_80 = arith.constant 4 : index
    %c0_81 = arith.constant 0 : index
    %c0_82 = arith.constant 0 : index
    %126 = vector.load %arg11[%c4_80, %c0_81, %c0_82] : memref<5x80x120xf32, #tpu.memory_space<vmem>>, vector<1x80x120xf32>
    %127 = vector.shape_cast %126 : vector<1x80x120xf32> to vector<80x120xf32>
    %cst_83 = arith.constant dense<0.000000e+00> : vector<40x120xf32>
    %128 = tpu.matmul %125, %127, %cst_83 {dimension_numbers = #tpu.dot_dimension_numbers<[1], [0], [0], [1], [0, 0, 1, 1], [], []>} : vector<40x80xf32>, vector<80x120xf32>, vector<40x120xf32> -> vector<40x120xf32>
    %129 = arith.addf %122, %128 : vector<40x120xf32>
    %c0_84 = arith.constant 0 : index
    %c0_85 = arith.constant 0 : index
    %130 = vector.load %arg10[%c0_84, %c0_85] : memref<8x40xf32, #tpu.memory_space<vmem>>, vector<8x40xf32>
    %cst_86 = arith.constant dense<0.000000e+00> : vector<8x120xf32>
    %131 = tpu.matmul %130, %129, %cst_86 {dimension_numbers = #tpu.dot_dimension_numbers<[1], [0], [0], [1], [0, 0, 1, 1], [], []>} : vector<8x40xf32>, vector<40x120xf32>, vector<8x120xf32> -> vector<8x120xf32>
    %c0_87 = arith.constant 0 : index
    %c0_88 = arith.constant 0 : index
    %132 = vector.load %arg12[%c0_87, %c0_88] : memref<1x120xf32, #tpu.memory_space<vmem>>, vector<1x120xf32>
    %133 = vector.broadcast %132 : vector<1x120xf32> to vector<8x120xf32>
    %134 = arith.addf %131, %133 : vector<8x120xf32>
    %cst_89 = arith.constant 0.000000e+00 : f32
    %135 = vector.broadcast %cst_89 : f32 to vector<8x120xf32>
    %136 = arith.maximumf %134, %135 : vector<8x120xf32>
    %c0_90 = arith.constant 0 : index
    %c0_91 = arith.constant 0 : index
    %137 = vector.load %arg13[%c0_90, %c0_91] : memref<120x84xf32, #tpu.memory_space<vmem>>, vector<120x84xf32>
    %cst_92 = arith.constant dense<0.000000e+00> : vector<8x84xf32>
    %138 = tpu.matmul %136, %137, %cst_92 {dimension_numbers = #tpu.dot_dimension_numbers<[1], [0], [0], [1], [0, 0, 1, 1], [], []>} : vector<8x120xf32>, vector<120x84xf32>, vector<8x84xf32> -> vector<8x84xf32>
    %c0_93 = arith.constant 0 : index
    %c0_94 = arith.constant 0 : index
    %139 = vector.load %arg14[%c0_93, %c0_94] : memref<1x84xf32, #tpu.memory_space<vmem>>, vector<1x84xf32>
    %140 = vector.broadcast %139 : vector<1x84xf32> to vector<8x84xf32>
    %141 = arith.addf %138, %140 : vector<8x84xf32>
    %cst_95 = arith.constant 0.000000e+00 : f32
    %142 = vector.broadcast %cst_95 : f32 to vector<8x84xf32>
    %143 = arith.maximumf %141, %142 : vector<8x84xf32>
    %c0_96 = arith.constant 0 : index
    %c0_97 = arith.constant 0 : index
    %144 = vector.load %arg15[%c0_96, %c0_97] : memref<84x128xf32, #tpu.memory_space<vmem>>, vector<84x128xf32>
    %cst_98 = arith.constant dense<0.000000e+00> : vector<8x128xf32>
    %145 = tpu.matmul %143, %144, %cst_98 {dimension_numbers = #tpu.dot_dimension_numbers<[1], [0], [0], [1], [0, 0, 1, 1], [], []>} : vector<8x84xf32>, vector<84x128xf32>, vector<8x128xf32> -> vector<8x128xf32>
    %c0_99 = arith.constant 0 : index
    %c0_100 = arith.constant 0 : index
    %146 = vector.load %arg16[%c0_99, %c0_100] : memref<1x128xf32, #tpu.memory_space<vmem>>, vector<1x128xf32>
    %147 = vector.broadcast %146 : vector<1x128xf32> to vector<8x128xf32>
    %148 = arith.addf %145, %147 : vector<8x128xf32>
    %c0_101 = arith.constant 0 : index
    %c0_102 = arith.constant 0 : index
    %149 = vector.load %arg17[%c0_101, %c0_102] : memref<8x128xf32, #tpu.memory_space<vmem>>, vector<8x128xf32>
    tpu.vector_store %arg17[%c0_101, %c0_102], %148 {strides = array<i32>} : memref<8x128xf32, #tpu.memory_space<vmem>>, vector<8x128xf32>,
    return
  }
  func.func @transform_0(%arg0: i32) -> (i32, i32) {
    %c0_i32 = arith.constant 0 : i32
    %c0_i32_0 = arith.constant 0 : i32
    return %arg0, %c0_i32 : i32, i32
  }
  func.func @transform_1(%arg0: i32) -> (i32, i32, i32) {
    %c0_i32 = arith.constant 0 : i32
    %c0_i32_0 = arith.constant 0 : i32
    %c0_i32_1 = arith.constant 0 : i32
    %c0_i32_2 = arith.constant 0 : i32
    return %c0_i32, %c0_i32_0, %c0_i32_1 : i32, i32, i32
  }
  func.func @transform_2(%arg0: i32) -> (i32, i32) {
    %c0_i32 = arith.constant 0 : i32
    %c0_i32_0 = arith.constant 0 : i32
    %c0_i32_1 = arith.constant 0 : i32
    return %c0_i32, %c0_i32_0 : i32, i32
  }
  func.func @transform_3(%arg0: i32) -> (i32, i32) {
    %c0_i32 = arith.constant 0 : i32
    %c0_i32_0 = arith.constant 0 : i32
    %c0_i32_1 = arith.constant 0 : i32
    return %c0_i32, %c0_i32_0 : i32, i32
  }
  func.func @transform_4(%arg0: i32) -> (i32, i32, i32) {
    %c0_i32 = arith.constant 0 : i32
    %c0_i32_0 = arith.constant 0 : i32
    %c0_i32_1 = arith.constant 0 : i32
    %c0_i32_2 = arith.constant 0 : i32
    return %c0_i32, %c0_i32_0, %c0_i32_1 : i32, i32, i32
  }
  func.func @transform_5(%arg0: i32) -> (i32, i32, i32) {
    %c0_i32 = arith.constant 0 : i32
    %c0_i32_0 = arith.constant 0 : i32
    %c0_i32_1 = arith.constant 0 : i32
    %c0_i32_2 = arith.constant 0 : i32
    return %c0_i32, %c0_i32_0, %c0_i32_1 : i32, i32, i32
  }
  func.func @transform_6(%arg0: i32) -> (i32, i32) {
    %c0_i32 = arith.constant 0 : i32
    %c0_i32_0 = arith.constant 0 : i32
    %c0_i32_1 = arith.constant 0 : i32
    return %c0_i32, %c0_i32_0 : i32, i32
  }
  func.func @transform_7(%arg0: i32) -> (i32, i32) {
    %c0_i32 = arith.constant 0 : i32
    %c0_i32_0 = arith.constant 0 : i32
    %c0_i32_1 = arith.constant 0 : i32
    return %c0_i32, %c0_i32_0 : i32, i32
  }
  func.func @transform_8(%arg0: i32) -> (i32, i32, i32) {
    %c0_i32 = arith.constant 0 : i32
    %c0_i32_0 = arith.constant 0 : i32
    %c0_i32_1 = arith.constant 0 : i32
    %c0_i32_2 = arith.constant 0 : i32
    return %c0_i32, %c0_i32_0, %c0_i32_1 : i32, i32, i32
  }
  func.func @transform_9(%arg0: i32) -> (i32, i32) {
    %c0_i32 = arith.constant 0 : i32
    %c0_i32_0 = arith.constant 0 : i32
    %c0_i32_1 = arith.constant 0 : i32
    return %c0_i32, %c0_i32_0 : i32, i32
  }
  func.func @transform_10(%arg0: i32) -> (i32, i32, i32) {
    %c0_i32 = arith.constant 0 : i32
    %c0_i32_0 = arith.constant 0 : i32
    %c0_i32_1 = arith.constant 0 : i32
    %c0_i32_2 = arith.constant 0 : i32
    return %c0_i32, %c0_i32_0, %c0_i32_1 : i32, i32, i32
  }
  func.func @transform_11(%arg0: i32) -> (i32, i32) {
    %c0_i32 = arith.constant 0 : i32
    %c0_i32_0 = arith.constant 0 : i32
    %c0_i32_1 = arith.constant 0 : i32
    return %c0_i32, %c0_i32_0 : i32, i32
  }
  func.func @transform_12(%arg0: i32) -> (i32, i32) {
    %c0_i32 = arith.constant 0 : i32
    %c0_i32_0 = arith.constant 0 : i32
    %c0_i32_1 = arith.constant 0 : i32
    return %c0_i32, %c0_i32_0 : i32, i32
  }
  func.func @transform_13(%arg0: i32) -> (i32, i32) {
    %c0_i32 = arith.constant 0 : i32
    %c0_i32_0 = arith.constant 0 : i32
    %c0_i32_1 = arith.constant 0 : i32
    return %c0_i32, %c0_i32_0 : i32, i32
  }
  func.func @transform_14(%arg0: i32) -> (i32, i32) {
    %c0_i32 = arith.constant 0 : i32
    %c0_i32_0 = arith.constant 0 : i32
    %c0_i32_1 = arith.constant 0 : i32
    return %c0_i32, %c0_i32_0 : i32, i32
  }
  func.func @transform_15(%arg0: i32) -> (i32, i32) {
    %c0_i32 = arith.constant 0 : i32
    %c0_i32_0 = arith.constant 0 : i32
    %c0_i32_1 = arith.constant 0 : i32
    return %c0_i32, %c0_i32_0 : i32, i32
  }
  func.func @transform_16(%arg0: i32) -> (i32, i32) {
    %c0_i32 = arith.constant 0 : i32
    %c0_i32_0 = arith.constant 0 : i32
    return %arg0, %c0_i32 : i32, i32
  }
}

</mosaic_0001>

<bundles_post_ra>
// kernel: cnn_cifar_forward.1
= control target key start
LH: loop header
LB: loop body
LE: loop exit
PB: predicated region body
PF: predicated region fallthrough
CT: control target
= control target key end

     0   :  { %s11439_s0 = inlined_call_operand.vmem [shape: f32[512,32], index: 0, kind: input, shape index: {}]   ;;  %s11440_s1 = inlined_call_operand.vmem [shape: f32[5,32,168], index: 1, kind: input, shape index: {}]   ;;  %s11441_s2 = inlined_call_operand.vmem [shape: f32[1,168], index: 2, kind: input, shape index: {}]   ;;  %s11442_s3 = inlined_call_operand.vmem [shape: f32[112,256], index: 3, kind: input, shape index: {}]   ;;  %s11443_s4 = inlined_call_operand.vmem [shape: f32[2,168,84], index: 4, kind: input, shape index: {}]   ;;  %s11444_s5 = inlined_call_operand.vmem [shape: f32[5,84,160], index: 5, kind: input, shape index: {}]   ;;  %s11445_s6 = inlined_call_operand.vmem [shape: f32[1,160], index: 6, kind: input, shape index: {}]   ;;  %s11446_s7 = inlined_call_operand.vmem [shape: f32[40,112], index: 7, kind: input, shape index: {}]   ;;  %s11447_s8 = inlined_call_operand.vmem [shape: f32[2,160,80], index: 8, kind: input, shape index: {}]   ;;  %s11448_s9 = inlined_call_operand.vmem [shape: f32[8,40], index: 9, kind: input, shape index: {}]   ;;  %s11449_s10 = inlined_call_operand.vmem [shape: f32[5,80,120], index: 10, kind: input, shape index: {}]   ;;  %s11450_s11 = inlined_call_operand.vmem [shape: f32[1,120], index: 11, kind: input, shape index: {}]   ;;  %s11451_s12 = inlined_call_operand.vmem [shape: f32[120,84], index: 12, kind: input, shape index: {}]   ;;  %s11452_s13 = inlined_call_operand.vmem [shape: f32[1,84], index: 13, kind: input, shape index: {}]   ;;  %s11453_s14 = inlined_call_operand.vmem [shape: f32[84,128], index: 14, kind: input, shape index: {}]   ;;  %s11454_s15 = inlined_call_operand.vmem [shape: f32[1,128], index: 15, kind: input, shape index: {}]   ;;  %s11455_s16 = inlined_call_operand.hbm [shape: f32[16,128], index: 16, kind: output, shape index: {}]  }
   0x1   :  { %11474 = sst [smem:[#allocation16_spill]] %s11439_s0 }
   0x2   :  { %21 = vsyncpa [#allocation3], 0 }
   0x3   :  { %23 = vsyncpa [#allocation3 + $0x1], 0  ;;  %s8479_s21 = smov 0   ;;  %s8481_s22 = smov 0  }
   0x4   :  { %s8483_s23 = smov 0   ;;  %s8485_s24 = smov 0  }
   0x5 LB: > { %11475 = sst [smem:[#allocation5_spill]] %s8376_s21  ;;  %s8500_s25 = sadd.s32 4294967295, %s8388_s24   ;;  %s8388_s24 = sphi %s8485_s24, %s11505_s24   ;;  %s8384_s23 = sphi %s8483_s23, %s11507_s23   ;;  %s8380_s22 = sphi %s8481_s22, %s11509_s22   ;;  %s8376_s21 = sphi %s8479_s21, %s11508_s21  }
   0x6   : > { %11476 = sst [smem:[#allocation6_spill]] %s8384_s23  ;;  %s6502_s26 = sadd.s32 4294967294, %s8388_s24  }
   0x7   : > { %11477 = sst [smem:[#allocation7_spill]] %s8388_s24  ;;  %s8504_s27 = sadd.s32 1, %s8388_s24  }
   0x8   : > { %11478 = sst [smem:[#allocation8_spill]] %s8504_s27  ;;  %s377_s28 = sadd.s32 1, %s8384_s23 }
   0x9   : > { %s374_s29 = ssub.s32 %s8388_s24, %s8504_s27  ;;  %p387_p0 = scmp.ne.s32.totalorder %s8384_s23, %s8380_s22 }
   0xa   : > { %p375_p1 = scmp.eq.s32.totalorder %s374_s29, 0  ;;  %p388_p2 = scmp.eq.s32.totalorder %s8500_s25, 1 }
   0xb   : > { %p393_p3 = scmp.ne.s32.totalorder %s8380_s22, %s8376_s21  ;;  %p394_p4 = scmp.eq.s32.totalorder %s6502_s26, 1 }
   0xc   : > { %s8515_s30 = scalar_select %p375_p1, %s8384_s23, %s377_s28  }
   0xd   : > { %p8517_p5 = por %p388_p2, %p387_p0  ;;  %p8521_p6 = por %p394_p4, %p393_p3 }
   0xe   : > { %11479 = sst [smem:[#allocation9_spill]] %s8515_s30  ;;  %p6505_p7 = scmp.ge.s32.totalorder %s8388_s24, 1 }
   0xf   : > { %s11481_s17 = scalar_select %p8521_p6, 1, 0 }
  0x10   : > { %p466_p8 = scmp.lt.s32.totalorder %s8388_s24, 3 }
  0x11   : > { %11482 = sst [smem:[#allocation10_spill]] %s11481_s17 }
  0x12   : > { %p467_p9 = pnand %p6505_p7, %p466_p8 }
  0x14   : > { %470 = sbr.rel (%p467_p9) target bundleno = 3343 (0xd0f), region = 84 }
  0x1b   : > { %v6510_v0 = vld [vmem:[%s11440_s1 + $0x48] sm:$0xff]  ;;  %v6512_v1 = vld [vmem:[%s11440_s1 + $0x58] sm:$0xff]  ;;  %v6509_v2 = vld [vmem:[%s11440_s1 + $0x40] sm:$0xff]  ;;  %s6507_s30 = sshll.u32 %s8500_s25, 5  ;;  %v11472_v7 = vmov 0.0   ;;  %s11483_s17 = sld [smem:[#allocation16_spill]] }
  0x1c   : > { %v7384_v3 = vpack.c.bf16 %v6512_v1, %v6510_v0  ;;  %v6511_v4 = vld [vmem:[%s11440_s1 + $0x50] sm:$0xff]  ;;  %v6514_v5 = vld [vmem:[%s11440_s1 + $0x68] sm:$0xff]  ;;  %v6516_v6 = vld [vmem:[%s11440_s1 + $0x78] sm:$0xff]  ;;  %800 = vmatprep.mubr.f32.mxu0 %v11472_v7  ;;  %p517_p10 = scmp.lt.s32.totalorder %s6507_s30, 63  ;;  %vm594_vm0 = vcmask 1046528   ;;  %vm670_vm1 = vcmask 261120  }
  0x1d   : > { %v7386_v8 = vpack.c.bf16 %v6511_v4, %v6509_v2  ;;  %v7388_v9 = vpack.c.bf16 %v6516_v6, %v6514_v5  ;;  %v6513_v10 = vld [vmem:[%s11440_s1 + $0x60] sm:$0xff]  ;;  %v6515_v11 = vld [vmem:[%s11440_s1 + $0x70] sm:$0xff]  ;;  %v555_v12 = vld [vmem:[%s11440_s1 + $0x8] sm:$0xff]  ;;  %vm1314_vm2 = vcmask 1045504   ;;  %vm1776_vm3 = vcmask 1044480  }
  0x1e   : > { %7385 = vmatprep.subr.bf16.mxu0 %v7384_v3  ;;  %s11511_s30 = smov (!%p517_p10, %s6507_s30), 63  ;;  %v557_v13 = vld [vmem:[%s11440_s1 + $0x18] sm:$0xff]  ;;  %v7390_v14 = vpack.c.bf16 %v6515_v11, %v6513_v10  ;;  %v554_v16 = vld [vmem:[%s11440_s1] sm:$0xff]  ;;  %v556_v17 = vld [vmem:[%s11440_s1 + $0x10] sm:$0xff]  ;;  %vm2238_vm4 = vcmask 1043456   ;;  %vm3360_vm5 = vcmask 326656  }
  0x1f   : > { %7387 = vmatpush1.bf16.msra.mxu0 %v7386_v8  ;;  %s6508_s18 = sshll.u32 %s11511_s30, 3  ;;  %v7392_v15 = vpack.c.bf16 %v557_v13, %v555_v12  ;;  %v559_v18 = vld [vmem:[%s11440_s1 + $0x28] sm:$0xff]  ;;  %v561_v19 = vld [vmem:[%s11440_s1 + $0x38] sm:$0xff]  ;;  %v7394_v26 = vpack.c.bf16 %v556_v17, %v554_v16  ;;  %v558_v29 = vld [vmem:[%s11440_s1 + $0x20] sm:$0xff]  ;;  %vm3798_vm6 = vcmask 687104   ;;  %vm5176_vm7 = vcmask 916480  }
  0x20   : > { %7389 = vmatprep.subr.bf16.mxu0 %v7388_v9  ;;  %v7396_v28 = vpack.c.bf16 %v561_v19, %v559_v18  ;;  %v560_v30 = vld [vmem:[%s11440_s1 + $0x30] sm:$0xff]  ;;  %vm8392_vm8 = vmmov 0   ;;  %vm5566_vm9 = vcmask 654336   ;;  %vm6259_vm10 = vcmask 982016  }
  0x21   : > { %s8568_s24 = scalar_lea.vmem %s11483_s17, %s6508_s18  ;;  %v7398_v34 = vpack.c.bf16 %v560_v30, %v558_v29  ;;  %s7026_s18 = sshll.u32 %s8500_s25, 7 }
  0x22   : > { %v8577_v20 = vld [vmem:[%s8568_s24] sm:$0xff]  ;;  %v8580_v21 = vld [vmem:[%s8568_s24 + $0x8] sm:$0xff]  ;;  %v8583_v22 = vld [vmem:[%s8568_s24 + $0x10] sm:$0xff]  ;;  %s11397_s21 = scalar_lea.hbm %s11455_s16, %s7026_s18  ;;  %s8393_s25 = smov [#allocation2]  }
  0x23   : > { %7391 = vmatpush1.bf16.msra.mxu0 %v7390_v14  ;;  %v595_v23 = vrot.slane %v8577_v20, 1  ;;  %v596_v24 = vrot.slane %v8580_v21, 1  ;;  %v598_v25 = vrot.slane %v8583_v22, 1  ;;  %v8589_v27 = vld [vmem:[%s8568_s24 + $0x18] sm:$0xff]  ;;  %v8605_v35 = vld [vmem:[%s8568_s24 + $0x20] sm:$0xff]  ;;  %v8612_v38 = vld [vmem:[%s8568_s24 + $0x28] sm:$0xff] }
  0x24   : > { %7393 = vmatprep.subr.bf16.mxu0 %v7392_v15  ;;  %v600_v33 = vrot.slane %v8589_v27, 1  ;;  %v602_v37 = vrot.slane %v8605_v35, 1  ;;  %v604_v40 = vrot.slane %v8612_v38, 1  ;;  %v8619_v41 = vld [vmem:[%s8568_s24 + $0x30] sm:$0xff]  ;;  %v8626_v44 = vld [vmem:[%s8568_s24 + $0x38] sm:$0xff]  ;;  %v8633_v47 = vld [vmem:[%s8568_s24 + $0x40] sm:$0xff] }
  0x25   : > { %v597_v31 = vsel %vm594_vm0, %v595_v23, %v596_v24  ;;  %v599_v32 = vsel %vm594_vm0, %v596_v24, %v598_v25  ;;  %v606_v43 = vrot.slane %v8619_v41, 1  ;;  %v608_v46 = vrot.slane %v8626_v44, 1  ;;  %v8640_v50 = vld [vmem:[%s8568_s24 + $0x48] sm:$0xff]  ;;  %v8647_v53 = vld [vmem:[%s8568_s24 + $0x50] sm:$0xff]  ;;  %v8654_v56 = vld [vmem:[%s8568_s24 + $0x58] sm:$0xff] }
  0x26   : > { %6517 = vmatmul.mubr.msk.f32.vlgmr.msra.gmra.mrb[0].mxu0 %vm670_vm1, %v597_v31  ;;  %v601_v36 = vsel %vm594_vm0, %v598_v25, %v600_v33  ;;  %v603_v39 = vsel %vm594_vm0, %v600_v33, %v602_v37  ;;  %v605_v42 = vsel %vm594_vm0, %v602_v37, %v604_v40  ;;  %v610_v49 = vrot.slane %v8633_v47, 1  ;;  %v8661_v59 = vld [vmem:[%s8568_s24 + $0x60] sm:$0xff]  ;;  %v8668_v62 = vld [vmem:[%s8568_s24 + $0x68] sm:$0xff]  ;;  %v8675_v1 = vld [vmem:[%s8568_s24 + $0x70] sm:$0xff] }
  0x27   : > { %806 = vmatprep.mubr.f32.mxu0 %v11472_v7  ;;  %7395 = vmatpush1.bf16.msra.mxu0 %v7394_v26  ;;  %v607_v45 = vsel %vm594_vm0, %v604_v40, %v606_v43  ;;  %v609_v48 = vsel %vm594_vm0, %v606_v43, %v608_v46  ;;  %v612_v52 = vrot.slane %v8640_v50, 1  ;;  %v614_v55 = vrot.slane %v8647_v53, 1  ;;  %v8682_v4 = vld [vmem:[%s8568_s24 + $0x78] sm:$0xff]  ;;  %v8689_v8 = vld [vmem:[%s8568_s24 + $0x80] sm:$0xff]  ;;  %v8696_v11 = vld [vmem:[%s8568_s24 + $0x88] sm:$0xff] }
  0x28   : > { %7397 = vmatprep.subr.bf16.mxu0 %v7396_v28  ;;  %v611_v51 = vsel %vm594_vm0, %v608_v46, %v610_v49  ;;  %v616_v58 = vrot.slane %v8654_v56, 1  ;;  %v618_v61 = vrot.slane %v8661_v59, 1  ;;  %v620_v0 = vrot.slane %v8668_v62, 1  ;;  %v8703_v14 = vld [vmem:[%s8568_s24 + $0x90] sm:$0xff]  ;;  %v8710_v17 = vld [vmem:[%s8568_s24 + $0x98] sm:$0xff]  ;;  %v8717_v24 = vld [vmem:[%s8568_s24 + $0xa0] sm:$0xff] }
  0x29   : > { %v613_v54 = vsel %vm594_vm0, %v610_v49, %v612_v52  ;;  %v615_v57 = vsel %vm594_vm0, %v612_v52, %v614_v55  ;;  %v622_v3 = vrot.slane %v8675_v1, 1  ;;  %v624_v6 = vrot.slane %v8682_v4, 1  ;;  %v8724_v28 = vld [vmem:[%s8568_s24 + $0xa8] sm:$0xff]  ;;  %v8731_v31 = vld [vmem:[%s8568_s24 + $0xb0] sm:$0xff]  ;;  %v8766_v52 = vld [vmem:[%s8568_s24 + $0xd8] sm:$0xff] }
  0x2a   : > { %6518 = vmatmul.mubr.msk.f32.gmra.mrb[2].mxu0 %vm670_vm1, %v599_v32  ;;  %v617_v60 = vsel %vm594_vm0, %v614_v55, %v616_v58  ;;  %v619_v63 = vsel %vm594_vm0, %v616_v58, %v618_v61  ;;  %v621_v2 = vsel %vm594_vm0, %v618_v61, %v620_v0  ;;  %v626_v10 = vrot.slane %v8689_v8, 1  ;;  %v8752_v43 = vld [vmem:[%s8568_s24 + $0xc8] sm:$0xff] }
  0x2b   : > { %812 = vmatprep.mubr.f32.mxu0 %v11472_v7  ;;  %7399 = vmatpush1.bf16.msra.mxu0 %v7398_v34  ;;  %v623_v5 = vsel %vm594_vm0, %v620_v0, %v622_v3  ;;  %v625_v9 = vsel %vm594_vm0, %v622_v3, %v624_v6  ;;  %v628_v13 = vrot.slane %v8696_v11, 1  ;;  %v630_v16 = vrot.slane %v8703_v14, 1  ;;  %v8738_v34 = vld [vmem:[%s8568_s24 + $0xb8] sm:$0xff]  ;;  %v8780_v61 = vld [vmem:[%s8568_s24 + $0xe8] sm:$0xff] }
  0x2c   : > { %v627_v12 = vsel %vm594_vm0, %v624_v6, %v626_v10  ;;  %v632_v19 = vrot.slane %v8710_v17, 1  ;;  %v634_v26 = vrot.slane %v8717_v24, 1  ;;  %v636_v30 = vrot.slane %v8724_v28, 1  ;;  %v8794_v6 = vld [vmem:[%s8568_s24 + $0xf8] sm:$0xff] }
  0x2d   : > { %v629_v15 = vsel %vm594_vm0, %v626_v10, %v628_v13  ;;  %v631_v18 = vsel %vm594_vm0, %v628_v13, %v630_v16  ;;  %v638_v33 = vrot.slane %v8731_v31, 1  ;;  %v640_v37 = vrot.slane %v8738_v34, 1  ;;  %v6584_v10 = vld [vmem:[%s11440_s1 + $0x98] sm:$0xff] }
  0x2e   : > { %6519 = vmatmul.mubr.msk.f32.gmra.mrb[4].mxu0 %vm670_vm1, %v601_v36  ;;  %v633_v25 = vsel %vm594_vm0, %v630_v16, %v632_v19  ;;  %v635_v29 = vsel %vm594_vm0, %v632_v19, %v634_v26  ;;  %v637_v32 = vsel %vm594_vm0, %v634_v26, %v636_v30  ;;  %v644_v46 = vrot.slane %v8752_v43, 1  ;;  %v6581_v19 = vld [vmem:[%s11440_s1 + $0x80] sm:$0xff]  ;;  %v6586_v26 = vld [vmem:[%s11440_s1 + $0xa8] sm:$0xff] }
  0x2f   : > { %818 = vmatprep.mubr.f32.mxu0 %v11472_v7  ;;  %v639_v36 = vsel %vm594_vm0, %v636_v30, %v638_v33  ;;  %v641_v40 = vsel %vm594_vm0, %v638_v33, %v640_v37  ;;  %v648_v55 = vrot.slane %v8766_v52, 1  ;;  %v652_v0 = vrot.slane %v8780_v61, 1  ;;  %v6587_v33 = vld [vmem:[%s11440_s1 + $0xb0] sm:$0xff] }
  0x30   : > { %v656_v13 = vrot.slane %v8794_v6, 1 }
  0x32   : > { %6520 = vmatmul.mubr.msk.f32.gmra.mrb[6].mxu0 %vm670_vm1, %v603_v39  ;;  %v8745_v39 = vld [vmem:[%s8568_s24 + $0xc0] sm:$0xff] }
  0x33   : > { %824 = vmatprep.mubr.f32.mxu0 %v11472_v7 }
  0x36   : > { %6521 = vmatmul.mubr.msk.f32.gmra.mrb[8].mxu0 %vm670_vm1, %v605_v42  ;;  %v642_v42 = vrot.slane %v8745_v39, 1 }
  0x37   : > { %830 = vmatprep.mubr.f32.mxu0 %v11472_v7 }
  0x38   : > { %v645_v49 = vsel %vm594_vm0, %v642_v42, %v644_v46 }
  0x3a   : > { %6522 = vmatmul.mubr.msk.f32.gmra.mrb[10].mxu0 %vm670_vm1, %v607_v45  ;;  %v643_v45 = vsel %vm594_vm0, %v640_v37, %v642_v42  ;;  %v6622_v37 = vld [vmem:[%s11440_s1 + $0xc8] sm:$0xff] }
  0x3b   : > { %836 = vmatprep.mubr.f32.mxu0 %v11472_v7 }
  0x3e   : > { %6523 = vmatmul.mubr.msk.f32.gmra.mrb[12].mxu0 %vm670_vm1, %v609_v48  ;;  %v8759_v48 = vld [vmem:[%s8568_s24 + $0xd0] sm:$0xff] }
  0x3f   : > { %842 = vmatprep.mubr.f32.mxu0 %v11472_v7 }
  0x42   : > { %6524 = vmatmul.mubr.msk.f32.gmra.mrb[14].mxu0 %vm670_vm1, %v611_v51  ;;  %v646_v51 = vrot.slane %v8759_v48, 1 }
  0x43   : > { %848 = vmatprep.mubr.f32.mxu0 %v11472_v7 }
  0x44   : > { %v649_v58 = vsel %vm594_vm0, %v646_v51, %v648_v55 }
  0x46   : > { %6525 = vmatmul.mubr.msk.f32.gmra.mrb[16].mxu0 %vm670_vm1, %v613_v54  ;;  %v647_v54 = vsel %vm594_vm0, %v644_v46, %v646_v51  ;;  %v1316_v46 = vrot.slane %v8580_v21, 2  ;;  %v6623_v51 = vld [vmem:[%s11440_s1 + $0xd0] sm:$0xff] }
  0x47   : > { %854 = vmatprep.mubr.f32.mxu0 %v11472_v7 }
  0x4a   : > { %6526 = vmatmul.mubr.msk.f32.gmra.mrb[18].mxu0 %vm670_vm1, %v615_v57  ;;  %v8773_v57 = vld [vmem:[%s8568_s24 + $0xe0] sm:$0xff] }
  0x4b   : > { %860 = vmatprep.mubr.f32.mxu0 %v11472_v7 }
  0x4e   : > { %6527 = vmatmul.mubr.msk.f32.gmra.mrb[20].mxu0 %vm670_vm1, %v617_v60  ;;  %v650_v60 = vrot.slane %v8773_v57, 1 }
  0x4f   : > { %866 = vmatprep.mubr.f32.mxu0 %v11472_v7 }
  0x50   : > { %v653_v3 = vsel %vm594_vm0, %v650_v60, %v652_v0 }
  0x52   : > { %6528 = vmatmul.mubr.msk.f32.gmra.mrb[22].mxu0 %vm670_vm1, %v619_v63  ;;  %v651_v63 = vsel %vm594_vm0, %v648_v55, %v650_v60  ;;  %v6628_v55 = vld [vmem:[%s11440_s1 + $0xf8] sm:$0xff]  ;;  %v1318_v60 = vrot.slane %v8583_v22, 2 }
  0x53   : > { %872 = vmatprep.mubr.f32.mxu0 %v11472_v7 }
  0x56   : > { %6529 = vmatmul.mubr.msk.f32.gmra.mrb[24].mxu0 %vm670_vm1, %v621_v2  ;;  %v8787_v2 = vld [vmem:[%s8568_s24 + $0xf0] sm:$0xff] }
  0x57   : > { %878 = vmatprep.mubr.f32.mxu0 %v11472_v7 }
  0x5a   : > { %6530 = vmatmul.mubr.msk.f32.gmra.mrb[26].mxu0 %vm670_vm1, %v623_v5  ;;  %v654_v5 = vrot.slane %v8787_v2, 1 }
  0x5b   : > { %884 = vmatprep.mubr.f32.mxu0 %v11472_v7 }
  0x5c   : > { %v657_v16 = vsel %vm594_vm0, %v654_v5, %v656_v13 }
  0x5e   : > { %6531 = vmatmul.mubr.msk.f32.gmra.mrb[28].mxu0 %vm670_vm1, %v625_v9  ;;  %v6582_v9 = vld [vmem:[%s11440_s1 + $0x88] sm:$0xff] }
  0x5f   : > { %890 = vmatprep.mubr.f32.mxu0 %v11472_v7 }
  0x62   : > { %6532 = vmatmul.mubr.msk.f32.gmra.mrb[30].mxu0 %vm670_vm1, %v627_v12  ;;  %v655_v12 = vsel %vm594_vm0, %v652_v0, %v654_v5  ;;  %v6627_v5 = vld [vmem:[%s11440_s1 + $0xf0] sm:$0xff] }
  0x63   : > { %896 = vmatprep.mubr.f32.mxu0 %v11472_v7 }
  0x66   : > { %6533 = vmatmul.mubr.msk.f32.gmra.mrb[32].mxu0 %vm670_vm1, %v629_v15  ;;  %v7400_v15 = vpack.c.bf16 %v6584_v10, %v6582_v9  ;;  %v1319_v9 = vsel %vm1314_vm2, %v1316_v46, %v1318_v60  ;;  %v1320_v10 = vrot.slane %v8589_v27, 2 }
  0x67   : > { %902 = vmatprep.mubr.f32.mxu0 %v11472_v7 }
  0x68   : > { %7401 = vmatprep.subr.bf16.mxu0 %v7400_v15  ;;  %v1322_v15 = vrot.slane %v8605_v35, 2 }
  0x6a   : > { %6534 = vmatmul.mubr.msk.f32.gmra.mrb[34].mxu0 %vm670_vm1, %v631_v18  ;;  %v660_v18 = vsel %vm594_vm0, %v656_v13, %v595_v23  ;;  %v1321_v13 = vsel %vm1314_vm2, %v1318_v60, %v1320_v10 }
  0x6b   : > { %908 = vmatprep.mubr.f32.mxu0 %v11472_v7 }
  0x6e   : > { %6535 = vmatmul.mubr.msk.f32.gmra.mrb[36].mxu0 %vm670_vm1, %v633_v25  ;;  %v6583_v25 = vld [vmem:[%s11440_s1 + $0x90] sm:$0xff] }
  0x6f   : > { %914 = vmatprep.mubr.f32.mxu0 %v11472_v7  ;;  %v7402_v23 = vpack.c.bf16 %v6583_v25, %v6581_v19  ;;  %v1326_v25 = vrot.slane %v8619_v41, 2 }
  0x72   : > { %6536 = vmatmul.mubr.msk.f32.gmra.mrb[38].mxu0 %vm670_vm1, %v635_v29  ;;  %v6588_v29 = vld [vmem:[%s11440_s1 + $0xb8] sm:$0xff] }
  0x73   : > { %920 = vmatprep.mubr.f32.mxu0 %v11472_v7  ;;  %v7404_v30 = vpack.c.bf16 %v6588_v29, %v6586_v26  ;;  %v1328_v29 = vrot.slane %v8626_v44, 2 }
  0x76   : > { %6537 = vmatmul.mubr.msk.f32.gmra.mrb[40].mxu0 %vm670_vm1, %v637_v32  ;;  %v6585_v32 = vld [vmem:[%s11440_s1 + $0xa0] sm:$0xff] }
  0x77   : > { %926 = vmatprep.mubr.f32.mxu0 %v11472_v7 }
  0x7a   : > { %6538 = vmatmul.mubr.msk.f32.gmra.mrb[42].mxu0 %vm670_vm1, %v639_v36  ;;  %v7406_v36 = vpack.c.bf16 %v6587_v33, %v6585_v32  ;;  %v1332_v33 = vrot.slane %v8640_v50, 2 }
  0x7b   : > { %932 = vmatprep.mubr.f32.mxu0 %v11472_v7 }
  0x7e   : > { %6539 = vmatmul.mubr.msk.f32.gmra.mrb[44].mxu0 %vm670_vm1, %v641_v40  ;;  %v6624_v40 = vld [vmem:[%s11440_s1 + $0xd8] sm:$0xff] }
  0x7f   : > { %938 = vmatprep.mubr.f32.mxu0 %v11472_v7  ;;  %v7408_v42 = vpack.c.bf16 %v6624_v40, %v6622_v37  ;;  %v1334_v37 = vrot.slane %v8647_v53, 2 }
  0x81   : > { %v1335_v40 = vsel %vm1314_vm2, %v1332_v33, %v1334_v37 }
  0x82   : > { %6540 = vmatmul.mubr.msk.f32.gmra.mrb[46].mxu0 %vm670_vm1, %v643_v45  ;;  %v1315_v45 = vrot.slane %v8577_v20, 2 }
  0x83   : > { %944 = vmatprep.mubr.f32.mxu0 %v11472_v7 }
  0x86   : > { %6541 = vmatmul.mubr.msk.f32.gmra.mrb[48].mxu0 %vm670_vm1, %v645_v49  ;;  %v6621_v49 = vld [vmem:[%s11440_s1 + $0xc0] sm:$0xff] }
  0x87   : > { %950 = vmatprep.mubr.f32.mxu0 %v11472_v7 }
  0x8a   : > { %6542 = vmatmul.mubr.msk.f32.gmra.mrb[50].mxu0 %vm670_vm1, %v647_v54  ;;  %v6626_v54 = vld [vmem:[%s11440_s1 + $0xe8] sm:$0xff] }
  0x8b   : > { %956 = vmatprep.mubr.f32.mxu0 %v11472_v7  ;;  %v7412_v0 = vpack.c.bf16 %v6628_v55, %v6626_v54  ;;  %v1340_v54 = vrot.slane %v8668_v62, 2 }
  0x8e   : > { %6543 = vmatmul.mubr.msk.f32.gmra.mrb[52].mxu0 %vm670_vm1, %v649_v58  ;;  %v1317_v58 = vsel %vm1314_vm2, %v1315_v45, %v1316_v46 }
  0x8f   : > { %962 = vmatprep.mubr.f32.mxu0 %v11472_v7 }
  0x92   : > { %6544 = vmatmul.mubr.msk.f32.gmra.mrb[54].mxu0 %vm670_vm1, %v651_v63  ;;  %v7410_v63 = vpack.c.bf16 %v6623_v51, %v6621_v49  ;;  %v1338_v49 = vrot.slane %v8661_v59, 2 }
  0x93   : > { %968 = vmatprep.mubr.f32.mxu0 %v11472_v7 }
  0x94   : > { %v1341_v55 = vsel %vm1314_vm2, %v1338_v49, %v1340_v54 }
  0x96   : > { %6545 = vmatmul.mubr.msk.f32.gmra.mrb[56].mxu0 %vm670_vm1, %v653_v3  ;;  %v6625_v3 = vld [vmem:[%s11440_s1 + $0xe0] sm:$0xff] }
  0x97   : > { %974 = vmatprep.mubr.f32.mxu0 %v11472_v7 }
  0x9a   : > { %6546 = vmatmul.mubr.msk.f32.gmra.mrb[58].mxu0 %vm670_vm1, %v655_v12  ;;  %v7414_v12 = vpack.c.bf16 %v6627_v5, %v6625_v3  ;;  %v1346_v3 = vrot.slane %v8689_v8, 2 }
  0x9b   : > { %980 = vmatprep.mubr.f32.mxu0 %v11472_v7 }
  0x9e   : > { %6547 = vmatmul.mubr.msk.f32.gmra.mrb[60].mxu0 %vm670_vm1, %v657_v16  ;;  %v1323_v16 = vsel %vm1314_vm2, %v1320_v10, %v1322_v15 }
  0x9f   : > { %986 = vmatprep.mubr.f32.mxu0 %v11472_v7 }
  0xa2   : > { %6548 = vmatmul.mubr.msk.f32.gmra.mrb[62].mxu0 %vm670_vm1, %v660_v18  ;;  %v1324_v18 = vrot.slane %v8612_v38, 2 }
  0xa3   : > { %1121 = vmatprep.mubr.f32.mxu0 %v11472_v7 }
  0xa4   : > { %v1325_v19 = vsel %vm1314_vm2, %v1322_v15, %v1324_v18  ;;  %v1327_v26 = vsel %vm1314_vm2, %v1324_v18, %v1326_v25  ;;  %v1352_v15 = vrot.slane %v8710_v17, 2  ;;  %v1354_v18 = vrot.slane %v8717_v24, 2 }
  0xa6   : > { %6549 = vmatmul.mubr.msk.f32.vlgmr.msra.gmra.mrb[0].mxu0 %vm670_vm1, %v8577_v20 }
  0xa7   : > { %1127 = vmatprep.mubr.f32.mxu0 %v11472_v7  ;;  %7403 = vmatpush1.bf16.msra.mxu0 %v7402_v23  ;;  %v1329_v23 = vsel %vm1314_vm2, %v1326_v25, %v1328_v29  ;;  %v1356_v25 = vrot.slane %v8724_v28, 2 }
  0xa8   : > { %7405 = vmatprep.subr.bf16.mxu0 %v7404_v30  ;;  %v1330_v30 = vrot.slane %v8633_v47, 2 }
  0xaa   : > { %6550 = vmatmul.mubr.msk.f32.gmra.mrb[2].mxu0 %vm670_vm1, %v8580_v21  ;;  %v1331_v32 = vsel %vm1314_vm2, %v1328_v29, %v1330_v30  ;;  %v1358_v29 = vrot.slane %v8731_v31, 2 }
  0xab   : > { %1133 = vmatprep.mubr.f32.mxu0 %v11472_v7  ;;  %7407 = vmatpush1.bf16.msra.mxu0 %v7406_v36  ;;  %v1333_v36 = vsel %vm1314_vm2, %v1330_v30, %v1332_v33  ;;  %v1360_v30 = vrot.slane %v8738_v34, 2  ;;  %v1362_v33 = vrot.slane %v8745_v39, 2 }
  0xac   : > { %7409 = vmatprep.subr.bf16.mxu0 %v7408_v42  ;;  %v1336_v42 = vrot.slane %v8654_v56, 2 }
  0xae   : > { %6551 = vmatmul.mubr.msk.f32.gmra.mrb[4].mxu0 %vm670_vm1, %v8583_v22  ;;  %v1337_v46 = vsel %vm1314_vm2, %v1334_v37, %v1336_v42  ;;  %v1339_v51 = vsel %vm1314_vm2, %v1336_v42, %v1338_v49  ;;  %v1364_v37 = vrot.slane %v8752_v43, 2  ;;  %v1366_v42 = vrot.slane %v8759_v48, 2 }
  0xaf   : > { %1139 = vmatprep.mubr.f32.mxu0 %v11472_v7  ;;  %v1368_v49 = vrot.slane %v8766_v52, 2 }
  0xb2   : > { %6552 = vmatmul.mubr.msk.f32.gmra.mrb[6].mxu0 %vm670_vm1, %v8589_v27 }
  0xb3   : > { %1145 = vmatprep.mubr.f32.mxu0 %v11472_v7 }
  0xb6   : > { %6553 = vmatmul.mubr.msk.f32.gmra.mrb[8].mxu0 %vm670_vm1, %v8605_v35 }
  0xb7   : > { %1151 = vmatprep.mubr.f32.mxu0 %v11472_v7 }
  0xba   : > { %6554 = vmatmul.mubr.msk.f32.gmra.mrb[10].mxu0 %vm670_vm1, %v8612_v38 }
  0xbb   : > { %1157 = vmatprep.mubr.f32.mxu0 %v11472_v7 }
  0xbe   : > { %6555 = vmatmul.mubr.msk.f32.gmra.mrb[12].mxu0 %vm670_vm1, %v8619_v41 }
  0xbf   : > { %1163 = vmatprep.mubr.f32.mxu0 %v11472_v7 }
  0xc2   : > { %6556 = vmatmul.mubr.msk.f32.gmra.mrb[14].mxu0 %vm670_vm1, %v8626_v44 }
  0xc3   : > { %1169 = vmatprep.mubr.f32.mxu0 %v11472_v7 }
  0xc6   : > { %6557 = vmatmul.mubr.msk.f32.gmra.mrb[16].mxu0 %vm670_vm1, %v8633_v47 }
  0xc7   : > { %1175 = vmatprep.mubr.f32.mxu0 %v11472_v7 }
  0xca   : > { %6558 = vmatmul.mubr.msk.f32.gmra.mrb[18].mxu0 %vm670_vm1, %v8640_v50 }
  0xcb   : > { %1181 = vmatprep.mubr.f32.mxu0 %v11472_v7 }
  0xce   : > { %6559 = vmatmul.mubr.msk.f32.gmra.mrb[20].mxu0 %vm670_vm1, %v8647_v53 }
  0xcf   : > { %1187 = vmatprep.mubr.f32.mxu0 %v11472_v7 }
  0xd2   : > { %6560 = vmatmul.mubr.msk.f32.gmra.mrb[22].mxu0 %vm670_vm1, %v8654_v56 }
  0xd3   : > { %1193 = vmatprep.mubr.f32.mxu0 %v11472_v7 }
  0xd6   : > { %6561 = vmatmul.mubr.msk.f32.gmra.mrb[24].mxu0 %vm670_vm1, %v8661_v59 }
  0xd7   : > { %1199 = vmatprep.mubr.f32.mxu0 %v11472_v7 }
  0xda   : > { %6562 = vmatmul.mubr.msk.f32.gmra.mrb[26].mxu0 %vm670_vm1, %v8668_v62 }
  0xdb   : > { %1205 = vmatprep.mubr.f32.mxu0 %v11472_v7 }
  0xde   : > { %6563 = vmatmul.mubr.msk.f32.gmra.mrb[28].mxu0 %vm670_vm1, %v8675_v1 }
  0xdf   : > { %1211 = vmatprep.mubr.f32.mxu0 %v11472_v7 }
  0xe2   : > { %6564 = vmatmul.mubr.msk.f32.gmra.mrb[30].mxu0 %vm670_vm1, %v8682_v4 }
  0xe3   : > { %1217 = vmatprep.mubr.f32.mxu0 %v11472_v7 }
  0xe6   : > { %6565 = vmatmul.mubr.msk.f32.gmra.mrb[32].mxu0 %vm670_vm1, %v8689_v8 }
  0xe7   : > { %1223 = vmatprep.mubr.f32.mxu0 %v11472_v7 }
  0xea   : > { %6566 = vmatmul.mubr.msk.f32.gmra.mrb[34].mxu0 %vm670_vm1, %v8696_v11 }
  0xeb   : > { %1229 = vmatprep.mubr.f32.mxu0 %v11472_v7 }
  0xee   : > { %6567 = vmatmul.mubr.msk.f32.gmra.mrb[36].mxu0 %vm670_vm1, %v8703_v14 }
  0xef   : > { %1235 = vmatprep.mubr.f32.mxu0 %v11472_v7 }
  0xf2   : > { %6568 = vmatmul.mubr.msk.f32.gmra.mrb[38].mxu0 %vm670_vm1, %v8710_v17 }
  0xf3   : > { %1241 = vmatprep.mubr.f32.mxu0 %v11472_v7 }
  0xf6   : > { %6569 = vmatmul.mubr.msk.f32.gmra.mrb[40].mxu0 %vm670_vm1, %v8717_v24 }
  0xf7   : > { %1247 = vmatprep.mubr.f32.mxu0 %v11472_v7 }
  0xfa   : > { %6570 = vmatmul.mubr.msk.f32.gmra.mrb[42].mxu0 %vm670_vm1, %v8724_v28 }
  0xfb   : > { %1253 = vmatprep.mubr.f32.mxu0 %v11472_v7 }
  0xfe   : > { %6571 = vmatmul.mubr.msk.f32.gmra.mrb[44].mxu0 %vm670_vm1, %v8731_v31 }
  0xff   : > { %1259 = vmatprep.mubr.f32.mxu0 %v11472_v7 }
 0x102   : > { %6572 = vmatmul.mubr.msk.f32.gmra.mrb[46].mxu0 %vm670_vm1, %v8738_v34 }
 0x103   : > { %1265 = vmatprep.mubr.f32.mxu0 %v11472_v7 }
 0x106   : > { %6573 = vmatmul.mubr.msk.f32.gmra.mrb[48].mxu0 %vm670_vm1, %v8745_v39 }
 0x107   : > { %1271 = vmatprep.mubr.f32.mxu0 %v11472_v7 }
 0x10a   : > { %6574 = vmatmul.mubr.msk.f32.gmra.mrb[50].mxu0 %vm670_vm1, %v8752_v43 }
 0x10b   : > { %1277 = vmatprep.mubr.f32.mxu0 %v11472_v7 }
 0x10e   : > { %6575 = vmatmul.mubr.msk.f32.gmra.mrb[52].mxu0 %vm670_vm1, %v8759_v48 }
 0x10f   : > { %1283 = vmatprep.mubr.f32.mxu0 %v11472_v7 }
 0x112   : > { %6576 = vmatmul.mubr.msk.f32.gmra.mrb[54].mxu0 %vm670_vm1, %v8766_v52 }
 0x113   : > { %1289 = vmatprep.mubr.f32.mxu0 %v11472_v7 }
 0x116   : > { %6577 = vmatmul.mubr.msk.f32.gmra.mrb[56].mxu0 %vm670_vm1, %v8773_v57 }
 0x117   : > { %1295 = vmatprep.mubr.f32.mxu0 %v11472_v7 }
 0x11a   : > { %6578 = vmatmul.mubr.msk.f32.gmra.mrb[58].mxu0 %vm670_vm1, %v8780_v61 }
 0x11b   : > { %1301 = vmatprep.mubr.f32.mxu0 %v11472_v7 }
 0x11e   : > { %6579 = vmatmul.mubr.msk.f32.gmra.mrb[60].mxu0 %vm670_vm1, %v8787_v2 }
 0x11f   : > { %1307 = vmatprep.mubr.f32.mxu0 %v11472_v7 }
 0x122   : > { %6580 = vmatmul.mubr.msk.f32.gmra.mrb[62].mxu0 %vm670_vm1, %v8794_v6 }
 0x123   : > { %1519 = vmatprep.mubr.f32.mxu0 %v11472_v7 }
 0x126   : > { %6589 = vmatmul.mubr.msk.f32.vlgmr.msra.gmra.mrb[0].mxu0 %vm670_vm1, %v1317_v58  ;;  %v1342_v58 = vrot.slane %v8675_v1, 2 }
 0x127   : > { %1525 = vmatprep.mubr.f32.mxu0 %v11472_v7  ;;  %7411 = vmatpush1.bf16.msra.mxu0 %v7410_v63  ;;  %v1344_v63 = vrot.slane %v8682_v4, 2 }
 0x128   : > { %7413 = vmatprep.subr.bf16.mxu0 %v7412_v0  ;;  %v1343_v60 = vsel %vm1314_vm2, %v1340_v54, %v1342_v58  ;;  %v1370_v54 = vrot.slane %v8773_v57, 2 }
 0x129   : > { %v1345_v0 = vsel %vm1314_vm2, %v1342_v58, %v1344_v63  ;;  %v1347_v5 = vsel %vm1314_vm2, %v1344_v63, %v1346_v3  ;;  %v1372_v58 = vrot.slane %v8780_v61, 2  ;;  %v1374_v63 = vrot.slane %v8787_v2, 2 }
 0x12a   : > { %6590 = vmatmul.mubr.msk.f32.gmra.mrb[2].mxu0 %vm670_vm1, %v1319_v9  ;;  %v1348_v9 = vrot.slane %v8696_v11, 2 }
 0x12b   : > { %1531 = vmatprep.mubr.f32.mxu0 %v11472_v7  ;;  %7415 = vmatpush1.bf16.msra.mxu0 %v7414_v12  ;;  %v1350_v12 = vrot.slane %v8703_v14, 2 }
 0x12c   : > { %v1349_v10 = vsel %vm1314_vm2, %v1346_v3, %v1348_v9  ;;  %v6664_v3 = vld [vmem:[%s11440_s1 + $0x118] sm:$0xff] }
 0x12e   : > { %6591 = vmatmul.mubr.msk.f32.gmra.mrb[4].mxu0 %vm670_vm1, %v1321_v13  ;;  %v1351_v13 = vsel %vm1314_vm2, %v1348_v9, %v1350_v12  ;;  %v1376_v9 = vrot.slane %v8794_v6, 2 }
 0x12f   : > { %1537 = vmatprep.mubr.f32.mxu0 %v11472_v7 }
 0x132   : > { %6592 = vmatmul.mubr.msk.f32.gmra.mrb[6].mxu0 %vm670_vm1, %v1323_v16  ;;  %v1353_v16 = vsel %vm1314_vm2, %v1350_v12, %v1352_v15  ;;  %v1377_v12 = vsel %vm1314_vm2, %v1374_v63, %v1376_v9 }
 0x133   : > { %1543 = vmatprep.mubr.f32.mxu0 %v11472_v7 }
 0x136   : > { %6593 = vmatmul.mubr.msk.f32.gmra.mrb[8].mxu0 %vm670_vm1, %v1325_v19  ;;  %v1355_v19 = vsel %vm1314_vm2, %v1352_v15, %v1354_v18  ;;  %v1777_v15 = vrot.slane %v8577_v20, 3  ;;  %v8305_v20 = vld [vmem:[%s8568_s24 + $0x10] sm:$0xff] }
 0x137   : > { %1549 = vmatprep.mubr.f32.mxu0 %v11472_v7 }
 0x13a   : > { %6594 = vmatmul.mubr.msk.f32.gmra.mrb[10].mxu0 %vm670_vm1, %v1327_v26  ;;  %v1357_v26 = vsel %vm1314_vm2, %v1354_v18, %v1356_v25  ;;  %v6661_v18 = vld [vmem:[%s11440_s1 + $0x100] sm:$0xff] }
 0x13b   : > { %1555 = vmatprep.mubr.f32.mxu0 %v11472_v7 }
 0x13e   : > { %6595 = vmatmul.mubr.msk.f32.gmra.mrb[12].mxu0 %vm670_vm1, %v1329_v23  ;;  %v1359_v23 = vsel %vm1314_vm2, %v1356_v25, %v1358_v29  ;;  %v6666_v25 = vld [vmem:[%s11440_s1 + $0x128] sm:$0xff] }
 0x13f   : > { %1561 = vmatprep.mubr.f32.mxu0 %v11472_v7 }
 0x142   : > { %6596 = vmatmul.mubr.msk.f32.gmra.mrb[14].mxu0 %vm670_vm1, %v1331_v32  ;;  %v1361_v32 = vsel %vm1314_vm2, %v1358_v29, %v1360_v30 }
 0x143   : > { %1567 = vmatprep.mubr.f32.mxu0 %v11472_v7 }
 0x146   : > { %6597 = vmatmul.mubr.msk.f32.gmra.mrb[16].mxu0 %vm670_vm1, %v1333_v36  ;;  %v1363_v36 = vsel %vm1314_vm2, %v1360_v30, %v1362_v33  ;;  %v6665_v30 = vld [vmem:[%s11440_s1 + $0x120] sm:$0xff] }
 0x147   : > { %1573 = vmatprep.mubr.f32.mxu0 %v11472_v7 }
 0x14a   : > { %6598 = vmatmul.mubr.msk.f32.gmra.mrb[18].mxu0 %vm670_vm1, %v1335_v40  ;;  %v1365_v40 = vsel %vm1314_vm2, %v1362_v33, %v1364_v37 }
 0x14b   : > { %1579 = vmatprep.mubr.f32.mxu0 %v11472_v7 }
 0x14e   : > { %6599 = vmatmul.mubr.msk.f32.gmra.mrb[20].mxu0 %vm670_vm1, %v1337_v46  ;;  %v1367_v46 = vsel %vm1314_vm2, %v1364_v37, %v1366_v42 }
 0x14f   : > { %1585 = vmatprep.mubr.f32.mxu0 %v11472_v7 }
 0x152   : > { %6600 = vmatmul.mubr.msk.f32.gmra.mrb[22].mxu0 %vm670_vm1, %v1339_v51  ;;  %v1369_v51 = vsel %vm1314_vm2, %v1366_v42, %v1368_v49 }
 0x153   : > { %1591 = vmatprep.mubr.f32.mxu0 %v11472_v7 }
 0x156   : > { %6601 = vmatmul.mubr.msk.f32.gmra.mrb[24].mxu0 %vm670_vm1, %v1341_v55  ;;  %v1371_v55 = vsel %vm1314_vm2, %v1368_v49, %v1370_v54  ;;  %v1788_v49 = vrot.slane %v8619_v41, 3 }
 0x157   : > { %1597 = vmatprep.mubr.f32.mxu0 %v11472_v7 }
 0x15a   : > { %6602 = vmatmul.mubr.msk.f32.gmra.mrb[26].mxu0 %vm670_vm1, %v1343_v60  ;;  %v1373_v60 = vsel %vm1314_vm2, %v1370_v54, %v1372_v58  ;;  %v1792_v54 = vrot.slane %v8633_v47, 3 }
 0x15b   : > { %1603 = vmatprep.mubr.f32.mxu0 %v11472_v7 }
 0x15e   : > { %6603 = vmatmul.mubr.msk.f32.gmra.mrb[28].mxu0 %vm670_vm1, %v1345_v0  ;;  %v6662_v0 = vld [vmem:[%s11440_s1 + $0x108] sm:$0xff] }
 0x15f   : > { %1609 = vmatprep.mubr.f32.mxu0 %v11472_v7 }
 0x162   : > { %6604 = vmatmul.mubr.msk.f32.gmra.mrb[30].mxu0 %vm670_vm1, %v1347_v5  ;;  %v1375_v5 = vsel %vm1314_vm2, %v1372_v58, %v1374_v63  ;;  %v1796_v58 = vrot.slane %v8647_v53, 3  ;;  %v1800_v63 = vrot.slane %v8661_v59, 3 }
 0x163   : > { %1615 = vmatprep.mubr.f32.mxu0 %v11472_v7 }
 0x166   : > { %6605 = vmatmul.mubr.msk.f32.gmra.mrb[32].mxu0 %vm670_vm1, %v1349_v10  ;;  %v7416_v10 = vpack.c.bf16 %v6664_v3, %v6662_v0  ;;  %v1802_v0 = vrot.slane %v8668_v62, 3  ;;  %v1804_v3 = vrot.slane %v8675_v1, 3 }
 0x167   : > { %1621 = vmatprep.mubr.f32.mxu0 %v11472_v7 }
 0x168   : > { %7417 = vmatprep.subr.bf16.mxu0 %v7416_v10  ;;  %v1805_v59 = vsel %vm1776_vm3, %v1802_v0, %v1804_v3  ;;  %v1810_v10 = vrot.slane %v8696_v11, 3 }
 0x16a   : > { %6606 = vmatmul.mubr.msk.f32.gmra.mrb[34].mxu0 %vm670_vm1, %v1351_v13  ;;  %v1380_v13 = vsel %vm1314_vm2, %v1376_v9, %v1315_v45  ;;  %v6668_v45 = vld [vmem:[%s11440_s1 + $0x138] sm:$0xff]  ;;  %v1808_v9 = vrot.slane %v8689_v8, 3 }
 0x16b   : > { %1627 = vmatprep.mubr.f32.mxu0 %v11472_v7 }
 0x16e   : > { %6607 = vmatmul.mubr.msk.f32.gmra.mrb[36].mxu0 %vm670_vm1, %v1353_v16  ;;  %v1778_v16 = vrot.slane %v8580_v21, 3 }
 0x16f   : > { %1633 = vmatprep.mubr.f32.mxu0 %v11472_v7 }
 0x170   : > { %v1779_v21 = vsel %vm1776_vm3, %v1777_v15, %v1778_v16 }
 0x172   : > { %6608 = vmatmul.mubr.msk.f32.gmra.mrb[38].mxu0 %vm670_vm1, %v1355_v19  ;;  %v6663_v19 = vld [vmem:[%s11440_s1 + $0x110] sm:$0xff] }
 0x173   : > { %1639 = vmatprep.mubr.f32.mxu0 %v11472_v7  ;;  %v7418_v29 = vpack.c.bf16 %v6663_v19, %v6661_v18  ;;  %v1818_v18 = vrot.slane %v8724_v28, 3  ;;  %v1820_v19 = vrot.slane %v8731_v31, 3 }
 0x176   : > { %6609 = vmatmul.mubr.msk.f32.gmra.mrb[40].mxu0 %vm670_vm1, %v1357_v26  ;;  %v1780_v26 = vrot.slane %v8583_v22, 3 }
 0x177   : > { %1645 = vmatprep.mubr.f32.mxu0 %v11472_v7 }
 0x178   : > { %v1781_v33 = vsel %vm1776_vm3, %v1778_v16, %v1780_v26  ;;  %v1816_v16 = vrot.slane %v8717_v24, 3  ;;  %v1821_v24 = vsel %vm1776_vm3, %v1818_v18, %v1820_v19 }
 0x17a   : > { %6610 = vmatmul.mubr.msk.f32.gmra.mrb[42].mxu0 %vm670_vm1, %v1359_v23  ;;  %v7420_v23 = vpack.c.bf16 %v6668_v45, %v6666_v25  ;;  %v1822_v25 = vrot.slane %v8738_v34, 3  ;;  %v1824_v45 = vrot.slane %v8745_v39, 3 }
 0x17b   : > { %1651 = vmatprep.mubr.f32.mxu0 %v11472_v7 }
 0x17c   : > { %v1823_v28 = vsel %vm1776_vm3, %v1820_v19, %v1822_v25  ;;  %v1825_v31 = vsel %vm1776_vm3, %v1822_v25, %v1824_v45  ;;  %v8315_v25 = vld [vmem:[%s8568_s24 + $0x60] sm:$0xff] }
 0x17e   : > { %6611 = vmatmul.mubr.msk.f32.gmra.mrb[44].mxu0 %vm670_vm1, %v1361_v32  ;;  %v6667_v32 = vld [vmem:[%s11440_s1 + $0x130] sm:$0xff] }
 0x17f   : > { %1657 = vmatprep.mubr.f32.mxu0 %v11472_v7  ;;  %v7422_v22 = vpack.c.bf16 %v6667_v32, %v6665_v30  ;;  %v1830_v30 = vrot.slane %v8766_v52, 3 }
 0x182   : > { %6612 = vmatmul.mubr.msk.f32.gmra.mrb[46].mxu0 %vm670_vm1, %v1363_v36  ;;  %v1782_v36 = vrot.slane %v8589_v27, 3  ;;  %v1786_v27 = vrot.slane %v8612_v38, 3 }
 0x183   : > { %1663 = vmatprep.mubr.f32.mxu0 %v11472_v7 }
 0x184   : > { %v1783_v37 = vsel %vm1776_vm3, %v1780_v26, %v1782_v36 }
 0x186   : > { %6613 = vmatmul.mubr.msk.f32.gmra.mrb[48].mxu0 %vm670_vm1, %v1365_v40  ;;  %v1784_v40 = vrot.slane %v8605_v35, 3  ;;  %v1789_v35 = vsel %vm1776_vm3, %v1786_v27, %v1788_v49 }
 0x187   : > { %1669 = vmatprep.mubr.f32.mxu0 %v11472_v7 }
 0x188   : > { %v1785_v42 = vsel %vm1776_vm3, %v1782_v36, %v1784_v40 }
 0x18a   : > { %6614 = vmatmul.mubr.msk.f32.gmra.mrb[50].mxu0 %vm670_vm1, %v1367_v46  ;;  %v1787_v46 = vsel %vm1776_vm3, %v1784_v40, %v1786_v27  ;;  %v1836_v40 = vrot.slane %v8787_v2, 3  ;;  %v1838_v27 = vrot.slane %v8794_v6, 3 }
 0x18b   : > { %1675 = vmatprep.mubr.f32.mxu0 %v11472_v7 }
 0x18e   : > { %6615 = vmatmul.mubr.msk.f32.gmra.mrb[52].mxu0 %vm670_vm1, %v1369_v51  ;;  %v1790_v51 = vrot.slane %v8626_v44, 3 }
 0x18f   : > { %1681 = vmatprep.mubr.f32.mxu0 %v11472_v7 }
 0x190   : > { %v1791_v38 = vsel %vm1776_vm3, %v1788_v49, %v1790_v51  ;;  %v1793_v41 = vsel %vm1776_vm3, %v1790_v51, %v1792_v54  ;;  %v1842_v49 = vsel %vm1776_vm3, %v1838_v27, %v1777_v15 }
 0x192   : > { %6616 = vmatmul.mubr.msk.f32.gmra.mrb[54].mxu0 %vm670_vm1, %v1371_v55  ;;  %v1794_v55 = vrot.slane %v8640_v50, 3 }
 0x193   : > { %1687 = vmatprep.mubr.f32.mxu0 %v11472_v7 }
 0x194   : > { %v1795_v44 = vsel %vm1776_vm3, %v1792_v54, %v1794_v55  ;;  %v1797_v47 = vsel %vm1776_vm3, %v1794_v55, %v1796_v58  ;;  %v2242_v55 = vrot.slane %v8305_v20, 4 }
 0x196   : > { %6617 = vmatmul.mubr.msk.f32.gmra.mrb[56].mxu0 %vm670_vm1, %v1373_v60  ;;  %v1798_v60 = vrot.slane %v8654_v56, 3  ;;  %v1803_v56 = vsel %vm1776_vm3, %v1800_v63, %v1802_v0 }
 0x197   : > { %1693 = vmatprep.mubr.f32.mxu0 %v11472_v7 }
 0x198   : > { %v1799_v50 = vsel %vm1776_vm3, %v1796_v58, %v1798_v60  ;;  %v1801_v53 = vsel %vm1776_vm3, %v1798_v60, %v1800_v63  ;;  %v8307_v60 = vld [vmem:[%s8568_s24 + $0x20] sm:$0xff] }
 0x19a   : > { %6618 = vmatmul.mubr.msk.f32.gmra.mrb[58].mxu0 %vm670_vm1, %v1375_v5  ;;  %v1806_v5 = vrot.slane %v8682_v4, 3  ;;  %v1811_v4 = vsel %vm1776_vm3, %v1808_v9, %v1810_v10 }
 0x19b   : > { %1699 = vmatprep.mubr.f32.mxu0 %v11472_v7 }
 0x19c   : > { %v1807_v62 = vsel %vm1776_vm3, %v1804_v3, %v1806_v5  ;;  %v1809_v1 = vsel %vm1776_vm3, %v1806_v5, %v1808_v9  ;;  %v8309_v3 = vld [vmem:[%s8568_s24 + $0x30] sm:$0xff] }
 0x19e   : > { %6619 = vmatmul.mubr.msk.f32.gmra.mrb[60].mxu0 %vm670_vm1, %v1377_v12  ;;  %v1812_v12 = vrot.slane %v8703_v14, 3 }
 0x19f   : > { %1705 = vmatprep.mubr.f32.mxu0 %v11472_v7 }
 0x1a0   : > { %v1813_v8 = vsel %vm1776_vm3, %v1810_v10, %v1812_v12  ;;  %v8311_v10 = vld [vmem:[%s8568_s24 + $0x40] sm:$0xff] }
 0x1a2   : > { %6620 = vmatmul.mubr.msk.f32.gmra.mrb[62].mxu0 %vm670_vm1, %v1380_v13  ;;  %v1814_v13 = vrot.slane %v8710_v17, 3  ;;  %v1819_v17 = vsel %vm1776_vm3, %v1816_v16, %v1818_v18 }
 0x1a3   : > { %1981 = vmatprep.mubr.f32.mxu0 %v11472_v7 }
 0x1a4   : > { %v1815_v11 = vsel %vm1776_vm3, %v1812_v12, %v1814_v13  ;;  %v1817_v14 = vsel %vm1776_vm3, %v1814_v13, %v1816_v16  ;;  %v8313_v16 = vld [vmem:[%s8568_s24 + $0x50] sm:$0xff] }
 0x1a6   : > { %6629 = vmatmul.mubr.msk.f32.vlgmr.msra.gmra.mrb[0].mxu0 %vm670_vm1, %v1779_v21  ;;  %v1826_v21 = vrot.slane %v8752_v43, 3 }
 0x1a7   : > { %1987 = vmatprep.mubr.f32.mxu0 %v11472_v7  ;;  %7419 = vmatpush1.bf16.msra.mxu0 %v7418_v29  ;;  %v1828_v29 = vrot.slane %v8759_v48, 3 }
 0x1a8   : > { %7421 = vmatprep.subr.bf16.mxu0 %v7420_v23  ;;  %v1827_v26 = vsel %vm1776_vm3, %v1824_v45, %v1826_v21 }
 0x1a9   : > { %v1829_v23 = vsel %vm1776_vm3, %v1826_v21, %v1828_v29  ;;  %v1831_v32 = vsel %vm1776_vm3, %v1828_v29, %v1830_v30  ;;  %v8317_v29 = vld [vmem:[%s8568_s24 + $0x70] sm:$0xff] }
 0x1aa   : > { %6630 = vmatmul.mubr.msk.f32.gmra.mrb[2].mxu0 %vm670_vm1, %v1781_v33  ;;  %v1832_v33 = vrot.slane %v8773_v57, 3 }
 0x1ab   : > { %1993 = vmatprep.mubr.f32.mxu0 %v11472_v7  ;;  %7423 = vmatpush1.bf16.msra.mxu0 %v7422_v22  ;;  %v1834_v22 = vrot.slane %v8780_v61, 3 }
 0x1ac   : > { %v1833_v36 = vsel %vm1776_vm3, %v1830_v30, %v1832_v33 }
 0x1ae   : > { %6631 = vmatmul.mubr.msk.f32.gmra.mrb[4].mxu0 %vm670_vm1, %v1783_v37  ;;  %v1835_v37 = vsel %vm1776_vm3, %v1832_v33, %v1834_v22 }
 0x1af   : > { %1999 = vmatprep.mubr.f32.mxu0 %v11472_v7 }
 0x1b2   : > { %6632 = vmatmul.mubr.msk.f32.gmra.mrb[6].mxu0 %vm670_vm1, %v1785_v42  ;;  %v1837_v42 = vsel %vm1776_vm3, %v1834_v22, %v1836_v40  ;;  %v8319_v22 = vld [vmem:[%s8568_s24 + $0x80] sm:$0xff] }
 0x1b3   : > { %2005 = vmatprep.mubr.f32.mxu0 %v11472_v7 }
 0x1b6   : > { %6633 = vmatmul.mubr.msk.f32.gmra.mrb[8].mxu0 %vm670_vm1, %v1787_v46  ;;  %v1839_v46 = vsel %vm1776_vm3, %v1836_v40, %v1838_v27 }
 0x1b7   : > { %2011 = vmatprep.mubr.f32.mxu0 %v11472_v7 }
 0x1ba   : > { %6634 = vmatmul.mubr.msk.f32.gmra.mrb[10].mxu0 %vm670_vm1, %v1789_v35  ;;  %v9241_v35 = vld [vmem:[%s8568_s24] sm:$0xff] }
 0x1bb   : > { %2017 = vmatprep.mubr.f32.mxu0 %v11472_v7  ;;  %v2239_v51 = vrot.slane %v9241_v35, 4 }
 0x1be   : > { %6635 = vmatmul.mubr.msk.f32.gmra.mrb[12].mxu0 %vm670_vm1, %v1791_v38  ;;  %v8304_v38 = vld [vmem:[%s8568_s24 + $0x8] sm:$0xff] }
 0x1bf   : > { %2023 = vmatprep.mubr.f32.mxu0 %v11472_v7  ;;  %v2240_v54 = vrot.slane %v8304_v38, 4 }
 0x1c1   : > { %v2243_v15 = vsel %vm2238_vm4, %v2240_v54, %v2242_v55 }
 0x1c2   : > { %6636 = vmatmul.mubr.msk.f32.gmra.mrb[14].mxu0 %vm670_vm1, %v1793_v41  ;;  %v2241_v41 = vsel %vm2238_vm4, %v2239_v51, %v2240_v54 }
 0x1c3   : > { %2029 = vmatprep.mubr.f32.mxu0 %v11472_v7 }
 0x1c6   : > { %6637 = vmatmul.mubr.msk.f32.gmra.mrb[16].mxu0 %vm670_vm1, %v1795_v44  ;;  %v8306_v44 = vld [vmem:[%s8568_s24 + $0x18] sm:$0xff] }
 0x1c7   : > { %2035 = vmatprep.mubr.f32.mxu0 %v11472_v7  ;;  %v2244_v58 = vrot.slane %v8306_v44, 4 }
 0x1ca   : > { %6638 = vmatmul.mubr.msk.f32.gmra.mrb[18].mxu0 %vm670_vm1, %v1797_v47  ;;  %v2245_v47 = vsel %vm2238_vm4, %v2242_v55, %v2244_v58 }
 0x1cb   : > { %2041 = vmatprep.mubr.f32.mxu0 %v11472_v7 }
 0x1ce   : > { %6639 = vmatmul.mubr.msk.f32.gmra.mrb[20].mxu0 %vm670_vm1, %v1799_v50  ;;  %v2246_v50 = vrot.slane %v8307_v60, 4 }
 0x1cf   : > { %2047 = vmatprep.mubr.f32.mxu0 %v11472_v7 }
 0x1d0   : > { %v2247_v63 = vsel %vm2238_vm4, %v2244_v58, %v2246_v50 }
 0x1d2   : > { %6640 = vmatmul.mubr.msk.f32.gmra.mrb[22].mxu0 %vm670_vm1, %v1801_v53  ;;  %v8308_v53 = vld [vmem:[%s8568_s24 + $0x28] sm:$0xff] }
 0x1d3   : > { %2053 = vmatprep.mubr.f32.mxu0 %v11472_v7  ;;  %v2248_v0 = vrot.slane %v8308_v53, 4 }
 0x1d6   : > { %6641 = vmatmul.mubr.msk.f32.gmra.mrb[24].mxu0 %vm670_vm1, %v1803_v56  ;;  %v2249_v56 = vsel %vm2238_vm4, %v2246_v50, %v2248_v0 }
 0x1d7   : > { %2059 = vmatprep.mubr.f32.mxu0 %v11472_v7 }
 0x1da   : > { %6642 = vmatmul.mubr.msk.f32.gmra.mrb[26].mxu0 %vm670_vm1, %v1805_v59  ;;  %v2250_v59 = vrot.slane %v8309_v3, 4 }
 0x1db   : > { %2065 = vmatprep.mubr.f32.mxu0 %v11472_v7 }
 0x1dc   : > { %v2251_v5 = vsel %vm2238_vm4, %v2248_v0, %v2250_v59 }
 0x1de   : > { %6643 = vmatmul.mubr.msk.f32.gmra.mrb[28].mxu0 %vm670_vm1, %v1807_v62  ;;  %v8310_v62 = vld [vmem:[%s8568_s24 + $0x38] sm:$0xff] }
 0x1df   : > { %2071 = vmatprep.mubr.f32.mxu0 %v11472_v7  ;;  %v2252_v9 = vrot.slane %v8310_v62, 4  ;;  %v2288_v62 = vrot.slane %v8752_v43, 4 }
 0x1e2   : > { %6644 = vmatmul.mubr.msk.f32.gmra.mrb[30].mxu0 %vm670_vm1, %v1809_v1  ;;  %v2253_v1 = vsel %vm2238_vm4, %v2250_v59, %v2252_v9  ;;  %v2286_v59 = vrot.slane %v8745_v39, 4 }
 0x1e3   : > { %2077 = vmatprep.mubr.f32.mxu0 %v11472_v7 }
 0x1e6   : > { %6645 = vmatmul.mubr.msk.f32.gmra.mrb[32].mxu0 %vm670_vm1, %v1811_v4  ;;  %v2254_v4 = vrot.slane %v8311_v10, 4  ;;  %v2294_v10 = vrot.slane %v8773_v57, 4 }
 0x1e7   : > { %2083 = vmatprep.mubr.f32.mxu0 %v11472_v7 }
 0x1e8   : > { %v2255_v12 = vsel %vm2238_vm4, %v2252_v9, %v2254_v4  ;;  %v2290_v9 = vrot.slane %v8759_v48, 4 }
 0x1ea   : > { %6646 = vmatmul.mubr.msk.f32.gmra.mrb[34].mxu0 %vm670_vm1, %v1813_v8  ;;  %v8312_v8 = vld [vmem:[%s8568_s24 + $0x48] sm:$0xff]  ;;  %v2291_v39 = vsel %vm2238_vm4, %v2288_v62, %v2290_v9 }
 0x1eb   : > { %2089 = vmatprep.mubr.f32.mxu0 %v11472_v7  ;;  %v2256_v13 = vrot.slane %v8312_v8, 4  ;;  %v2300_v8 = vrot.slane %v8794_v6, 4 }
 0x1ee   : > { %6647 = vmatmul.mubr.msk.f32.gmra.mrb[36].mxu0 %vm670_vm1, %v1815_v11  ;;  %v2257_v11 = vsel %vm2238_vm4, %v2254_v4, %v2256_v13  ;;  %v2296_v4 = vrot.slane %v8780_v61, 4 }
 0x1ef   : > { %2095 = vmatprep.mubr.f32.mxu0 %v11472_v7 }
 0x1f2   : > { %6648 = vmatmul.mubr.msk.f32.gmra.mrb[38].mxu0 %vm670_vm1, %v1817_v14  ;;  %v2258_v14 = vrot.slane %v8313_v16, 4  ;;  %v2700_v16 = vld [vmem:[%s11441_s2] sm:$0x3] }
 0x1f3   : > { %2101 = vmatprep.mubr.f32.mxu0 %v11472_v7 }
 0x1f4   : > { %v2259_v18 = vsel %vm2238_vm4, %v2256_v13, %v2258_v14  ;;  %v2702_v13 = vlaneseq }
 0x1f6   : > { %6649 = vmatmul.mubr.msk.f32.gmra.mrb[40].mxu0 %vm670_vm1, %v1819_v17  ;;  %v8314_v17 = vld [vmem:[%s8568_s24 + $0x58] sm:$0xff] }
 0x1f7   : > { %2107 = vmatprep.mubr.f32.mxu0 %v11472_v7  ;;  %v2260_v19 = vrot.slane %v8314_v17, 4 }
 0x1fa   : > { %6650 = vmatmul.mubr.msk.f32.gmra.mrb[42].mxu0 %vm670_vm1, %v1821_v24  ;;  %v2261_v24 = vsel %vm2238_vm4, %v2258_v14, %v2260_v19 }
 0x1fb   : > { %2113 = vmatprep.mubr.f32.mxu0 %v11472_v7 }
 0x1fe   : > { %6651 = vmatmul.mubr.msk.f32.gmra.mrb[44].mxu0 %vm670_vm1, %v1823_v28  ;;  %v2262_v28 = vrot.slane %v8315_v25, 4 }
 0x1ff   : > { %2119 = vmatprep.mubr.f32.mxu0 %v11472_v7 }
 0x200   : > { %v2263_v45 = vsel %vm2238_vm4, %v2260_v19, %v2262_v28 }
 0x202   : > { %6652 = vmatmul.mubr.msk.f32.gmra.mrb[46].mxu0 %vm670_vm1, %v1825_v31  ;;  %v8316_v31 = vld [vmem:[%s8568_s24 + $0x68] sm:$0xff] }
 0x203   : > { %2125 = vmatprep.mubr.f32.mxu0 %v11472_v7  ;;  %v2264_v21 = vrot.slane %v8316_v31, 4 }
 0x206   : > { %6653 = vmatmul.mubr.msk.f32.gmra.mrb[48].mxu0 %vm670_vm1, %v1827_v26  ;;  %v2265_v26 = vsel %vm2238_vm4, %v2262_v28, %v2264_v21 }
 0x207   : > { %2131 = vmatprep.mubr.f32.mxu0 %v11472_v7 }
 0x20a   : > { %6654 = vmatmul.mubr.msk.f32.gmra.mrb[50].mxu0 %vm670_vm1, %v1829_v23  ;;  %v2266_v23 = vrot.slane %v8317_v29, 4 }
 0x20b   : > { %2137 = vmatprep.mubr.f32.mxu0 %v11472_v7 }
 0x20c   : > { %v2267_v30 = vsel %vm2238_vm4, %v2264_v21, %v2266_v23 }
 0x20e   : > { %6655 = vmatmul.mubr.msk.f32.gmra.mrb[52].mxu0 %vm670_vm1, %v1831_v32  ;;  %v8318_v32 = vld [vmem:[%s8568_s24 + $0x78] sm:$0xff] }
 0x20f   : > { %2143 = vmatprep.mubr.f32.mxu0 %v11472_v7  ;;  %v2268_v33 = vrot.slane %v8318_v32, 4 }
 0x212   : > { %6656 = vmatmul.mubr.msk.f32.gmra.mrb[54].mxu0 %vm670_vm1, %v1833_v36  ;;  %v2269_v36 = vsel %vm2238_vm4, %v2266_v23, %v2268_v33 }
 0x213   : > { %2149 = vmatprep.mubr.f32.mxu0 %v11472_v7 }
 0x216   : > { %6657 = vmatmul.mubr.msk.f32.gmra.mrb[56].mxu0 %vm670_vm1, %v1835_v37  ;;  %v2270_v37 = vrot.slane %v8319_v22, 4 }
 0x217   : > { %2155 = vmatprep.mubr.f32.mxu0 %v11472_v7 }
 0x218   : > { %v2271_v40 = vsel %vm2238_vm4, %v2268_v33, %v2270_v37 }
 0x21a   : > { %6658 = vmatmul.mubr.msk.f32.gmra.mrb[58].mxu0 %vm670_vm1, %v1837_v42  ;;  %v8320_v42 = vld [vmem:[%s8568_s24 + $0x88] sm:$0xff] }
 0x21b   : > { %2161 = vmatprep.mubr.f32.mxu0 %v11472_v7  ;;  %v2272_v27 = vrot.slane %v8320_v42, 4 }
 0x21e   : > { %6659 = vmatmul.mubr.msk.f32.gmra.mrb[60].mxu0 %vm670_vm1, %v1839_v46  ;;  %v2273_v46 = vsel %vm2238_vm4, %v2270_v37, %v2272_v27 }
 0x21f   : > { %2167 = vmatprep.mubr.f32.mxu0 %v11472_v7 }
 0x222   : > { %6660 = vmatmul.mubr.msk.f32.gmra.mrb[62].mxu0 %vm670_vm1, %v1842_v49  ;;  %v8321_v49 = vld [vmem:[%s8568_s24 + $0x90] sm:$0xff] }
 0x223   : > { %2443 = vmatprep.mubr.f32.mxu0 %v11472_v7  ;;  %v2274_v38 = vrot.slane %v8321_v49, 4 }
 0x225   : > { %v2275_v54 = vsel %vm2238_vm4, %v2272_v27, %v2274_v38  ;;  %v3163_v27 = vld [vmem:[%s11442_s3 + $0x8] sm:$0xff] }
 0x226   : > { %6669 = vmatmul.mubr.msk.f32.vlgmr.msra.gmra.mrb[0].mxu0 %vm670_vm1, %v2241_v41  ;;  %v8322_v41 = vld [vmem:[%s8568_s24 + $0x98] sm:$0xff]  ;;  %3254 = vmatprep.mubr.f32.mxu1 %v3163_v27 }
 0x227   : > { %2449 = vmatprep.mubr.f32.mxu0 %v11472_v7  ;;  %v2276_v20 = vrot.slane %v8322_v41, 4 }
 0x229   : > { %v2277_v55 = vsel %vm2238_vm4, %v2274_v38, %v2276_v20 }
 0x22a   : > { %6670 = vmatmul.mubr.msk.f32.gmra.mrb[2].mxu0 %vm670_vm1, %v2243_v15  ;;  %v8323_v15 = vld [vmem:[%s8568_s24 + $0xa0] sm:$0xff] }
 0x22b   : > { %2455 = vmatprep.mubr.f32.mxu0 %v11472_v7  ;;  %v2278_v44 = vrot.slane %v8323_v15, 4 }
 0x22d   : > { %v2279_v58 = vsel %vm2238_vm4, %v2276_v20, %v2278_v44 }
 0x22e   : > { %6671 = vmatmul.mubr.msk.f32.gmra.mrb[4].mxu0 %vm670_vm1, %v2245_v47  ;;  %v8324_v47 = vld [vmem:[%s8568_s24 + $0xa8] sm:$0xff] }
 0x22f   : > { %2461 = vmatprep.mubr.f32.mxu0 %v11472_v7  ;;  %v2280_v60 = vrot.slane %v8324_v47, 4 }
 0x231   : > { %v2281_v50 = vsel %vm2238_vm4, %v2278_v44, %v2280_v60 }
 0x232   : > { %6672 = vmatmul.mubr.msk.f32.gmra.mrb[6].mxu0 %vm670_vm1, %v2247_v63  ;;  %v8325_v63 = vld [vmem:[%s8568_s24 + $0xb0] sm:$0xff]  ;;  %s513_s24 = sand.u32 1, %s8380_s22  }
 0x233   : > { %2467 = vmatprep.mubr.f32.mxu0 %v11472_v7  ;;  %v2282_v53 = vrot.slane %v8325_v63, 4  ;;  %s6506_s29 = sshll.u32 %s513_s24, 3  ;;  %s6430_s17 = scalar_lea.sflag [#allocation3], %s513_s24 }
 0x234   : > { %s515_s20 = scalar_lea.vmem [#allocation2], %s6506_s29  ;;  %s8330_s29 = sshll.u32 %s8393_s25, 4  ;;  %s8331_s29 = int_to_ptr.vmem [resolvable:$false] %s8330_s29 }
 0x235   : > { %v2283_v0 = vsel %vm2238_vm4, %v2280_v60, %v2282_v53  ;;  %s6443_s26 = sshll.u32 %s515_s20, 4  ;;  %s8332_s30 = scalar_lea.vmem %s8331_s29, 256  ;;  %s11399_s26 = int_to_ptr.vmem [resolvable:$true] %s6443_s26 }
 0x236   : > { %6673 = vmatmul.mubr.msk.f32.gmra.mrb[8].mxu0 %vm670_vm1, %v2249_v56  ;;  %v2284_v56 = vrot.slane %v8738_v34, 4  ;;  %v2289_v34 = vsel %vm2238_vm4, %v2286_v59, %v2288_v62  ;;  %s8326_s28 = scalar_lea.vmem %s11399_s26, 128  ;;  %p8333_p0 = scmp.lt.s32.totalorder %s11399_s26, %s8331_s29 }
 0x237   : > { %2473 = vmatprep.mubr.f32.mxu0 %v11472_v7  ;;  %p8327_p11 = scmp.ne.s32.totalorder %s11399_s26, %s8326_s28  ;;  %p8334_p1 = scmp.lt.s32.totalorder %s8332_s30, %s8326_s28 }
 0x238   : > { %v2285_v3 = vsel %vm2238_vm4, %v2282_v53, %v2284_v56 }
 0x239   : > { %p8328_p12 = pnand %p8327_p11, %p8517_p5  ;;  %p8335_p2 = por %p8334_p1, %p8333_p0 }
 0x23a   : > { %6674 = vmatmul.mubr.msk.f32.gmra.mrb[10].mxu0 %vm670_vm1, %v2251_v5  ;;  %v2287_v5 = vsel %vm2238_vm4, %v2284_v56, %v2286_v59 }
 0x23b   : > { %2479 = vmatprep.mubr.f32.mxu0 %v11472_v7  ;;  %p8329_p13 = pneg %p8328_p12 }
 0x23d   : > { %p8336_p3 = pnand %p8335_p2, %p8329_p13 }
 0x23e   : > { %6675 = vmatmul.mubr.msk.f32.gmra.mrb[12].mxu0 %vm670_vm1, %v2253_v1  ;;  %v2292_v1 = vrot.slane %v8766_v52, 4  ;;  %v2297_v52 = vsel %vm2238_vm4, %v2294_v10, %v2296_v4 }
 0x23f   : > { %2485 = vmatprep.mubr.f32.mxu0 %v11472_v7 }
 0x240   : > { %v2293_v43 = vsel %vm2238_vm4, %v2290_v9, %v2292_v1  ;;  %v2295_v48 = vsel %vm2238_vm4, %v2292_v1, %v2294_v10 }
 0x242   : > { %6676 = vmatmul.mubr.msk.f32.gmra.mrb[14].mxu0 %vm670_vm1, %v2255_v12  ;;  %v2298_v12 = vrot.slane %v8787_v2, 4  ;;  %v2304_v2 = vsel %vm2238_vm4, %v2300_v8, %v2239_v51 }
 0x243   : > { %2491 = vmatprep.mubr.f32.mxu0 %v11472_v7 }
 0x244   : > { %v2299_v57 = vsel %vm2238_vm4, %v2296_v4, %v2298_v12  ;;  %v2301_v61 = vsel %vm2238_vm4, %v2298_v12, %v2300_v8 }
 0x246   : > { %6677 = vmatmul.mubr.msk.f32.gmra.mrb[16].mxu0 %vm670_vm1, %v2257_v11  ;;  %v9376_v11 = vshrl.u32 %v2702_v13, 7 }
 0x247   : > { %2497 = vmatprep.mubr.f32.mxu0 %v11472_v7 }
 0x248   : > { %11484 = vst [vmem:[#allocation11_spill] sm:$0xff] %v9376_v11  ;;  %v11465_v6 = vsub.s32 0, %v9376_v11  ;;  %v11464_v14 = vsub.s32 1, %v9376_v11 }
 0x24a   : > { %6678 = vmatmul.mubr.msk.f32.gmra.mrb[18].mxu0 %vm670_vm1, %v2259_v18  ;;  %v9385_v18 = vrot.slane %v2700_v16, %v11465_v6  ;;  %v9389_v35 = vrot.slane %v2700_v16, %v11464_v14 }
 0x24b   : > { %2503 = vmatprep.mubr.f32.mxu0 %v11472_v7 }
 0x24e   : > { %6679 = vmatmul.mubr.msk.f32.gmra.mrb[20].mxu0 %vm670_vm1, %v2261_v24 }
 0x24f   : > { %2509 = vmatprep.mubr.f32.mxu0 %v11472_v7 }
 0x252   : > { %6680 = vmatmul.mubr.msk.f32.gmra.mrb[22].mxu0 %vm670_vm1, %v2263_v45 }
 0x253   : > { %2515 = vmatprep.mubr.f32.mxu0 %v11472_v7 }
 0x256   : > { %6681 = vmatmul.mubr.msk.f32.gmra.mrb[24].mxu0 %vm670_vm1, %v2265_v26 }
 0x257   : > { %2521 = vmatprep.mubr.f32.mxu0 %v11472_v7 }
 0x25a   : > { %6682 = vmatmul.mubr.msk.f32.gmra.mrb[26].mxu0 %vm670_vm1, %v2267_v30 }
 0x25b   : > { %2527 = vmatprep.mubr.f32.mxu0 %v11472_v7 }
 0x25e   : > { %6683 = vmatmul.mubr.msk.f32.gmra.mrb[28].mxu0 %vm670_vm1, %v2269_v36 }
 0x25f   : > { %2533 = vmatprep.mubr.f32.mxu0 %v11472_v7 }
 0x262   : > { %6684 = vmatmul.mubr.msk.f32.gmra.mrb[30].mxu0 %vm670_vm1, %v2271_v40 }
 0x263   : > { %2539 = vmatprep.mubr.f32.mxu0 %v11472_v7 }
 0x266   : > { %6685 = vmatmul.mubr.msk.f32.gmra.mrb[32].mxu0 %vm670_vm1, %v2273_v46 }
 0x267   : > { %2545 = vmatprep.mubr.f32.mxu0 %v11472_v7 }
 0x26a   : > { %6686 = vmatmul.mubr.msk.f32.gmra.mrb[34].mxu0 %vm670_vm1, %v2275_v54 }
 0x26b   : > { %2551 = vmatprep.mubr.f32.mxu0 %v11472_v7 }
 0x26e   : > { %6687 = vmatmul.mubr.msk.f32.gmra.mrb[36].mxu0 %vm670_vm1, %v2277_v55 }
 0x26f   : > { %2557 = vmatprep.mubr.f32.mxu0 %v11472_v7 }
 0x272   : > { %6688 = vmatmul.mubr.msk.f32.gmra.mrb[38].mxu0 %vm670_vm1, %v2279_v58 }
 0x273   : > { %2563 = vmatprep.mubr.f32.mxu0 %v11472_v7 }
 0x276   : > { %6689 = vmatmul.mubr.msk.f32.gmra.mrb[40].mxu0 %vm670_vm1, %v2281_v50 }
 0x277   : > { %2569 = vmatprep.mubr.f32.mxu0 %v11472_v7 }
 0x27a   : > { %6690 = vmatmul.mubr.msk.f32.gmra.mrb[42].mxu0 %vm670_vm1, %v2283_v0 }
 0x27b   : > { %2575 = vmatprep.mubr.f32.mxu0 %v11472_v7 }
 0x27e   : > { %6691 = vmatmul.mubr.msk.f32.gmra.mrb[44].mxu0 %vm670_vm1, %v2285_v3 }
 0x27f   : > { %2581 = vmatprep.mubr.f32.mxu0 %v11472_v7 }
 0x282   : > { %6692 = vmatmul.mubr.msk.f32.gmra.mrb[46].mxu0 %vm670_vm1, %v2287_v5 }
 0x283   : > { %2587 = vmatprep.mubr.f32.mxu0 %v11472_v7 }
 0x286   : > { %6693 = vmatmul.mubr.msk.f32.gmra.mrb[48].mxu0 %vm670_vm1, %v2289_v34 }
 0x287   : > { %2593 = vmatprep.mubr.f32.mxu0 %v11472_v7 }
 0x28a   : > { %6694 = vmatmul.mubr.msk.f32.gmra.mrb[50].mxu0 %vm670_vm1, %v2291_v39 }
 0x28b   : > { %2599 = vmatprep.mubr.f32.mxu0 %v11472_v7 }
 0x28e   : > { %6695 = vmatmul.mubr.msk.f32.gmra.mrb[52].mxu0 %vm670_vm1, %v2293_v43 }
 0x28f   : > { %2605 = vmatprep.mubr.f32.mxu0 %v11472_v7 }
 0x292   : > { %6696 = vmatmul.mubr.msk.f32.gmra.mrb[54].mxu0 %vm670_vm1, %v2295_v48 }
 0x293   : > { %2611 = vmatprep.mubr.f32.mxu0 %v11472_v7 }
 0x296   : > { %6697 = vmatmul.mubr.msk.f32.gmra.mrb[56].mxu0 %vm670_vm1, %v2297_v52 }
 0x297   : > { %2617 = vmatprep.mubr.f32.mxu0 %v11472_v7 }
 0x29a   : > { %6698 = vmatmul.mubr.msk.f32.gmra.mrb[58].mxu0 %vm670_vm1, %v2299_v57 }
 0x29b   : > { %2623 = vmatprep.mubr.f32.mxu0 %v11472_v7 }
 0x29e   : > { %6699 = vmatmul.mubr.msk.f32.gmra.mrb[60].mxu0 %vm670_vm1, %v2301_v61 }
 0x29f   : > { %2629 = vmatprep.mubr.f32.mxu0 %v11472_v7 }
 0x2a2   : > { %6700 = vmatmul.mubr.msk.f32.gmra.mrb[62].mxu0 %vm670_vm1, %v2304_v2 }
 0x2f9   : > { %v2445_v51 = vpop.f32.mrb[0].mxu0 }
 0x2fa   : > { %v2712_v17 = vadd.f32 %v9385_v18, %v2445_v51  ;;  %v2447_v19 = vpop.f32.mrb[1].mxu0 }
 0x2fb   : > { %v2713_v24 = vadd.f32 %v9389_v35, %v2447_v19 }
 0x2fc   : > { %v2776_v28 = vmax.f32 %v2712_v17, 0.0 }
 0x2fd   : > { %v2451_v25 = vpop.f32.mrb[2].mxu0  ;;  %v2777_v21 = vmax.f32 %v2713_v24, 0.0 }
 0x2fe   : > { %v2714_v45 = vadd.f32 %v9385_v18, %v2451_v25  ;;  %v2453_v31 = vpop.f32.mrb[3].mxu0  ;;  %v9395_v32 = vrot.slane %v2776_v28, 1 }
 0x2ff   : > { %v2715_v26 = vadd.f32 %v9389_v35, %v2453_v31  ;;  %v9398_v37 = vrot.slane %v2777_v21, 1 }
 0x300   : > { %v2778_v29 = vmax.f32 %v2714_v45, 0.0 }
 0x301   : > { %v2779_v23 = vmax.f32 %v2715_v26, 0.0  ;;  %v2457_v30 = vpop.f32.mrb[4].mxu0 }
 0x302   : > { %v2905_v33 = vrot.slane %v2778_v29, 1  ;;  %v2716_v36 = vadd.f32 %v9385_v18, %v2457_v30  ;;  %v2459_v22 = vpop.f32.mrb[5].mxu0 }
 0x303   : > { %v2908_v40 = vrot.slane %v2779_v23, 1  ;;  %v2717_v42 = vadd.f32 %v9389_v35, %v2459_v22 }
 0x304   : > { %v2780_v46 = vmax.f32 %v2716_v36, 0.0  ;;  %v2906_v49 = vsel %vm594_vm0, %v9395_v32, %v2905_v33 }
 0x305   : > { %v2781_v38 = vmax.f32 %v2717_v42, 0.0  ;;  %v2463_v54 = vpop.f32.mrb[6].mxu0  ;;  %v2909_v41 = vsel %vm594_vm0, %v9398_v37, %v2908_v40  ;;  %v3098_v20 = vmax.f32 %v2776_v28, %v2906_v49 }
 0x306   : > { %v2910_v55 = vrot.slane %v2780_v46, 1  ;;  %v2718_v15 = vadd.f32 %v9385_v18, %v2463_v54  ;;  %v2465_v44 = vpop.f32.mrb[7].mxu0  ;;  %v3099_v58 = vmax.f32 %v2777_v21, %v2909_v41 }
 0x307   : > { %v2912_v47 = vrot.slane %v2781_v38, 1  ;;  %v2719_v60 = vadd.f32 %v9389_v35, %v2465_v44 }
 0x308   : > { %v2782_v50 = vmax.f32 %v2718_v15, 0.0  ;;  %v2911_v63 = vsel %vm594_vm0, %v2905_v33, %v2910_v55 }
 0x309   : > { %v2783_v53 = vmax.f32 %v2719_v60, 0.0  ;;  %v2469_v0 = vpop.f32.mrb[8].mxu0  ;;  %v2913_v56 = vsel %vm594_vm0, %v2908_v40, %v2912_v47  ;;  %v3100_v3 = vmax.f32 %v2778_v29, %v2911_v63 }
 0x30a   : > { %v2914_v59 = vrot.slane %v2782_v50, 1  ;;  %v2720_v5 = vadd.f32 %v9385_v18, %v2469_v0  ;;  %v2471_v62 = vpop.f32.mrb[9].mxu0  ;;  %v3101_v34 = vmax.f32 %v2779_v23, %v2913_v56 }
 0x30b   : > { %v2916_v9 = vrot.slane %v2783_v53, 1  ;;  %v2721_v39 = vadd.f32 %v9389_v35, %v2471_v62  ;;  %v7426_v1 = vpack.c.bf16 %v3100_v3, %v3098_v20 }
 0x30c   : > { %v2784_v43 = vmax.f32 %v2720_v5, 0.0  ;;  %v7424_v10 = vpack.c.bf16 %v3101_v34, %v3099_v58  ;;  %v2915_v48 = vsel %vm594_vm0, %v2910_v55, %v2914_v59 }
 0x30d   : > { %v2785_v4 = vmax.f32 %v2721_v39, 0.0  ;;  %v2475_v52 = vpop.f32.mrb[10].mxu0  ;;  %v2917_v12 = vsel %vm594_vm0, %v2912_v47, %v2916_v9  ;;  %v3102_v57 = vmax.f32 %v2780_v46, %v2915_v48 }
 0x30e   : > { %v2918_v8 = vrot.slane %v2784_v43, 1  ;;  %v2722_v61 = vadd.f32 %v9385_v18, %v2475_v52  ;;  %v2477_v2 = vpop.f32.mrb[11].mxu0  ;;  %7425 = vmatprep.subr.bf16.mxu1 %v7424_v10  ;;  %v3103_v13 = vmax.f32 %v2781_v38, %v2917_v12 }
 0x30f   : > { %v2920_v16 = vrot.slane %v2785_v4, 1  ;;  %v2723_v51 = vadd.f32 %v9389_v35, %v2477_v2  ;;  %7427 = vmatpush1.bf16.msra.mxu1 %v7426_v1 }
 0x310   : > { %v2786_v17 = vmax.f32 %v2722_v61, 0.0  ;;  %v2919_v19 = vsel %vm594_vm0, %v2914_v59, %v2918_v8 }
 0x311   : > { %v2787_v24 = vmax.f32 %v2723_v51, 0.0  ;;  %v2481_v25 = vpop.f32.mrb[12].mxu0  ;;  %v2921_v28 = vsel %vm594_vm0, %v2916_v9, %v2920_v16  ;;  %v3104_v45 = vmax.f32 %v2782_v50, %v2919_v19 }
 0x312   : > { %v2922_v31 = vrot.slane %v2786_v17, 1  ;;  %v2724_v21 = vadd.f32 %v9385_v18, %v2481_v25  ;;  %v2483_v26 = vpop.f32.mrb[13].mxu0  ;;  %v3105_v29 = vmax.f32 %v2783_v53, %v2921_v28 }
 0x313   : > { %v2924_v23 = vrot.slane %v2787_v24, 1  ;;  %v2725_v30 = vadd.f32 %v9389_v35, %v2483_v26  ;;  %v7430_v33 = vpack.c.bf16 %v3104_v45, %v3102_v57 }
 0x314   : > { %v2788_v36 = vmax.f32 %v2724_v21, 0.0  ;;  %v7428_v22 = vpack.c.bf16 %v3105_v29, %v3103_v13  ;;  %v2923_v40 = vsel %vm594_vm0, %v2918_v8, %v2922_v31 }
 0x315   : > { %v2789_v42 = vmax.f32 %v2725_v30, 0.0  ;;  %v2487_v27 = vpop.f32.mrb[14].mxu0  ;;  %v2925_v46 = vsel %vm594_vm0, %v2920_v16, %v2924_v23  ;;  %v3106_v49 = vmax.f32 %v2784_v43, %v2923_v40 }
 0x316   : > { %v2926_v38 = vrot.slane %v2788_v36, 1  ;;  %v2726_v54 = vadd.f32 %v9385_v18, %v2487_v27  ;;  %v2489_v41 = vpop.f32.mrb[15].mxu0  ;;  %7429 = vmatprep.subr.bf16.mxu1 %v7428_v22  ;;  %v3107_v20 = vmax.f32 %v2785_v4, %v2925_v46 }
 0x317   : > { %v2928_v55 = vrot.slane %v2789_v42, 1  ;;  %v2727_v15 = vadd.f32 %v9389_v35, %v2489_v41  ;;  %7431 = vmatpush1.bf16.msra.mxu1 %v7430_v33 }
 0x318   : > { %v2790_v44 = vmax.f32 %v2726_v54, 0.0  ;;  %v2927_v58 = vsel %vm594_vm0, %v2922_v31, %v2926_v38 }
 0x319   : > { %v2791_v47 = vmax.f32 %v2727_v15, 0.0  ;;  %v2493_v60 = vpop.f32.mrb[16].mxu0  ;;  %v2929_v50 = vsel %vm594_vm0, %v2924_v23, %v2928_v55  ;;  %v3108_v63 = vmax.f32 %v2786_v17, %v2927_v58 }
 0x31a   : > { %v2930_v53 = vrot.slane %v2790_v44, 1  ;;  %v2728_v0 = vadd.f32 %v9385_v18, %v2493_v60  ;;  %v2495_v56 = vpop.f32.mrb[17].mxu0  ;;  %v3109_v3 = vmax.f32 %v2787_v24, %v2929_v50 }
 0x31b   : > { %v2932_v59 = vrot.slane %v2791_v47, 1  ;;  %v2729_v5 = vadd.f32 %v9389_v35, %v2495_v56  ;;  %v7434_v62 = vpack.c.bf16 %v3108_v63, %v3106_v49 }
 0x31c   : > { %v2792_v34 = vmax.f32 %v2728_v0, 0.0  ;;  %v7432_v9 = vpack.c.bf16 %v3109_v3, %v3107_v20  ;;  %v2931_v39 = vsel %vm594_vm0, %v2926_v38, %v2930_v53 }
 0x31d   : > { %v2793_v1 = vmax.f32 %v2729_v5, 0.0  ;;  %v2499_v43 = vpop.f32.mrb[18].mxu0  ;;  %v2933_v10 = vsel %vm594_vm0, %v2928_v55, %v2932_v59  ;;  %v3110_v48 = vmax.f32 %v2788_v36, %v2931_v39 }
 0x31e   : > { %v2934_v4 = vrot.slane %v2792_v34, 1  ;;  %v2730_v52 = vadd.f32 %v9385_v18, %v2499_v43  ;;  %v2501_v12 = vpop.f32.mrb[19].mxu0  ;;  %7433 = vmatprep.subr.bf16.mxu1 %v7432_v9  ;;  %v3111_v57 = vmax.f32 %v2789_v42, %v2933_v10 }
 0x31f   : > { %v2936_v8 = vrot.slane %v2793_v1, 1  ;;  %v2731_v61 = vadd.f32 %v9389_v35, %v2501_v12  ;;  %7435 = vmatpush1.bf16.msra.mxu1 %v7434_v62 }
 0x320   : > { %v2794_v2 = vmax.f32 %v2730_v52, 0.0  ;;  %v2935_v13 = vsel %vm594_vm0, %v2930_v53, %v2934_v4 }
 0x321   : > { %v2795_v16 = vmax.f32 %v2731_v61, 0.0  ;;  %v2505_v51 = vpop.f32.mrb[20].mxu0  ;;  %v2937_v17 = vsel %vm594_vm0, %v2932_v59, %v2936_v8  ;;  %v3112_v19 = vmax.f32 %v2790_v44, %v2935_v13 }
 0x322   : > { %v2938_v24 = vrot.slane %v2794_v2, 1  ;;  %v2732_v25 = vadd.f32 %v9385_v18, %v2505_v51  ;;  %v2507_v28 = vpop.f32.mrb[21].mxu0  ;;  %v3113_v45 = vmax.f32 %v2791_v47, %v2937_v17 }
 0x323   : > { %v2940_v31 = vrot.slane %v2795_v16, 1  ;;  %v2733_v21 = vadd.f32 %v9389_v35, %v2507_v28  ;;  %v7438_v26 = vpack.c.bf16 %v3112_v19, %v3110_v48 }
 0x324   : > { %v2796_v29 = vmax.f32 %v2732_v25, 0.0  ;;  %v7436_v23 = vpack.c.bf16 %v3113_v45, %v3111_v57  ;;  %v2939_v30 = vsel %vm594_vm0, %v2934_v4, %v2938_v24 }
 0x325   : > { %v2797_v33 = vmax.f32 %v2733_v21, 0.0  ;;  %v2511_v36 = vpop.f32.mrb[22].mxu0  ;;  %v2941_v22 = vsel %vm594_vm0, %v2936_v8, %v2940_v31  ;;  %v3114_v40 = vmax.f32 %v2792_v34, %v2939_v30 }
 0x326   : > { %v2942_v42 = vrot.slane %v2796_v29, 1  ;;  %v2734_v27 = vadd.f32 %v9385_v18, %v2511_v36  ;;  %v2513_v46 = vpop.f32.mrb[23].mxu0  ;;  %7437 = vmatprep.subr.bf16.mxu1 %v7436_v23  ;;  %v3115_v49 = vmax.f32 %v2793_v1, %v2941_v22 }
 0x327   : > { %v2944_v38 = vrot.slane %v2797_v33, 1  ;;  %v2735_v54 = vadd.f32 %v9389_v35, %v2513_v46  ;;  %7439 = vmatpush1.bf16.msra.mxu1 %v7438_v26 }
 0x328   : > { %v2798_v41 = vmax.f32 %v2734_v27, 0.0  ;;  %v2943_v20 = vsel %vm594_vm0, %v2938_v24, %v2942_v42 }
 0x329   : > { %v2799_v55 = vmax.f32 %v2735_v54, 0.0  ;;  %v2517_v15 = vpop.f32.mrb[24].mxu0  ;;  %v2945_v44 = vsel %vm594_vm0, %v2940_v31, %v2944_v38  ;;  %v3116_v58 = vmax.f32 %v2794_v2, %v2943_v20 }
 0x32a   : > { %v2946_v47 = vrot.slane %v2798_v41, 1  ;;  %v2736_v60 = vadd.f32 %v9385_v18, %v2517_v15  ;;  %v2519_v50 = vpop.f32.mrb[25].mxu0  ;;  %v3117_v63 = vmax.f32 %v2795_v16, %v2945_v44 }
 0x32b   : > { %v2948_v53 = vrot.slane %v2799_v55, 1  ;;  %v2737_v0 = vadd.f32 %v9389_v35, %v2519_v50  ;;  %v7442_v56 = vpack.c.bf16 %v3116_v58, %v3114_v40 }
 0x32c   : > { %v2800_v3 = vmax.f32 %v2736_v60, 0.0  ;;  %v7440_v59 = vpack.c.bf16 %v3117_v63, %v3115_v49  ;;  %v2947_v5 = vsel %vm594_vm0, %v2942_v42, %v2946_v47  ;;  %v11462_v63 = vmov 0.0|0.0  }
 0x32d   : > { %v2801_v62 = vmax.f32 %v2737_v0, 0.0  ;;  %v2523_v34 = vpop.f32.mrb[26].mxu0  ;;  %v2949_v9 = vsel %vm594_vm0, %v2944_v38, %v2948_v53  ;;  %v3118_v39 = vmax.f32 %v2796_v29, %v2947_v5  ;;  %7811 = vmatprep.subr.bf16.mxu0 %v11462_v63 }
 0x32e   : > { %v2950_v1 = vrot.slane %v2800_v3, 1  ;;  %v2738_v43 = vadd.f32 %v9385_v18, %v2523_v34  ;;  %v2525_v10 = vpop.f32.mrb[27].mxu0  ;;  %7441 = vmatprep.subr.bf16.mxu1 %v7440_v59  ;;  %v3119_v48 = vmax.f32 %v2797_v33, %v2949_v9 }
 0x32f   : > { %v2952_v4 = vrot.slane %v2801_v62, 1  ;;  %v2739_v52 = vadd.f32 %v9389_v35, %v2525_v10  ;;  %7443 = vmatpush1.bf16.msra.mxu1 %v7442_v56 }
 0x330   : > { %v2802_v12 = vmax.f32 %v2738_v43, 0.0  ;;  %v2951_v57 = vsel %vm594_vm0, %v2946_v47, %v2950_v1 }
 0x331   : > { %v2803_v8 = vmax.f32 %v2739_v52, 0.0  ;;  %v2529_v61 = vpop.f32.mrb[28].mxu0  ;;  %v2953_v2 = vsel %vm594_vm0, %v2948_v53, %v2952_v4  ;;  %v3120_v13 = vmax.f32 %v2798_v41, %v2951_v57 }
 0x332   : > { %v2954_v16 = vrot.slane %v2802_v12, 1  ;;  %v2740_v51 = vadd.f32 %v9385_v18, %v2529_v61  ;;  %v2531_v17 = vpop.f32.mrb[29].mxu0  ;;  %v3121_v19 = vmax.f32 %v2799_v55, %v2953_v2 }
 0x333   : > { %v2956_v24 = vrot.slane %v2803_v8, 1  ;;  %v2741_v25 = vadd.f32 %v9389_v35, %v2531_v17  ;;  %v7446_v28 = vpack.c.bf16 %v3120_v13, %v3118_v39 }
 0x334   : > { %v2804_v45 = vmax.f32 %v2740_v51, 0.0  ;;  %v7444_v31 = vpack.c.bf16 %v3121_v19, %v3119_v48  ;;  %v2955_v21 = vsel %vm594_vm0, %v2950_v1, %v2954_v16 }
 0x335   : > { %v2805_v26 = vmax.f32 %v2741_v25, 0.0  ;;  %v2535_v29 = vpop.f32.mrb[30].mxu0  ;;  %v2957_v23 = vsel %vm594_vm0, %v2952_v4, %v2956_v24  ;;  %v3122_v30 = vmax.f32 %v2800_v3, %v2955_v21 }
 0x336   : > { %v2958_v33 = vrot.slane %v2804_v45, 1  ;;  %v2742_v36 = vadd.f32 %v9385_v18, %v2535_v29  ;;  %v2537_v22 = vpop.f32.mrb[31].mxu0  ;;  %7445 = vmatprep.subr.bf16.mxu1 %v7444_v31  ;;  %v3123_v40 = vmax.f32 %v2801_v62, %v2957_v23 }
 0x337   : > { %v2960_v42 = vrot.slane %v2805_v26, 1  ;;  %v2743_v27 = vadd.f32 %v9389_v35, %v2537_v22  ;;  %7447 = vmatpush1.bf16.msra.mxu1 %v7446_v28 }
 0x338   : > { %v2806_v46 = vmax.f32 %v2742_v36, 0.0  ;;  %v2959_v49 = vsel %vm594_vm0, %v2954_v16, %v2958_v33 }
 0x339   : > { %v2807_v38 = vmax.f32 %v2743_v27, 0.0  ;;  %v2541_v54 = vpop.f32.mrb[32].mxu0  ;;  %v2961_v41 = vsel %vm594_vm0, %v2956_v24, %v2960_v42  ;;  %v3124_v20 = vmax.f32 %v2802_v12, %v2959_v49 }
 0x33a   : > { %v2962_v55 = vrot.slane %v2806_v46, 1  ;;  %v2744_v15 = vadd.f32 %v9385_v18, %v2541_v54  ;;  %v2543_v44 = vpop.f32.mrb[33].mxu0  ;;  %v3125_v58 = vmax.f32 %v2803_v8, %v2961_v41 }
 0x33b   : > { %v2964_v47 = vrot.slane %v2807_v38, 1  ;;  %v2745_v60 = vadd.f32 %v9389_v35, %v2543_v44  ;;  %v7450_v50 = vpack.c.bf16 %v3124_v20, %v3122_v30 }
 0x33c   : > { %v2808_v53 = vmax.f32 %v2744_v15, 0.0  ;;  %v7448_v0 = vpack.c.bf16 %v3125_v58, %v3123_v40  ;;  %v2963_v56 = vsel %vm594_vm0, %v2958_v33, %v2962_v55 }
 0x33d   : > { %v2809_v3 = vmax.f32 %v2745_v60, 0.0  ;;  %v2547_v59 = vpop.f32.mrb[34].mxu0  ;;  %v2965_v5 = vsel %vm594_vm0, %v2960_v42, %v2964_v47  ;;  %v3126_v62 = vmax.f32 %v2804_v45, %v2963_v56 }
 0x33e   : > { %v2966_v34 = vrot.slane %v2808_v53, 1  ;;  %v2746_v9 = vadd.f32 %v9385_v18, %v2547_v59  ;;  %v2549_v39 = vpop.f32.mrb[35].mxu0  ;;  %7449 = vmatprep.subr.bf16.mxu1 %v7448_v0  ;;  %v3127_v1 = vmax.f32 %v2805_v26, %v2965_v5 }
 0x33f   : > { %v2968_v43 = vrot.slane %v2809_v3, 1  ;;  %v2747_v10 = vadd.f32 %v9389_v35, %v2549_v39  ;;  %7451 = vmatpush1.bf16.msra.mxu1 %v7450_v50 }
 0x340   : > { %v2810_v48 = vmax.f32 %v2746_v9, 0.0  ;;  %v2967_v4 = vsel %vm594_vm0, %v2962_v55, %v2966_v34 }
 0x341   : > { %v2811_v52 = vmax.f32 %v2747_v10, 0.0  ;;  %v2553_v12 = vpop.f32.mrb[36].mxu0  ;;  %v2969_v57 = vsel %vm594_vm0, %v2964_v47, %v2968_v43  ;;  %v3128_v8 = vmax.f32 %v2806_v46, %v2967_v4 }
 0x342   : > { %v2970_v61 = vrot.slane %v2810_v48, 1  ;;  %v2748_v2 = vadd.f32 %v9385_v18, %v2553_v12  ;;  %v2555_v13 = vpop.f32.mrb[37].mxu0  ;;  %v3129_v16 = vmax.f32 %v2807_v38, %v2969_v57 }
 0x343   : > { %v2972_v51 = vrot.slane %v2811_v52, 1  ;;  %v2749_v17 = vadd.f32 %v9389_v35, %v2555_v13  ;;  %v7454_v19 = vpack.c.bf16 %v3128_v8, %v3126_v62 }
 0x344   : > { %v2812_v24 = vmax.f32 %v2748_v2, 0.0  ;;  %v7452_v25 = vpack.c.bf16 %v3129_v16, %v3127_v1  ;;  %v2971_v28 = vsel %vm594_vm0, %v2966_v34, %v2970_v61 }
 0x345   : > { %v2813_v45 = vmax.f32 %v2749_v17, 0.0  ;;  %v2559_v31 = vpop.f32.mrb[38].mxu0  ;;  %v2973_v21 = vsel %vm594_vm0, %v2968_v43, %v2972_v51  ;;  %v3130_v26 = vmax.f32 %v2808_v53, %v2971_v28 }
 0x346   : > { %v2974_v29 = vrot.slane %v2812_v24, 1  ;;  %v2750_v23 = vadd.f32 %v9385_v18, %v2559_v31  ;;  %v2561_v30 = vpop.f32.mrb[39].mxu0  ;;  %7453 = vmatprep.subr.bf16.mxu1 %v7452_v25  ;;  %v3131_v33 = vmax.f32 %v2809_v3, %v2973_v21 }
 0x347   : > { %v2976_v36 = vrot.slane %v2813_v45, 1  ;;  %v2751_v22 = vadd.f32 %v9389_v35, %v2561_v30  ;;  %7455 = vmatpush1.bf16.msra.mxu1 %v7454_v19 }
 0x348   : > { %v2814_v40 = vmax.f32 %v2750_v23, 0.0  ;;  %v2975_v42 = vsel %vm594_vm0, %v2970_v61, %v2974_v29 }
 0x349   : > { %v2815_v27 = vmax.f32 %v2751_v22, 0.0  ;;  %v2565_v46 = vpop.f32.mrb[40].mxu0  ;;  %v2977_v49 = vsel %vm594_vm0, %v2972_v51, %v2976_v36  ;;  %v3132_v38 = vmax.f32 %v2810_v48, %v2975_v42 }
 0x34a   : > { %v2978_v54 = vrot.slane %v2814_v40, 1  ;;  %v2752_v41 = vadd.f32 %v9385_v18, %v2565_v46  ;;  %v2567_v20 = vpop.f32.mrb[41].mxu0  ;;  %v3133_v55 = vmax.f32 %v2811_v52, %v2977_v49 }
 0x34b   : > { %v2980_v15 = vrot.slane %v2815_v27, 1  ;;  %v2753_v44 = vadd.f32 %v9389_v35, %v2567_v20  ;;  %v7458_v58 = vpack.c.bf16 %v3132_v38, %v3130_v26 }
 0x34c   : > { %v2816_v47 = vmax.f32 %v2752_v41, 0.0  ;;  %v7456_v60 = vpack.c.bf16 %v3133_v55, %v3131_v33  ;;  %v2979_v50 = vsel %vm594_vm0, %v2974_v29, %v2978_v54 }
 0x34d   : > { %v2817_v53 = vmax.f32 %v2753_v44, 0.0  ;;  %v2571_v0 = vpop.f32.mrb[42].mxu0  ;;  %v2981_v56 = vsel %vm594_vm0, %v2976_v36, %v2980_v15  ;;  %v3134_v3 = vmax.f32 %v2812_v24, %v2979_v50 }
 0x34e   : > { %v2982_v59 = vrot.slane %v2816_v47, 1  ;;  %v2754_v5 = vadd.f32 %v9385_v18, %v2571_v0  ;;  %v2573_v62 = vpop.f32.mrb[43].mxu0  ;;  %7457 = vmatprep.subr.bf16.mxu1 %v7456_v60  ;;  %v3135_v34 = vmax.f32 %v2813_v45, %v2981_v56 }
 0x34f   : > { %v2984_v9 = vrot.slane %v2817_v53, 1  ;;  %v2755_v39 = vadd.f32 %v9389_v35, %v2573_v62  ;;  %7459 = vmatpush1.bf16.msra.mxu1 %v7458_v58 }
 0x350   : > { %v2818_v1 = vmax.f32 %v2754_v5, 0.0  ;;  %v2983_v43 = vsel %vm594_vm0, %v2978_v54, %v2982_v59 }
 0x351   : > { %v2819_v10 = vmax.f32 %v2755_v39, 0.0  ;;  %v2577_v48 = vpop.f32.mrb[44].mxu0  ;;  %v2985_v4 = vsel %vm594_vm0, %v2980_v15, %v2984_v9  ;;  %v3136_v52 = vmax.f32 %v2814_v40, %v2983_v43 }
 0x352   : > { %v2986_v12 = vrot.slane %v2818_v1, 1  ;;  %v2756_v57 = vadd.f32 %v9385_v18, %v2577_v48  ;;  %v2579_v8 = vpop.f32.mrb[45].mxu0  ;;  %v3137_v61 = vmax.f32 %v2815_v27, %v2985_v4 }
 0x353   : > { %v2988_v2 = vrot.slane %v2819_v10, 1  ;;  %v2757_v13 = vadd.f32 %v9389_v35, %v2579_v8  ;;  %v7462_v16 = vpack.c.bf16 %v3136_v52, %v3134_v3 }
 0x354   : > { %v2820_v51 = vmax.f32 %v2756_v57, 0.0  ;;  %v7460_v17 = vpack.c.bf16 %v3137_v61, %v3135_v34  ;;  %v2987_v19 = vsel %vm594_vm0, %v2982_v59, %v2986_v12 }
 0x355   : > { %v2821_v24 = vmax.f32 %v2757_v13, 0.0  ;;  %v2583_v25 = vpop.f32.mrb[46].mxu0  ;;  %v2989_v28 = vsel %vm594_vm0, %v2984_v9, %v2988_v2  ;;  %v3138_v45 = vmax.f32 %v2816_v47, %v2987_v19 }
 0x356   : > { %v2990_v31 = vrot.slane %v2820_v51, 1  ;;  %v2758_v21 = vadd.f32 %v9385_v18, %v2583_v25  ;;  %v2585_v26 = vpop.f32.mrb[47].mxu0  ;;  %7461 = vmatprep.subr.bf16.mxu1 %v7460_v17  ;;  %v3139_v29 = vmax.f32 %v2817_v53, %v2989_v28 }
 0x357   : > { %v2992_v23 = vrot.slane %v2821_v24, 1  ;;  %v2759_v30 = vadd.f32 %v9389_v35, %v2585_v26  ;;  %7463 = vmatpush1.bf16.msra.mxu1 %v7462_v16 }
 0x358   : > { %v2822_v33 = vmax.f32 %v2758_v21, 0.0  ;;  %v2991_v36 = vsel %vm594_vm0, %v2986_v12, %v2990_v31 }
 0x359   : > { %v2823_v22 = vmax.f32 %v2759_v30, 0.0  ;;  %v2589_v40 = vpop.f32.mrb[48].mxu0  ;;  %v2993_v42 = vsel %vm594_vm0, %v2988_v2, %v2992_v23  ;;  %v3140_v27 = vmax.f32 %v2818_v1, %v2991_v36 }
 0x35a   : > { %v2994_v46 = vrot.slane %v2822_v33, 1  ;;  %v2760_v49 = vadd.f32 %v9385_v18, %v2589_v40  ;;  %v2591_v38 = vpop.f32.mrb[49].mxu0  ;;  %v3141_v54 = vmax.f32 %v2819_v10, %v2993_v42 }
 0x35b   : > { %v2996_v41 = vrot.slane %v2823_v22, 1  ;;  %v2761_v20 = vadd.f32 %v9389_v35, %v2591_v38  ;;  %v7466_v55 = vpack.c.bf16 %v3140_v27, %v3138_v45 }
 0x35c   : > { %v2824_v15 = vmax.f32 %v2760_v49, 0.0  ;;  %v7464_v44 = vpack.c.bf16 %v3141_v54, %v3139_v29  ;;  %v2995_v58 = vsel %vm594_vm0, %v2990_v31, %v2994_v46 }
 0x35d   : > { %v2825_v47 = vmax.f32 %v2761_v20, 0.0  ;;  %v2595_v60 = vpop.f32.mrb[50].mxu0  ;;  %v2997_v50 = vsel %vm594_vm0, %v2992_v23, %v2996_v41  ;;  %v3142_v53 = vmax.f32 %v2820_v51, %v2995_v58 }
 0x35e   : > { %v2998_v0 = vrot.slane %v2824_v15, 1  ;;  %v2762_v56 = vadd.f32 %v9385_v18, %v2595_v60  ;;  %v2597_v3 = vpop.f32.mrb[51].mxu0  ;;  %7465 = vmatprep.subr.bf16.mxu1 %v7464_v44  ;;  %v3143_v59 = vmax.f32 %v2821_v24, %v2997_v50 }
 0x35f   : > { %v3000_v5 = vrot.slane %v2825_v47, 1  ;;  %v2763_v62 = vadd.f32 %v9389_v35, %v2597_v3  ;;  %7467 = vmatpush1.bf16.msra.mxu1 %v7466_v55 }
 0x360   : > { %v2826_v34 = vmax.f32 %v2762_v56, 0.0  ;;  %v2999_v9 = vsel %vm594_vm0, %v2994_v46, %v2998_v0 }
 0x361   : > { %v2827_v39 = vmax.f32 %v2763_v62, 0.0  ;;  %v2601_v1 = vpop.f32.mrb[52].mxu0  ;;  %v3001_v43 = vsel %vm594_vm0, %v2996_v41, %v3000_v5  ;;  %v3144_v10 = vmax.f32 %v2822_v33, %v2999_v9 }
 0x362   : > { %v3002_v48 = vrot.slane %v2826_v34, 1  ;;  %v2764_v4 = vadd.f32 %v9385_v18, %v2601_v1  ;;  %v2603_v52 = vpop.f32.mrb[53].mxu0  ;;  %v3145_v12 = vmax.f32 %v2823_v22, %v3001_v43 }
 0x363   : > { %v3004_v57 = vrot.slane %v2827_v39, 1  ;;  %v2765_v8 = vadd.f32 %v9389_v35, %v2603_v52  ;;  %v7470_v61 = vpack.c.bf16 %v3144_v10, %v3142_v53 }
 0x364   : > { %v2828_v2 = vmax.f32 %v2764_v4, 0.0  ;;  %v7468_v13 = vpack.c.bf16 %v3145_v12, %v3143_v59  ;;  %v3003_v16 = vsel %vm594_vm0, %v2998_v0, %v3002_v48 }
 0x365   : > { %v2829_v51 = vmax.f32 %v2765_v8, 0.0  ;;  %v2607_v17 = vpop.f32.mrb[54].mxu0  ;;  %v3005_v19 = vsel %vm594_vm0, %v3000_v5, %v3004_v57  ;;  %v3146_v24 = vmax.f32 %v2824_v15, %v3003_v16 }
 0x366   : > { %v3006_v25 = vrot.slane %v2828_v2, 1  ;;  %v2766_v28 = vadd.f32 %v9385_v18, %v2607_v17  ;;  %v2609_v45 = vpop.f32.mrb[55].mxu0  ;;  %7469 = vmatprep.subr.bf16.mxu1 %v7468_v13  ;;  %v3147_v31 = vmax.f32 %v2825_v47, %v3005_v19 }
 0x367   : > { %v3008_v21 = vrot.slane %v2829_v51, 1  ;;  %v2767_v26 = vadd.f32 %v9389_v35, %v2609_v45  ;;  %7471 = vmatpush1.bf16.msra.mxu1 %v7470_v61 }
 0x368   : > { %v2830_v29 = vmax.f32 %v2766_v28, 0.0  ;;  %v3007_v23 = vsel %vm594_vm0, %v3002_v48, %v3006_v25 }
 0x369   : > { %v2831_v30 = vmax.f32 %v2767_v26, 0.0  ;;  %v2613_v33 = vpop.f32.mrb[56].mxu0  ;;  %v3009_v36 = vsel %vm594_vm0, %v3004_v57, %v3008_v21  ;;  %v3148_v22 = vmax.f32 %v2826_v34, %v3007_v23 }
 0x36a   : > { %v3010_v40 = vrot.slane %v2830_v29, 1  ;;  %v2768_v42 = vadd.f32 %v9385_v18, %v2613_v33  ;;  %v2615_v27 = vpop.f32.mrb[57].mxu0  ;;  %v3149_v46 = vmax.f32 %v2827_v39, %v3009_v36 }
 0x36b   : > { %v3012_v49 = vrot.slane %v2831_v30, 1  ;;  %v2769_v38 = vadd.f32 %v9389_v35, %v2615_v27  ;;  %v7474_v54 = vpack.c.bf16 %v3148_v22, %v3146_v24 }
 0x36c   : > { %v2832_v41 = vmax.f32 %v2768_v42, 0.0  ;;  %v7472_v20 = vpack.c.bf16 %v3149_v46, %v3147_v31  ;;  %v3011_v55 = vsel %vm594_vm0, %v3006_v25, %v3010_v40 }
 0x36d   : > { %v2833_v15 = vmax.f32 %v2769_v38, 0.0  ;;  %v2619_v44 = vpop.f32.mrb[58].mxu0  ;;  %v3013_v58 = vsel %vm594_vm0, %v3008_v21, %v3012_v49  ;;  %v3150_v47 = vmax.f32 %v2828_v2, %v3011_v55  ;;  %v3340_v55 = vld [vmem:[%s11443_s4 + $0x8] sm:$0xff] }
 0x36e   : > { %v3014_v60 = vrot.slane %v2832_v41, 1  ;;  %v2770_v50 = vadd.f32 %v9385_v18, %v2619_v44  ;;  %v2621_v53 = vpop.f32.mrb[59].mxu0  ;;  %7473 = vmatprep.subr.bf16.mxu1 %v7472_v20  ;;  %v3151_v0 = vmax.f32 %v2829_v51, %v3013_v58  ;;  %v3165_v44 = vld [vmem:[%s11442_s3 + $0x18] sm:$0xff]  ;;  %v3341_v58 = vld [vmem:[%s11443_s4 + $0x10] sm:$0xff] }
 0x36f   : > { %v3016_v56 = vrot.slane %v2833_v15, 1  ;;  %v2771_v3 = vadd.f32 %v9389_v35, %v2621_v53  ;;  %7475 = vmatpush1.bf16.msra.mxu1 %v7474_v54  ;;  %v3167_v53 = vld [vmem:[%s11442_s3 + $0x28] sm:$0xff] }
 0x370   : > { %v2834_v59 = vmax.f32 %v2770_v50, 0.0  ;;  %v3015_v5 = vsel %vm594_vm0, %v3010_v40, %v3014_v60 }
 0x371   : > { %v2835_v62 = vmax.f32 %v2771_v3, 0.0  ;;  %v2625_v34 = vpop.f32.mrb[60].mxu0  ;;  %v3017_v9 = vsel %vm594_vm0, %v3012_v49, %v3016_v56  ;;  %v3152_v39 = vmax.f32 %v2830_v29, %v3015_v5  ;;  %v3166_v3 = vld [vmem:[%s11442_s3 + $0x20] sm:$0xff]  ;;  %v3169_v5 = vld [vmem:[%s11442_s3 + $0x38] sm:$0xff] }
 0x372   : > { %v3018_v1 = vrot.slane %v2834_v59, 1  ;;  %v2772_v43 = vadd.f32 %v9385_v18, %v2625_v34  ;;  %v2627_v10 = vpop.f32.mrb[61].mxu0  ;;  %v3153_v48 = vmax.f32 %v2831_v30, %v3017_v9  ;;  %v3346_v34 = vld [vmem:[%s11443_s4 + $0x38] sm:$0xff]  ;;  %v3168_v9 = vld [vmem:[%s11442_s3 + $0x30] sm:$0xff] }
 0x373   : > { %v3020_v4 = vrot.slane %v2835_v62, 1  ;;  %v2773_v52 = vadd.f32 %v9389_v35, %v2627_v10  ;;  %v7478_v12 = vpack.c.bf16 %v3152_v39, %v3150_v47  ;;  %v3342_v47 = vld [vmem:[%s11443_s4 + $0x18] sm:$0xff]  ;;  %v3348_v10 = vld [vmem:[%s11443_s4 + $0x48] sm:$0xff] }
 0x374   : > { %v2836_v57 = vmax.f32 %v2772_v43, 0.0  ;;  %v7476_v8 = vpack.c.bf16 %v3153_v48, %v3151_v0  ;;  %v3019_v61 = vsel %vm594_vm0, %v3014_v60, %v3018_v1  ;;  %v3164_v60 = vld [vmem:[%s11442_s3 + $0x10] sm:$0xff]  ;;  %v7492_v50 = vpack.c.bf16 %v3342_v47, %v3341_v58  ;;  %v3343_v0 = vld [vmem:[%s11443_s4 + $0x20] sm:$0xff] }
 0x375   : > { %v2837_v2 = vmax.f32 %v2773_v52, 0.0  ;;  %v2631_v13 = vpop.f32.mrb[62].mxu0  ;;  %v3021_v16 = vsel %vm594_vm0, %v3016_v56, %v3020_v4  ;;  %v3154_v51 = vmax.f32 %v2832_v41, %v3019_v61  ;;  %v3344_v56 = vld [vmem:[%s11443_s4 + $0x28] sm:$0xff]  ;;  %v3347_v43 = vld [vmem:[%s11443_s4 + $0x40] sm:$0xff]  ;;  %v3173_v52 = vld [vmem:[%s11442_s3 + $0x58] sm:$0xff] }
 0x376   : > { %v3022_v17 = vrot.slane %v2836_v57, 1  ;;  %v2774_v19 = vadd.f32 %v9385_v18, %v2631_v13  ;;  %v2633_v24 = vpop.f32.mrb[63].mxu0  ;;  %7477 = vmatprep.subr.bf16.mxu1 %v7476_v8  ;;  %v3155_v25 = vmax.f32 %v2833_v15, %v3021_v16  ;;  %v3170_v48 = vld [vmem:[%s11442_s3 + $0x40] sm:$0xff]  ;;  %v3172_v8 = vld [vmem:[%s11442_s3 + $0x50] sm:$0xff]  ;;  %v3352_v16 = vld [vmem:[%s11443_s4 + $0x68] sm:$0xff] }
 0x377   : > { %v3024_v28 = vrot.slane %v2837_v2, 1  ;;  %v2775_v45 = vadd.f32 %v9389_v35, %v2633_v24  ;;  %7479 = vmatpush1.bf16.msra.mxu1 %v7478_v12  ;;  %v3349_v12 = vld [vmem:[%s11443_s4 + $0x50] sm:$0xff]  ;;  %v3351_v13 = vld [vmem:[%s11443_s4 + $0x60] sm:$0xff] }
 0x378   : > { %v2838_v31 = vmax.f32 %v2774_v19, 0.0  ;;  %v3023_v21 = vsel %vm594_vm0, %v3018_v1, %v3022_v17  ;;  %v3171_v1 = vld [vmem:[%s11442_s3 + $0x48] sm:$0xff]  ;;  %v3177_v19 = vld [vmem:[%s11442_s3 + $0x78] sm:$0xff]  ;;  %v3353_v24 = vld [vmem:[%s11443_s4 + $0x70] sm:$0xff] }
 0x379   : > { %v2839_v26 = vmax.f32 %v2775_v45, 0.0  ;;  %v3025_v29 = vsel %vm594_vm0, %v3020_v4, %v3024_v28  ;;  %v3156_v23 = vmax.f32 %v2834_v59, %v3023_v21  ;;  %v7495_v59 = vpack.c.bf16 %v3344_v56, %v3343_v0  ;;  %v3355_v21 = vld [vmem:[%s11443_s4 + $0x80] sm:$0xff]  ;;  %v6720_v0 = vld [vmem:[%s11443_s4 + $0xd0] sm:$0xff] }
 0x37a   : > { %v3026_v30 = vrot.slane %v2838_v31, 1  ;;  %v3157_v33 = vmax.f32 %v2835_v62, %v3025_v29  ;;  %v3345_v62 = vld [vmem:[%s11443_s4 + $0x30] sm:$0xff]  ;;  %v7501_v4 = vpack.c.bf16 %v3348_v10, %v3347_v43  ;;  %v3178_v29 = vld [vmem:[%s11442_s3 + $0x80] sm:$0xff] }
 0x37b   : > { %v3028_v36 = vrot.slane %v2839_v26, 1  ;;  %v7482_v22 = vpack.c.bf16 %v3156_v23, %v3154_v51  ;;  %v7498_v39 = vpack.c.bf16 %v3346_v34, %v3345_v62  ;;  %v3174_v51 = vld [vmem:[%s11442_s3 + $0x60] sm:$0xff]  ;;  %v6724_v43 = vld [vmem:[%s11443_s4 + $0xf0] sm:$0xff] }
 0x37c   : > { %v3096_v18 = vsel %vm594_vm0, %v3026_v30, %v9395_v32  ;;  %v7480_v40 = vpack.c.bf16 %v3157_v33, %v3155_v25  ;;  %v3027_v42 = vsel %vm594_vm0, %v3022_v17, %v3026_v30  ;;  %v3339_v32 = vld [vmem:[%s11443_s4] sm:$0xff]  ;;  %v7507_v17 = vpack.c.bf16 %v3352_v16, %v3351_v13  ;;  %v3354_v25 = vld [vmem:[%s11443_s4 + $0x78] sm:$0xff]  ;;  %v3357_v33 = vld [vmem:[%s11443_s4 + $0x90] sm:$0xff] }
 0x37d   : > { %v3160_v27 = vmax.f32 %v2838_v31, %v3096_v18  ;;  %v3097_v35 = vsel %vm594_vm0, %v3028_v36, %v9398_v37  ;;  %v3029_v46 = vsel %vm594_vm0, %v3024_v28, %v3028_v36  ;;  %v3158_v49 = vmax.f32 %v2836_v57, %v3027_v42  ;;  %v3162_v37 = vld [vmem:[%s11442_s3] sm:$0xff]  ;;  %v3350_v57 = vld [vmem:[%s11443_s4 + $0x58] sm:$0xff]  ;;  %v3176_v28 = vld [vmem:[%s11442_s3 + $0x70] sm:$0xff] }
 0x37e   : > { %v3161_v38 = vmax.f32 %v2839_v26, %v3097_v35  ;;  %7481 = vmatprep.subr.bf16.mxu1 %v7480_v40  ;;  %v3159_v54 = vmax.f32 %v2837_v2, %v3029_v46  ;;  %v7489_v15 = vpack.c.bf16 %v3340_v55, %v3339_v32  ;;  %v7504_v61 = vpack.c.bf16 %v3350_v57, %v3349_v12  ;;  %v3175_v2 = vld [vmem:[%s11442_s3 + $0x68] sm:$0xff]  ;;  %v3181_v30 = vld [vmem:[%s11442_s3 + $0x98] sm:$0xff]  ;;  %v3182_v42 = vld [vmem:[%s11442_s3 + $0xa0] sm:$0xff] }
 0x37f   : > { %7483 = vmatpush1.bf16.msra.mxu1 %v7482_v22  ;;  %v7486_v41 = vpack.c.bf16 %v3160_v27, %v3158_v49  ;;  %v7510_v45 = vpack.c.bf16 %v3354_v25, %v3353_v24  ;;  %v3179_v31 = vld [vmem:[%s11442_s3 + $0x88] sm:$0xff]  ;;  %v3358_v36 = vld [vmem:[%s11443_s4 + $0x98] sm:$0xff]  ;;  %v3180_v22 = vld [vmem:[%s11442_s3 + $0x90] sm:$0xff] }
 0x380   : > { %v7484_v20 = vpack.c.bf16 %v3161_v38, %v3159_v54  ;;  %v3356_v26 = vld [vmem:[%s11443_s4 + $0x88] sm:$0xff]  ;;  %v7516_v18 = vpack.c.bf16 %v3358_v36, %v3357_v33  ;;  %v3185_v27 = vld [vmem:[%s11442_s3 + $0xb8] sm:$0xff]  ;;  %v3184_v35 = vld [vmem:[%s11442_s3 + $0xb0] sm:$0xff] }
 0x381   : > { %v7513_v23 = vpack.c.bf16 %v3356_v26, %v3355_v21  ;;  %v3183_v40 = vld [vmem:[%s11442_s3 + $0xa8] sm:$0xff]  ;;  %v3186_v49 = vld [vmem:[%s11442_s3 + $0xc0] sm:$0xff]  ;;  %v3189_v38 = vld [vmem:[%s11442_s3 + $0xd8] sm:$0xff] }
 0x382   : > { %7485 = vmatprep.subr.bf16.mxu1 %v7484_v20  ;;  %v3187_v46 = vld [vmem:[%s11442_s3 + $0xc8] sm:$0xff]  ;;  %v3188_v54 = vld [vmem:[%s11442_s3 + $0xd0] sm:$0xff]  ;;  %v6718_v58 = vld [vmem:[%s11443_s4 + $0xc0] sm:$0xff] }
 0x383   : > { %7487 = vmatpush1.bf16.msra.mxu1 %v7486_v41  ;;  %v3359_v41 = vld [vmem:[%s11443_s4 + $0xa0] sm:$0xff]  ;;  %v6715_v20 = vld [vmem:[%s11443_s4 + $0xa8] sm:$0xff]  ;;  %v6716_v32 = vld [vmem:[%s11443_s4 + $0xb0] sm:$0xff] }
 0x384   : > { %7488 = vmatprep.subr.bf16.mxu1 %v11462_v63  ;;  %v6722_v62 = vld [vmem:[%s11443_s4 + $0xe0] sm:$0xff]  ;;  %v6728_v13 = vld [vmem:[%s11443_s4 + $0x110] sm:$0xff] }
 0x385   : > { %v6726_v12 = vld [vmem:[%s11443_s4 + $0x100] sm:$0xff]  ;;  %v6732_v21 = vld [vmem:[%s11443_s4 + $0x130] sm:$0xff] }
 0x386   : > { %3255 = vmatmul.mubr.f32.vlgmr.msra.gmra.mrb[0].mxu1 %v3162_v37  ;;  %v7519_v37 = vpack.c.bf16 %v6716_v32, %v6715_v20  ;;  %v6730_v24 = vld [vmem:[%s11443_s4 + $0x120] sm:$0xff]  ;;  %v6751_v20 = vld [vmem:[%s11444_s5 + $0xb8] sm:$0xff]  ;;  %v6753_v32 = vld [vmem:[%s11444_s5 + $0xc8] sm:$0xff] }
 0x387   : > { %3260 = vmatprep.mubr.f32.mxu1 %v3165_v44  ;;  %7490 = vmatpush1.bf16.msra.mxu1 %v7489_v15  ;;  %v6717_v44 = vld [vmem:[%s11443_s4 + $0xb8] sm:$0xff]  ;;  %v6734_v33 = vld [vmem:[%s11443_s4 + $0x140] sm:$0xff] }
 0x388   : > { %7491 = vmatprep.subr.bf16.mxu1 %v11462_v63 }
 0x38a   : > { %3261 = vmatmul.mubr.f32.gmra.mrb[2].mxu1 %v3164_v60  ;;  %v7522_v60 = vpack.c.bf16 %v6718_v58, %v6717_v44  ;;  %v6755_v58 = vld [vmem:[%s11444_s5 + $0xd8] sm:$0xff] }
 0x38b   : > { %3266 = vmatprep.mubr.f32.mxu1 %v3167_v53  ;;  %7493 = vmatpush1.bf16.msra.mxu1 %v7492_v50  ;;  %v6719_v53 = vld [vmem:[%s11443_s4 + $0xc8] sm:$0xff] }
 0x38c   : > { %7494 = vmatprep.subr.bf16.mxu1 %v11462_v63 }
 0x38e   : > { %3267 = vmatmul.mubr.f32.gmra.mrb[4].mxu1 %v3166_v3  ;;  %v7525_v3 = vpack.c.bf16 %v6720_v0, %v6719_v53  ;;  %v6756_v53 = vld [vmem:[%s11444_s5 + $0xe0] sm:$0xff] }
 0x38f   : > { %3272 = vmatprep.mubr.f32.mxu1 %v3169_v5  ;;  %7496 = vmatpush1.bf16.msra.mxu1 %v7495_v59  ;;  %v6721_v5 = vld [vmem:[%s11443_s4 + $0xd8] sm:$0xff] }
 0x390   : > { %7497 = vmatprep.subr.bf16.mxu1 %v11462_v63 }
 0x392   : > { %3273 = vmatmul.mubr.f32.gmra.mrb[6].mxu1 %v3168_v9  ;;  %v7528_v9 = vpack.c.bf16 %v6722_v62, %v6721_v5  ;;  %v6758_v5 = vld [vmem:[%s11444_s5 + $0xf0] sm:$0xff]  ;;  %v6760_v62 = vld [vmem:[%s11444_s5 + $0x100] sm:$0xff] }
 0x393   : > { %3278 = vmatprep.mubr.f32.mxu1 %v3171_v1  ;;  %7499 = vmatpush1.bf16.msra.mxu1 %v7498_v39  ;;  %v6723_v1 = vld [vmem:[%s11443_s4 + $0xe8] sm:$0xff] }
 0x394   : > { %7500 = vmatprep.subr.bf16.mxu1 %v11462_v63 }
 0x396   : > { %3279 = vmatmul.mubr.f32.gmra.mrb[8].mxu1 %v3170_v48  ;;  %v7531_v48 = vpack.c.bf16 %v6724_v43, %v6723_v1  ;;  %v6762_v43 = vld [vmem:[%s11444_s5 + $0x110] sm:$0xff] }
 0x397   : > { %3284 = vmatprep.mubr.f32.mxu1 %v3173_v52  ;;  %7502 = vmatpush1.bf16.msra.mxu1 %v7501_v4  ;;  %v6725_v52 = vld [vmem:[%s11443_s4 + $0xf8] sm:$0xff] }
 0x398   : > { %7503 = vmatprep.subr.bf16.mxu1 %v11462_v63 }
 0x39a   : > { %3285 = vmatmul.mubr.f32.gmra.mrb[10].mxu1 %v3172_v8  ;;  %v7534_v8 = vpack.c.bf16 %v6726_v12, %v6725_v52  ;;  %v6769_v52 = vld [vmem:[%s11444_s5 + $0x148] sm:$0xff] }
 0x39b   : > { %3290 = vmatprep.mubr.f32.mxu1 %v3175_v2  ;;  %7505 = vmatpush1.bf16.msra.mxu1 %v7504_v61  ;;  %v6727_v2 = vld [vmem:[%s11443_s4 + $0x108] sm:$0xff] }
 0x39c   : > { %7506 = vmatprep.subr.bf16.mxu1 %v11462_v63 }
 0x39e   : > { %3291 = vmatmul.mubr.f32.gmra.mrb[12].mxu1 %v3174_v51  ;;  %v7537_v51 = vpack.c.bf16 %v6728_v13, %v6727_v2  ;;  %v6771_v2 = vld [vmem:[%s11444_s5 + $0x158] sm:$0xf]  ;;  %v6770_v13 = vld [vmem:[%s11444_s5 + $0x150] sm:$0xf] }
 0x39f   : > { %3296 = vmatprep.mubr.f32.mxu1 %v3177_v19  ;;  %7508 = vmatpush1.bf16.msra.mxu1 %v7507_v17  ;;  %v6729_v19 = vld [vmem:[%s11443_s4 + $0x118] sm:$0xff] }
 0x3a0   : > { %7509 = vmatprep.subr.bf16.mxu1 %v11462_v63 }
 0x3a2   : > { %3297 = vmatmul.mubr.f32.gmra.mrb[14].mxu1 %v3176_v28  ;;  %v7540_v28 = vpack.c.bf16 %v6730_v24, %v6729_v19 }
 0x3a3   : > { %3302 = vmatprep.mubr.f32.mxu1 %v3179_v31  ;;  %7511 = vmatpush1.bf16.msra.mxu1 %v7510_v45  ;;  %v6731_v31 = vld [vmem:[%s11443_s4 + $0x128] sm:$0xff] }
 0x3a4   : > { %7512 = vmatprep.subr.bf16.mxu1 %v11462_v63 }
 0x3a6   : > { %3303 = vmatmul.mubr.f32.gmra.mrb[16].mxu1 %v3178_v29  ;;  %v7543_v29 = vpack.c.bf16 %v6732_v21, %v6731_v31 }
 0x3a7   : > { %3308 = vmatprep.mubr.f32.mxu1 %v3181_v30  ;;  %7514 = vmatpush1.bf16.msra.mxu1 %v7513_v23  ;;  %v6733_v30 = vld [vmem:[%s11443_s4 + $0x138] sm:$0xff] }
 0x3a8   : > { %7515 = vmatprep.subr.bf16.mxu1 %v11462_v63 }
 0x3aa   : > { %3309 = vmatmul.mubr.f32.gmra.mrb[18].mxu1 %v3180_v22  ;;  %v7546_v22 = vpack.c.bf16 %v6734_v33, %v6733_v30 }
 0x3ab   : > { %3314 = vmatprep.mubr.f32.mxu1 %v3183_v40  ;;  %7517 = vmatpush1.bf16.msra.mxu1 %v7516_v18 }
 0x3ac   : > { %3443 = vmatprep.subr.mxu1 %v11472_v7 }
 0x3ae   : > { %3315 = vmatmul.mubr.f32.gmra.mrb[20].mxu1 %v3182_v42 }
 0x3af   : > { %3320 = vmatprep.mubr.f32.mxu1 %v3185_v27  ;;  %3444 = vmatpush1.msra.mxu1 %v3359_v41  ;;  %v6735_v27 = vld [vmem:[%s11443_s4 + $0x148] sm:$0xff] }
 0x3b0   : > { %7518 = vmatprep.subr.bf16.mxu1 %v11462_v63 }
 0x3b2   : > { %3321 = vmatmul.mubr.f32.gmra.mrb[22].mxu1 %v3184_v35 }
 0x3b3   : > { %3326 = vmatprep.mubr.f32.mxu1 %v3187_v46 }
 0x3b6   : > { %3327 = vmatmul.mubr.f32.gmra.mrb[24].mxu1 %v3186_v49 }
 0x3b7   : > { %3332 = vmatprep.mubr.f32.mxu1 %v3189_v38 }
 0x3ba   : > { %3333 = vmatmul.mubr.f32.gmra.mrb[26].mxu1 %v3188_v54 }
 0x459   : > { %v9693_v55 = vpop.f32.mrb[0].mxu1 }
 0x45a   : > { %v9695_v15 = vpop.f32.mrb[1].mxu1 }
 0x45b   : > { %6701 = vmatprep.mubr.msk.f32.mxu1 %vm3360_vm5, %v9695_v15 }
 0x45c   : > { %3468 = vmatmul.mubr.f32.vlgmr.msra.gmra.mrb[28].mxu1 %v9693_v55 }
 0x45d   : > { %v9706_v47 = vpop.f32.mrb[2].mxu1  ;;  %7520 = vmatpush1.bf16.msra.mxu1 %v7519_v37  ;;  %v6750_v37 = vld [vmem:[%s11444_s5 + $0xb0] sm:$0xff] }
 0x45e   : > { %v9708_v50 = vpop.f32.mrb[3].mxu1  ;;  %7521 = vmatprep.subr.bf16.mxu1 %v11462_v63 }
 0x45f   : > { %6702 = vmatprep.mubr.msk.f32.mxu1 %vm3360_vm5, %v9708_v50 }
 0x460   : > { %3473 = vmatmul.mubr.f32.gmra.mrb[30].mxu1 %v9706_v47 }
 0x461   : > { %v9720_v56 = vpop.f32.mrb[4].mxu1  ;;  %7523 = vmatpush1.bf16.msra.mxu1 %v7522_v60 }
 0x462   : > { %v9722_v59 = vpop.f32.mrb[5].mxu1  ;;  %7524 = vmatprep.subr.bf16.mxu1 %v11462_v63 }
 0x463   : > { %6703 = vmatprep.mubr.msk.f32.mxu1 %vm3360_vm5, %v9722_v59 }
 0x464   : > { %3478 = vmatmul.mubr.f32.gmra.mrb[32].mxu1 %v9720_v56 }
 0x465   : > { %v9734_v34 = vpop.f32.mrb[6].mxu1  ;;  %7526 = vmatpush1.bf16.msra.mxu1 %v7525_v3  ;;  %v6761_v3 = vld [vmem:[%s11444_s5 + $0x108] sm:$0xff] }
 0x466   : > { %v9736_v39 = vpop.f32.mrb[7].mxu1  ;;  %7527 = vmatprep.subr.bf16.mxu1 %v11462_v63 }
 0x467   : > { %6704 = vmatprep.mubr.msk.f32.mxu1 %vm3360_vm5, %v9736_v39 }
 0x468   : > { %3483 = vmatmul.mubr.f32.gmra.mrb[34].mxu1 %v9734_v34 }
 0x469   : > { %v9748_v10 = vpop.f32.mrb[8].mxu1  ;;  %7529 = vmatpush1.bf16.msra.mxu1 %v7528_v9  ;;  %v6763_v9 = vld [vmem:[%s11444_s5 + $0x118] sm:$0xff] }
 0x46a   : > { %v9750_v4 = vpop.f32.mrb[9].mxu1  ;;  %7530 = vmatprep.subr.bf16.mxu1 %v11462_v63 }
 0x46b   : > { %6705 = vmatprep.mubr.msk.f32.mxu1 %vm3360_vm5, %v9750_v4 }
 0x46c   : > { %3488 = vmatmul.mubr.f32.gmra.mrb[36].mxu1 %v9748_v10 }
 0x46d   : > { %v9762_v57 = vpop.f32.mrb[10].mxu1  ;;  %7532 = vmatpush1.bf16.msra.mxu1 %v7531_v48 }
 0x46e   : > { %v9764_v61 = vpop.f32.mrb[11].mxu1  ;;  %7533 = vmatprep.subr.bf16.mxu1 %v11462_v63 }
 0x46f   : > { %6706 = vmatprep.mubr.msk.f32.mxu1 %vm3360_vm5, %v9764_v61 }
 0x470   : > { %3493 = vmatmul.mubr.f32.gmra.mrb[38].mxu1 %v9762_v57 }
 0x471   : > { %v9776_v16 = vpop.f32.mrb[12].mxu1  ;;  %7535 = vmatpush1.bf16.msra.mxu1 %v7534_v8  ;;  %v6768_v8 = vld [vmem:[%s11444_s5 + $0x140] sm:$0xff] }
 0x472   : > { %v9778_v17 = vpop.f32.mrb[13].mxu1  ;;  %7536 = vmatprep.subr.bf16.mxu1 %v11462_v63 }
 0x473   : > { %6707 = vmatprep.mubr.msk.f32.mxu1 %vm3360_vm5, %v9778_v17 }
 0x474   : > { %3498 = vmatmul.mubr.f32.gmra.mrb[40].mxu1 %v9776_v16 }
 0x475   : > { %v3298_v25 = vpop.f32.mrb[14].mxu1  ;;  %7538 = vmatpush1.bf16.msra.mxu1 %v7537_v51  ;;  %v3712_v51 = vld [vmem:[%s11444_s5 + $0x18] sm:$0xff] }
 0x476   : > { %v3300_v45 = vpop.f32.mrb[15].mxu1  ;;  %7539 = vmatprep.subr.bf16.mxu1 %v11462_v63 }
 0x477   : > { %6708 = vmatprep.mubr.msk.f32.mxu1 %vm3360_vm5, %v3300_v45 }
 0x478   : > { %3503 = vmatmul.mubr.f32.gmra.mrb[42].mxu1 %v3298_v25 }
 0x479   : > { %v3304_v26 = vpop.f32.mrb[16].mxu1  ;;  %7541 = vmatpush1.bf16.msra.mxu1 %v7540_v28 }
 0x47a   : > { %v3306_v23 = vpop.f32.mrb[17].mxu1  ;;  %7542 = vmatprep.subr.bf16.mxu1 %v11462_v63 }
 0x47b   : > { %6709 = vmatprep.mubr.msk.f32.mxu1 %vm3360_vm5, %v3306_v23 }
 0x47c   : > { %3508 = vmatmul.mubr.f32.gmra.mrb[44].mxu1 %v3304_v26 }
 0x47d   : > { %v3310_v36 = vpop.f32.mrb[18].mxu1  ;;  %7544 = vmatpush1.bf16.msra.mxu1 %v7543_v29 }
 0x47e   : > { %v3312_v18 = vpop.f32.mrb[19].mxu1  ;;  %7545 = vmatprep.subr.bf16.mxu1 %v11462_v63 }
 0x47f   : > { %6710 = vmatprep.mubr.msk.f32.mxu1 %vm3360_vm5, %v3312_v18 }
 0x480   : > { %3513 = vmatmul.mubr.f32.gmra.mrb[46].mxu1 %v3310_v36 }
 0x481   : > { %v3316_v40 = vpop.f32.mrb[20].mxu1  ;;  %7547 = vmatpush1.bf16.msra.mxu1 %v7546_v22 }
 0x482   : > { %v3318_v42 = vpop.f32.mrb[21].mxu1  ;;  %3600 = vmatprep.subr.mxu1 %v11472_v7 }
 0x483   : > { %6711 = vmatprep.mubr.msk.f32.mxu1 %vm3360_vm5, %v3318_v42 }
 0x484   : > { %3518 = vmatmul.mubr.f32.gmra.mrb[48].mxu1 %v3316_v40 }
 0x485   : > { %v3322_v35 = vpop.f32.mrb[22].mxu1  ;;  %3601 = vmatpush1.msra.mxu1 %v6735_v27 }
 0x486   : > { %v3324_v46 = vpop.f32.mrb[23].mxu1 }
 0x487   : > { %6712 = vmatprep.mubr.msk.f32.mxu1 %vm3360_vm5, %v3324_v46 }
 0x488   : > { %3523 = vmatmul.mubr.f32.gmra.mrb[50].mxu1 %v3322_v35 }
 0x489   : > { %v3328_v49 = vpop.f32.mrb[24].mxu1 }
 0x48a   : > { %v3330_v38 = vpop.f32.mrb[25].mxu1 }
 0x48b   : > { %6713 = vmatprep.mubr.msk.f32.mxu1 %vm3360_vm5, %v3330_v38 }
 0x48c   : > { %3528 = vmatmul.mubr.f32.gmra.mrb[52].mxu1 %v3328_v49 }
 0x48d   : > { %v3334_v54 = vpop.f32.mrb[26].mxu1 }
 0x48e   : > { %v3336_v41 = vpop.f32.mrb[27].mxu1 }
 0x48f   : > { %6714 = vmatprep.mubr.msk.f32.mxu1 %vm3360_vm5, %v3336_v41 }
 0x490   : > { %3533 = vmatmul.mubr.f32.gmra.mrb[54].mxu1 %v3334_v54 }
 0x491   : > { %6736 = vmatprep.mubr.msk.f32.mxu1 %vm3360_vm5, %v9695_v15  ;;  %v6752_v15 = vld [vmem:[%s11444_s5 + $0xc0] sm:$0xff] }
 0x492   : > { %v7550_v44 = vpack.c.bf16 %v6752_v15, %v6750_v37 }
 0x494   : > { %3625 = vmatmul.mubr.f32.vlgmr.msra.gmra.mrb[56].mxu1 %v9693_v55  ;;  %v7548_v55 = vpack.c.bf16 %v6753_v32, %v6751_v20 }
 0x495   : > { %6737 = vmatprep.mubr.msk.f32.mxu1 %vm3360_vm5, %v9708_v50  ;;  %v6754_v50 = vld [vmem:[%s11444_s5 + $0xd0] sm:$0xff] }
 0x496   : > { %7549 = vmatprep.subr.bf16.mxu1 %v7548_v55  ;;  %v7554_v0 = vpack.c.bf16 %v6756_v53, %v6754_v50 }
 0x497   : > { %7551 = vmatpush1.bf16.msra.mxu1 %v7550_v44 }
 0x498   : > { %3630 = vmatmul.mubr.f32.gmra.mrb[58].mxu1 %v9706_v47  ;;  %v6757_v47 = vld [vmem:[%s11444_s5 + $0xe8] sm:$0xff] }
 0x499   : > { %6738 = vmatprep.mubr.msk.f32.mxu1 %vm3360_vm5, %v9722_v59  ;;  %v7552_v60 = vpack.c.bf16 %v6757_v47, %v6755_v58  ;;  %v3709_v47 = vld [vmem:[%s11444_s5] sm:$0xff] }
 0x49b   : > { %7553 = vmatprep.subr.bf16.mxu1 %v7552_v60  ;;  %v3711_v60 = vld [vmem:[%s11444_s5 + $0x10] sm:$0xff] }
 0x49c   : > { %3635 = vmatmul.mubr.f32.gmra.mrb[60].mxu1 %v9720_v56  ;;  %v6759_v56 = vld [vmem:[%s11444_s5 + $0xf8] sm:$0xff] }
 0x49d   : > { %6739 = vmatprep.mubr.msk.f32.mxu1 %vm3360_vm5, %v9736_v39  ;;  %7555 = vmatpush1.bf16.msra.mxu1 %v7554_v0  ;;  %v7556_v59 = vpack.c.bf16 %v6761_v3, %v6759_v56  ;;  %v6765_v39 = vld [vmem:[%s11444_s5 + $0x128] sm:$0xff]  ;;  %v3716_v3 = vld [vmem:[%s11444_s5 + $0x38] sm:$0xff] }
 0x49e   : > { %v7560_v1 = vpack.c.bf16 %v6765_v39, %v6763_v9  ;;  %v3714_v56 = vld [vmem:[%s11444_s5 + $0x28] sm:$0xff]  ;;  %v3713_v39 = vld [vmem:[%s11444_s5 + $0x20] sm:$0xff] }
 0x49f   : > { %7557 = vmatprep.subr.bf16.mxu1 %v7556_v59 }
 0x4a0   : > { %3640 = vmatmul.mubr.f32.gmra.mrb[62].mxu1 %v9734_v34  ;;  %v7558_v34 = vpack.c.bf16 %v6760_v62, %v6758_v5  ;;  %v7570_v5 = vpack.c.bf16 %v3711_v60, %v3709_v47  ;;  %v3723_v47 = vld [vmem:[%s11444_s5 + $0x70] sm:$0xff] }
 0x4a1   : > { %6740 = vmatprep.mubr.msk.f32.mxu1 %vm3360_vm5, %v9750_v4  ;;  %v6767_v4 = vld [vmem:[%s11444_s5 + $0x138] sm:$0xff] }
 0x4a2   : > { %7559 = vmatpush1.bf16.msra.mxu1 %v7558_v34  ;;  %v7564_v12 = vpack.c.bf16 %v6769_v52, %v6767_v4  ;;  %v7572_v52 = vpack.c.bf16 %v3716_v3, %v3714_v56 }
 0x4a3   : > { %7561 = vmatprep.subr.bf16.mxu1 %v7560_v1  ;;  %v3715_v1 = vld [vmem:[%s11444_s5 + $0x30] sm:$0xff] }
 0x4a4   : > { %3645 = vmatmul.mubr.f32.gmra.mrb[64].mxu1 %v9748_v10  ;;  %v6764_v10 = vld [vmem:[%s11444_s5 + $0x120] sm:$0xff] }
 0x4a5   : > { %6741 = vmatprep.mubr.msk.f32.mxu1 %vm3360_vm5, %v9764_v61  ;;  %v7562_v48 = vpack.c.bf16 %v6764_v10, %v6762_v43 }
 0x4a7   : > { %7563 = vmatpush1.bf16.msra.mxu1 %v7562_v48 }
 0x4a8   : > { %3650 = vmatmul.mubr.f32.gmra.mrb[66].mxu1 %v9762_v57  ;;  %v6766_v57 = vld [vmem:[%s11444_s5 + $0x130] sm:$0xff]  ;;  %7565 = vmatprep.subr.bf16.mxu1 %v7564_v12 }
 0x4a9   : > { %6742 = vmatprep.mubr.msk.f32.mxu1 %vm3360_vm5, %v9778_v17  ;;  %v7566_v61 = vpack.c.bf16 %v6768_v8, %v6766_v57 }
 0x4ab   : > { %7567 = vmatpush1.bf16.msra.mxu1 %v7566_v61 }
 0x4ac   : > { %3655 = vmatmul.mubr.f32.gmra.mrb[68].mxu1 %v9776_v16  ;;  %6772 = vmatprep.subr.msk.mxu1 %vm2238_vm4, %v6771_v2  ;;  %v3710_v16 = vld [vmem:[%s11444_s5 + $0x8] sm:$0xff] }
 0x4ad   : > { %6743 = vmatprep.mubr.msk.f32.mxu1 %vm3360_vm5, %v3300_v45  ;;  %v7568_v17 = vpack.c.bf16 %v3712_v51, %v3710_v16  ;;  %v3718_v2 = vld [vmem:[%s11444_s5 + $0x48] sm:$0xff] }
 0x4af   : > { %6773 = vmatpush1.msk.msra.mxu1 %vm2238_vm4, %v6770_v13  ;;  %v3720_v13 = vld [vmem:[%s11444_s5 + $0x58] sm:$0xff] }
 0x4b0   : > { %3660 = vmatmul.mubr.f32.gmra.mrb[70].mxu1 %v3298_v25  ;;  %7569 = vmatprep.subr.bf16.mxu1 %v7568_v17  ;;  %v7574_v17 = vpack.c.bf16 %v3715_v1, %v3713_v39  ;;  %v3726_v1 = vld [vmem:[%s11444_s5 + $0x88] sm:$0xff] }
 0x4b1   : > { %6744 = vmatprep.mubr.msk.f32.mxu1 %vm3360_vm5, %v3306_v23 }
 0x4b4   : > { %3665 = vmatmul.mubr.f32.gmra.mrb[72].mxu1 %v3304_v26 }
 0x4b5   : > { %6745 = vmatprep.mubr.msk.f32.mxu1 %vm3360_vm5, %v3312_v18 }
 0x4b8   : > { %3670 = vmatmul.mubr.f32.gmra.mrb[74].mxu1 %v3310_v36 }
 0x4b9   : > { %6746 = vmatprep.mubr.msk.f32.mxu1 %vm3360_vm5, %v3318_v42 }
 0x4bc   : > { %3675 = vmatmul.mubr.f32.gmra.mrb[76].mxu1 %v3316_v40 }
 0x4bd   : > { %6747 = vmatprep.mubr.msk.f32.mxu1 %vm3360_vm5, %v3324_v46 }
 0x4c0   : > { %3680 = vmatmul.mubr.f32.gmra.mrb[78].mxu1 %v3322_v35 }
 0x4c1   : > { %6748 = vmatprep.mubr.msk.f32.mxu1 %vm3360_vm5, %v3330_v38 }
 0x4c4   : > { %3685 = vmatmul.mubr.f32.gmra.mrb[80].mxu1 %v3328_v49 }
 0x4c5   : > { %6749 = vmatprep.mubr.msk.f32.mxu1 %vm3360_vm5, %v3336_v41 }
 0x4c8   : > { %3690 = vmatmul.mubr.f32.gmra.mrb[82].mxu1 %v3334_v54 }
 0x4c9   : > { %3898 = vmatprep.mubr.f32.mxu1 %v11472_v7 }
 0x52f   : > { %v3469_v19 = vpop.f32.mrb[28].mxu1 }
 0x530   : > { %v3471_v24 = vpop.f32.mrb[29].mxu1 }
 0x533   : > { %v3474_v25 = vpop.f32.mrb[30].mxu1 }
 0x534   : > { %v3476_v28 = vpop.f32.mrb[31].mxu1 }
 0x535   : > { %v3719_v28 = vld [vmem:[%s11444_s5 + $0x50] sm:$0xff] }
 0x537   : > { %v3479_v45 = vpop.f32.mrb[32].mxu1 }
 0x538   : > { %v3481_v31 = vpop.f32.mrb[33].mxu1 }
 0x53b   : > { %v9919_v21 = vpop.f32.mrb[34].mxu1 }
 0x53c   : > { %v3486_v26 = vpop.f32.mrb[35].mxu1 }
 0x53f   : > { %v9921_v29 = vpop.f32.mrb[36].mxu1 }
 0x540   : > { %v3491_v23 = vpop.f32.mrb[37].mxu1 }
 0x543   : > { %v9923_v30 = vpop.f32.mrb[38].mxu1 }
 0x544   : > { %v3496_v33 = vpop.f32.mrb[39].mxu1 }
 0x545   : > { %v7576_v33 = vpack.c.bf16 %v3720_v13, %v3718_v2 }
 0x547   : > { %v9925_v36 = vpop.f32.mrb[40].mxu1 }
 0x548   : > { %v3501_v22 = vpop.f32.mrb[41].mxu1 }
 0x54b   : > { %v9927_v18 = vpop.f32.mrb[42].mxu1 }
 0x54c   : > { %v3506_v40 = vpop.f32.mrb[43].mxu1 }
 0x54f   : > { %v9929_v42 = vpop.f32.mrb[44].mxu1 }
 0x550   : > { %v3511_v27 = vpop.f32.mrb[45].mxu1 }
 0x553   : > { %v9931_v35 = vpop.f32.mrb[46].mxu1 }
 0x554   : > { %v3516_v46 = vpop.f32.mrb[47].mxu1 }
 0x555   : > { %v3722_v46 = vld [vmem:[%s11444_s5 + $0x68] sm:$0xff] }
 0x557   : > { %v9933_v49 = vpop.f32.mrb[48].mxu1 }
 0x558   : > { %v3521_v38 = vpop.f32.mrb[49].mxu1 }
 0x559   : > { %v3724_v38 = vld [vmem:[%s11444_s5 + $0x78] sm:$0xff] }
 0x55a   : > { %v7580_v3 = vpack.c.bf16 %v3724_v38, %v3722_v46 }
 0x55b   : > { %v9935_v54 = vpop.f32.mrb[50].mxu1 }
 0x55c   : > { %v3526_v41 = vpop.f32.mrb[51].mxu1 }
 0x55f   : > { %v9937_v20 = vpop.f32.mrb[52].mxu1 }
 0x560   : > { %v3531_v32 = vpop.f32.mrb[53].mxu1 }
 0x563   : > { %v9939_v55 = vpop.f32.mrb[54].mxu1 }
 0x564   : > { %v3536_v37 = vpop.f32.mrb[55].mxu1 }
 0x567   : > { %v3626_v15 = vpop.f32.mrb[56].mxu1 }
 0x568   : > { %v9941_v44 = vmax.f32 %v3469_v19, %v3626_v15  ;;  %v3628_v58 = vpop.f32.mrb[57].mxu1 }
 0x569   : > { %v3721_v58 = vld [vmem:[%s11444_s5 + $0x60] sm:$0xff] }
 0x56a   : > { %v11469_v59 = vrot.slane %v9941_v44, 1  ;;  %v11468_v62 = vrot.slane %v9941_v44, 2  ;;  %v11467_v34 = vrot.slane %v9941_v44, 3  ;;  %v11466_v12 = vrot.slane %v9941_v44, 4 }
 0x56b   : > { %v3631_v50 = vpop.f32.mrb[58].mxu1 }
 0x56c   : > { %v9949_v53 = vmax.f32 %v3474_v25, %v3631_v50  ;;  %v3633_v0 = vpop.f32.mrb[59].mxu1  ;;  %v3717_v25 = vld [vmem:[%s11444_s5 + $0x40] sm:$0xff] }
 0x56e   : > { %v3746_v9 = vrot.slane %v9949_v53, 1  ;;  %v4167_v43 = vrot.slane %v9949_v53, 2  ;;  %v4432_v10 = vrot.slane %v9949_v53, 3  ;;  %v4697_v48 = vrot.slane %v9949_v53, 4 }
 0x56f   : > { %v3636_v4 = vpop.f32.mrb[60].mxu1 }
 0x570   : > { %v9971_v57 = vmax.f32 %v3479_v45, %v3636_v4  ;;  %v3638_v8 = vpop.f32.mrb[61].mxu1  ;;  %v3747_v61 = vsel %vm594_vm0, %v11469_v59, %v3746_v9  ;;  %v9985_v16 = vsel %vm1314_vm2, %v11468_v62, %v4167_v43  ;;  %v9990_v51 = vsel %vm1776_vm3, %v11467_v34, %v4432_v10 }
 0x571   : > { %6774 = vmatmul.mubr.msk.f32.vlgmr.msra.gmra.mrb[84].mxu1 %vm3798_vm6, %v3747_v61  ;;  %v9996_v19 = vsel %vm2238_vm4, %v11466_v12, %v4697_v48  ;;  %v3725_v8 = vld [vmem:[%s11444_s5 + $0x80] sm:$0xff]  ;;  %v3727_v61 = vld [vmem:[%s11444_s5 + $0x90] sm:$0xff] }
 0x572   : > { %3904 = vmatprep.mubr.f32.mxu1 %v11472_v7  ;;  %v3748_v24 = vrot.slane %v9971_v57, 1  ;;  %7571 = vmatpush1.bf16.msra.mxu1 %v7570_v5  ;;  %v4169_v45 = vrot.slane %v9971_v57, 2  ;;  %v4434_v31 = vrot.slane %v9971_v57, 3  ;;  %v4699_v26 = vrot.slane %v9971_v57, 4 }
 0x573   : > { %v3641_v23 = vpop.f32.mrb[62].mxu1  ;;  %7573 = vmatprep.subr.bf16.mxu1 %v7572_v52 }
 0x574   : > { %v10010_v22 = vmax.f32 %v9919_v21, %v3641_v23  ;;  %v3643_v40 = vpop.f32.mrb[63].mxu1  ;;  %v3749_v27 = vsel %vm594_vm0, %v3746_v9, %v3748_v24  ;;  %v10020_v41 = vsel %vm1314_vm2, %v4167_v43, %v4169_v45  ;;  %v10023_v32 = vsel %vm1776_vm3, %v4432_v10, %v4434_v31  ;;  %v3728_v43 = vld [vmem:[%s11444_s5 + $0x98] sm:$0xff] }
 0x575   : > { %6775 = vmatmul.mubr.msk.f32.gmra.mrb[86].mxu1 %vm3798_vm6, %v3749_v27  ;;  %v7578_v21 = vpack.c.bf16 %v3719_v28, %v3717_v25  ;;  %v10027_v37 = vsel %vm2238_vm4, %v4697_v48, %v4699_v26  ;;  %v7584_v25 = vpack.c.bf16 %v3728_v43, %v3726_v1 }
 0x576   : > { %3910 = vmatprep.mubr.f32.mxu1 %v11472_v7  ;;  %v3750_v15 = vrot.slane %v10010_v22, 1  ;;  %7575 = vmatpush1.bf16.msra.mxu1 %v7574_v17  ;;  %v4171_v60 = vrot.slane %v10010_v22, 2  ;;  %v4436_v50 = vrot.slane %v10010_v22, 3  ;;  %v4701_v0 = vrot.slane %v10010_v22, 4 }
 0x577   : > { %v3646_v56 = vpop.f32.mrb[64].mxu1  ;;  %7577 = vmatprep.subr.bf16.mxu1 %v7576_v33  ;;  %v7586_v33 = vpack.c.bf16 %v3727_v61, %v3725_v8 }
 0x578   : > { %v10041_v5 = vmax.f32 %v9921_v29, %v3646_v56  ;;  %v3648_v9 = vpop.f32.mrb[65].mxu1  ;;  %v3751_v39 = vsel %vm594_vm0, %v3748_v24, %v3750_v15  ;;  %v10051_v10 = vsel %vm1314_vm2, %v4169_v45, %v4171_v60  ;;  %v10054_v48 = vsel %vm1776_vm3, %v4434_v31, %v4436_v50 }
 0x579   : > { %6776 = vmatmul.mubr.msk.f32.gmra.mrb[88].mxu1 %vm3798_vm6, %v3751_v39  ;;  %v7582_v29 = vpack.c.bf16 %v3723_v47, %v3721_v58  ;;  %v10058_v4 = vsel %vm2238_vm4, %v4699_v26, %v4701_v0 }
 0x57a   : > { %3916 = vmatprep.mubr.f32.mxu1 %v11472_v7  ;;  %v3752_v52 = vrot.slane %v10041_v5, 1  ;;  %7579 = vmatpush1.bf16.msra.mxu1 %v7578_v21  ;;  %v4173_v2 = vrot.slane %v10041_v5, 2  ;;  %v4438_v13 = vrot.slane %v10041_v5, 3  ;;  %v4703_v17 = vrot.slane %v10041_v5, 4 }
 0x57b   : > { %v3651_v24 = vpop.f32.mrb[66].mxu1  ;;  %7581 = vmatprep.subr.bf16.mxu1 %v7580_v3 }
 0x57c   : > { %v10072_v28 = vmax.f32 %v9923_v30, %v3651_v24  ;;  %v3653_v45 = vpop.f32.mrb[67].mxu1  ;;  %v3753_v31 = vsel %vm594_vm0, %v3750_v15, %v3752_v52  ;;  %v10076_v26 = vsel %vm1314_vm2, %v4171_v60, %v4173_v2  ;;  %v10079_v23 = vsel %vm1776_vm3, %v4436_v50, %v4438_v13  ;;  %v3730_v60 = vld [vmem:[%s11444_s5 + $0xa8] sm:$0xf] }
 0x57d   : > { %6777 = vmatmul.mubr.msk.f32.gmra.mrb[90].mxu1 %vm3798_vm6, %v3753_v31  ;;  %v10083_v40 = vsel %vm2238_vm4, %v4701_v0, %v4703_v17  ;;  %v6805_v50 = vld [vmem:[%s11444_s5 + $0x168] sm:$0xff]  ;;  %v6807_v0 = vld [vmem:[%s11444_s5 + $0x178] sm:$0xff] }
 0x57e   : > { %3922 = vmatprep.mubr.f32.mxu1 %v11472_v7  ;;  %v3754_v30 = vrot.slane %v10072_v28, 1  ;;  %7583 = vmatpush1.bf16.msra.mxu1 %v7582_v29  ;;  %v4175_v27 = vrot.slane %v10072_v28, 2  ;;  %v4440_v46 = vrot.slane %v10072_v28, 3  ;;  %v4705_v38 = vrot.slane %v10072_v28, 4  ;;  %v3729_v29 = vld [vmem:[%s11444_s5 + $0xa0] sm:$0xf] }
 0x57f   : > { %v3656_v21 = vpop.f32.mrb[68].mxu1  ;;  %7585 = vmatprep.subr.bf16.mxu1 %v7584_v25 }
 0x580   : > { %v10091_v15 = vmax.f32 %v9925_v36, %v3656_v21  ;;  %v3658_v58 = vpop.f32.mrb[69].mxu1  ;;  %v3755_v47 = vsel %vm594_vm0, %v3752_v52, %v3754_v30  ;;  %v10104_v56 = vsel %vm1314_vm2, %v4173_v2, %v4175_v27  ;;  %v10107_v36 = vsel %vm1776_vm3, %v4438_v13, %v4440_v46 }
 0x581   : > { %6778 = vmatmul.mubr.msk.f32.gmra.mrb[92].mxu1 %vm3798_vm6, %v3755_v47  ;;  %v10111_v3 = vsel %vm2238_vm4, %v4703_v17, %v4705_v38  ;;  %v7588_v52 = vpack.c.bf16 %v6807_v0, %v6805_v50 }
 0x582   : > { %3928 = vmatprep.mubr.f32.mxu1 %v11472_v7  ;;  %v3756_v9 = vrot.slane %v10091_v15, 1  ;;  %7587 = vmatpush1.bf16.msra.mxu1 %v7586_v33  ;;  %v4177_v39 = vrot.slane %v10091_v15, 2  ;;  %v4442_v1 = vrot.slane %v10091_v15, 3  ;;  %v4707_v8 = vrot.slane %v10091_v15, 4 }
 0x583   : > { %v3661_v43 = vpop.f32.mrb[70].mxu1  ;;  %6788 = vmatprep.subr.msk.mxu1 %vm2238_vm4, %v3730_v60 }
 0x584   : > { %v10123_v61 = vmax.f32 %v9927_v18, %v3661_v43  ;;  %v3663_v2 = vpop.f32.mrb[71].mxu1  ;;  %v3757_v13 = vsel %vm594_vm0, %v3754_v30, %v3756_v9  ;;  %v10127_v17 = vsel %vm1314_vm2, %v4175_v27, %v4177_v39  ;;  %v10130_v24 = vsel %vm1776_vm3, %v4440_v46, %v4442_v1 }
 0x585   : > { %6779 = vmatmul.mubr.msk.f32.gmra.mrb[94].mxu1 %vm3798_vm6, %v3757_v13  ;;  %v10134_v25 = vsel %vm2238_vm4, %v4705_v38, %v4707_v8 }
 0x586   : > { %3934 = vmatprep.mubr.f32.mxu1 %v11472_v7  ;;  %v3758_v45 = vrot.slane %v10123_v61, 1  ;;  %6789 = vmatpush1.msk.msra.mxu1 %vm2238_vm4, %v3729_v29  ;;  %v4179_v18 = vrot.slane %v10123_v61, 2  ;;  %v4444_v31 = vrot.slane %v10123_v61, 3  ;;  %v4709_v30 = vrot.slane %v10123_v61, 4 }
 0x587   : > { %v3666_v33 = vpop.f32.mrb[72].mxu1  ;;  %7589 = vmatprep.subr.bf16.mxu1 %v7588_v52 }
 0x588   : > { %v10143_v27 = vmax.f32 %v9929_v42, %v3666_v33  ;;  %v3668_v46 = vpop.f32.mrb[73].mxu1  ;;  %v3759_v38 = vsel %vm594_vm0, %v3756_v9, %v3758_v45  ;;  %v10147_v21 = vsel %vm1314_vm2, %v4177_v39, %v4179_v18  ;;  %v10150_v58 = vsel %vm1776_vm3, %v4442_v1, %v4444_v31 }
 0x589   : > { %6780 = vmatmul.mubr.msk.f32.gmra.mrb[96].mxu1 %vm3798_vm6, %v3759_v38  ;;  %v10154_v47 = vsel %vm2238_vm4, %v4707_v8, %v4709_v30 }
 0x58a   : > { %3940 = vmatprep.mubr.f32.mxu1 %v11472_v7  ;;  %v3760_v60 = vrot.slane %v10143_v27, 1  ;;  %v4181_v42 = vrot.slane %v10143_v27, 2  ;;  %v4446_v50 = vrot.slane %v10143_v27, 3  ;;  %v4711_v9 = vrot.slane %v10143_v27, 4 }
 0x58b   : > { %v3671_v0 = vpop.f32.mrb[74].mxu1 }
 0x58c   : > { %v10162_v39 = vmax.f32 %v9931_v35, %v3671_v0  ;;  %v3673_v1 = vpop.f32.mrb[75].mxu1  ;;  %v3761_v43 = vsel %vm594_vm0, %v3758_v45, %v3760_v60  ;;  %v10166_v29 = vsel %vm1314_vm2, %v4179_v18, %v4181_v42  ;;  %v10169_v52 = vsel %vm1776_vm3, %v4444_v31, %v4446_v50 }
 0x58d   : > { %6781 = vmatmul.mubr.msk.f32.gmra.mrb[98].mxu1 %vm3798_vm6, %v3761_v43  ;;  %v10173_v8 = vsel %vm2238_vm4, %v4709_v30, %v4711_v9 }
 0x58e   : > { %3946 = vmatprep.mubr.f32.mxu1 %v11472_v7  ;;  %v3762_v2 = vrot.slane %v10162_v39, 1  ;;  %v4183_v35 = vrot.slane %v10162_v39, 2  ;;  %v4448_v13 = vrot.slane %v10162_v39, 3  ;;  %v4713_v18 = vrot.slane %v10162_v39, 4 }
 0x58f   : > { %v3676_v45 = vpop.f32.mrb[76].mxu1 }
 0x590   : > { %v10181_v33 = vmax.f32 %v9933_v49, %v3676_v45  ;;  %v3678_v31 = vpop.f32.mrb[77].mxu1  ;;  %v3763_v46 = vsel %vm594_vm0, %v3760_v60, %v3762_v2  ;;  %v10185_v30 = vsel %vm1314_vm2, %v4181_v42, %v4183_v35  ;;  %v10188_v38 = vsel %vm1776_vm3, %v4446_v50, %v4448_v13 }
 0x591   : > { %6782 = vmatmul.mubr.msk.f32.gmra.mrb[100].mxu1 %vm3798_vm6, %v3763_v46  ;;  %v10192_v0 = vsel %vm2238_vm4, %v4711_v9, %v4713_v18 }
 0x592   : > { %3952 = vmatprep.mubr.f32.mxu1 %v11472_v7  ;;  %v3764_v1 = vrot.slane %v10181_v33, 1  ;;  %v4185_v49 = vrot.slane %v10181_v33, 2  ;;  %v4450_v43 = vrot.slane %v10181_v33, 3  ;;  %v4715_v42 = vrot.slane %v10181_v33, 4 }
 0x593   : > { %v3681_v60 = vpop.f32.mrb[78].mxu1 }
 0x594   : > { %v10200_v45 = vmax.f32 %v9935_v54, %v3681_v60  ;;  %v3683_v50 = vpop.f32.mrb[79].mxu1  ;;  %v3765_v31 = vsel %vm594_vm0, %v3762_v2, %v3764_v1  ;;  %v10204_v9 = vsel %vm1314_vm2, %v4183_v35, %v4185_v49  ;;  %v10207_v46 = vsel %vm1776_vm3, %v4448_v13, %v4450_v43 }
 0x595   : > { %6783 = vmatmul.mubr.msk.f32.gmra.mrb[102].mxu1 %vm3798_vm6, %v3765_v31  ;;  %v10211_v63 = vsel %vm2238_vm4, %v4713_v18, %v4715_v42 }
 0x596   : > { %3958 = vmatprep.mubr.f32.mxu1 %v11472_v7  ;;  %v3766_v14 = vrot.slane %v10200_v45, 1  ;;  %v4187_v54 = vrot.slane %v10200_v45, 2  ;;  %v4452_v60 = vrot.slane %v10200_v45, 3  ;;  %v4717_v2 = vrot.slane %v10200_v45, 4 }
 0x597   : > { %v3686_v35 = vpop.f32.mrb[80].mxu1 }
 0x598   : > { %v10219_v50 = vmax.f32 %v9937_v20, %v3686_v35  ;;  %v3688_v13 = vpop.f32.mrb[81].mxu1  ;;  %v3767_v31 = vsel %vm594_vm0, %v3764_v1, %v3766_v14  ;;  %v10223_v18 = vsel %vm1314_vm2, %v4185_v49, %v4187_v54  ;;  %v10226_v6 = vsel %vm1776_vm3, %v4450_v43, %v4452_v60 }
 0x599   : > { %6784 = vmatmul.mubr.msk.f32.gmra.mrb[104].mxu1 %vm3798_vm6, %v3767_v31  ;;  %v10230_v12 = vsel %vm2238_vm4, %v4715_v42, %v4717_v2 }
 0x59a   : > { %11485 = vst [vmem:[#allocation12_spill] sm:$0xff] %v10230_v12  ;;  %3964 = vmatprep.mubr.f32.mxu1 %v11472_v7  ;;  %v3768_v34 = vrot.slane %v10219_v50, 1  ;;  %v4189_v20 = vrot.slane %v10219_v50, 2  ;;  %v4454_v35 = vrot.slane %v10219_v50, 3  ;;  %v4719_v1 = vrot.slane %v10219_v50, 4 }
 0x59b   : > { %v3691_v49 = vpop.f32.mrb[82].mxu1  ;;  %v11489_v12 = vrot.slane %v9941_v44, 3 }
 0x59c   : > { %v10238_v13 = vmax.f32 %v9939_v55, %v3691_v49  ;;  %v3693_v43 = vpop.f32.mrb[83].mxu1  ;;  %v3769_v31 = vsel %vm594_vm0, %v3766_v14, %v3768_v34  ;;  %v10242_v42 = vsel %vm1314_vm2, %v4187_v54, %v4189_v20  ;;  %v10245_v62 = vsel %vm1776_vm3, %v4452_v60, %v4454_v35 }
 0x59d   : > { %6785 = vmatmul.mubr.msk.f32.gmra.mrb[106].mxu1 %vm3798_vm6, %v3769_v31  ;;  %v10249_v59 = vsel %vm2238_vm4, %v4717_v2, %v4719_v1  ;;  %v11487_v60 = vrot.slane %v9941_v44, 1  ;;  %v11488_v2 = vrot.slane %v9941_v44, 2 }
 0x59e   : > { %11486 = vst [vmem:[#allocation13_spill] sm:$0xff] %v10249_v59  ;;  %3970 = vmatprep.mubr.f32.mxu1 %v11472_v7  ;;  %v3770_v11 = vrot.slane %v10238_v13, 1  ;;  %v4191_v55 = vrot.slane %v10238_v13, 2  ;;  %v4456_v49 = vrot.slane %v10238_v13, 3  ;;  %v4721_v14 = vrot.slane %v10238_v13, 4 }
 0x5a0   : > { %v3771_v54 = vsel %vm594_vm0, %v3768_v34, %v3770_v11  ;;  %v3774_v43 = vsel %vm594_vm0, %v3770_v11, %v11487_v60  ;;  %v10261_v31 = vsel %vm1314_vm2, %v4189_v20, %v4191_v55  ;;  %v10266_v7 = vsel %vm1314_vm2, %v4191_v55, %v11488_v2  ;;  %v6808_v2 = vld [vmem:[%s11444_s5 + $0x180] sm:$0xff] }
 0x5a1   : > { %6786 = vmatmul.mubr.msk.f32.gmra.mrb[108].mxu1 %vm3798_vm6, %v3771_v54  ;;  %v10270_v59 = vsel %vm1776_vm3, %v4454_v35, %v4456_v49  ;;  %v10275_v34 = vsel %vm1776_vm3, %v4456_v49, %v11489_v12  ;;  %v10278_v11 = vsel %vm2238_vm4, %v4719_v1, %v4721_v14  ;;  %v11491_v20 = vrot.slane %v9941_v44, 4  ;;  %v6804_v35 = vld [vmem:[%s11444_s5 + $0x160] sm:$0xff]  ;;  %v6806_v54 = vld [vmem:[%s11444_s5 + $0x170] sm:$0xff]  ;;  %v6809_v12 = vld [vmem:[%s11444_s5 + $0x188] sm:$0xff] }
 0x5a2   : > { %11490 = vst [vmem:[#allocation14_spill] sm:$0xff] %v10278_v11  ;;  %v11493_v55 = vmov 0.0   ;;  %v6811_v1 = vld [vmem:[%s11444_s5 + $0x198] sm:$0xff]  ;;  %v7590_v49 = vpack.c.bf16 %v6806_v54, %v6804_v35  ;;  %v6817_v11 = vld [vmem:[%s11444_s5 + $0x1c8] sm:$0xff] }
 0x5a3   : > { %v10283_v60 = vsel %vm2238_vm4, %v4721_v14, %v11491_v20  ;;  %3976 = vmatprep.mubr.f32.mxu1 %v11493_v55  ;;  %v7592_v14 = vpack.c.bf16 %v6811_v1, %v6809_v12  ;;  %v6810_v20 = vld [vmem:[%s11444_s5 + $0x190] sm:$0xff]  ;;  %v6812_v12 = vld [vmem:[%s11444_s5 + $0x1a0] sm:$0xff]  ;;  %7323 = vmatprep.mubr.msk.f32.mxu0 %vm8392_vm8, %v11493_v55 }
 0x5a4   : > { %11492 = vst [vmem:[#allocation15_spill] sm:$0xff] %v10283_v60  ;;  %v6813_v60 = vld [vmem:[%s11444_s5 + $0x1a8] sm:$0xff]  ;;  %v7594_v35 = vpack.c.bf16 %v6810_v20, %v6808_v2  ;;  %v6814_v1 = vld [vmem:[%s11444_s5 + $0x1b0] sm:$0xff] }
 0x5a5   : > { %6787 = vmatmul.mubr.msk.f32.gmra.mrb[110].mxu1 %vm3798_vm6, %v3774_v43  ;;  %v6815_v43 = vld [vmem:[%s11444_s5 + $0x1b8] sm:$0xff]  ;;  %v6818_v2 = vld [vmem:[%s11444_s5 + $0x1d0] sm:$0xff]  ;;  %v6821_v20 = vld [vmem:[%s11444_s5 + $0x1e8] sm:$0xff] }
 0x5a6   : > { %4081 = vmatprep.mubr.f32.mxu1 %v11493_v55  ;;  %v7596_v54 = vpack.c.bf16 %v6815_v43, %v6813_v60  ;;  %v7598_v60 = vpack.c.bf16 %v6814_v1, %v6812_v12  ;;  %v6825_v12 = vld [vmem:[%s11444_s5 + $0x208] sm:$0xf]  ;;  %v6843_v1 = vld [vmem:[%s11444_s5 + $0x218] sm:$0xff] }
 0x5a9   : > { %6790 = vmatmul.mubr.msk.f32.vlgmr.msra.gmra.mrb[84].mxu1 %vm3798_vm6, %v9941_v44  ;;  %v6819_v44 = vld [vmem:[%s11444_s5 + $0x1d8] sm:$0xff] }
 0x5aa   : > { %4087 = vmatprep.mubr.f32.mxu1 %v11493_v55  ;;  %7591 = vmatpush1.bf16.msra.mxu1 %v7590_v49  ;;  %v7600_v49 = vpack.c.bf16 %v6819_v44, %v6817_v11  ;;  %v6845_v44 = vld [vmem:[%s11444_s5 + $0x228] sm:$0xff] }
 0x5ab   : > { %7593 = vmatprep.subr.bf16.mxu1 %v7592_v14  ;;  %v6816_v14 = vld [vmem:[%s11444_s5 + $0x1c0] sm:$0xff] }
 0x5ac   : > { %v7602_v11 = vpack.c.bf16 %v6818_v2, %v6816_v14  ;;  %v6850_v2 = vld [vmem:[%s11444_s5 + $0x250] sm:$0xff] }
 0x5ad   : > { %6791 = vmatmul.mubr.msk.f32.gmra.mrb[86].mxu1 %vm3798_vm6, %v9949_v53  ;;  %v6823_v53 = vld [vmem:[%s11444_s5 + $0x1f8] sm:$0xff] }
 0x5ae   : > { %4093 = vmatprep.mubr.f32.mxu1 %v11493_v55  ;;  %7595 = vmatpush1.bf16.msra.mxu1 %v7594_v35  ;;  %v7604_v43 = vpack.c.bf16 %v6823_v53, %v6821_v20  ;;  %v6820_v35 = vld [vmem:[%s11444_s5 + $0x1e0] sm:$0xff]  ;;  %v6855_v53 = vld [vmem:[%s11444_s5 + $0x278] sm:$0xff] }
 0x5af   : > { %7597 = vmatprep.subr.bf16.mxu1 %v7596_v54  ;;  %v6822_v54 = vld [vmem:[%s11444_s5 + $0x1f0] sm:$0xff]  ;;  %v6852_v20 = vld [vmem:[%s11444_s5 + $0x260] sm:$0xff] }
 0x5b1   : > { %6792 = vmatmul.mubr.msk.f32.gmra.mrb[88].mxu1 %vm3798_vm6, %v9971_v57  ;;  %v7606_v57 = vpack.c.bf16 %v6822_v54, %v6820_v35  ;;  %v6854_v35 = vld [vmem:[%s11444_s5 + $0x270] sm:$0xff]  ;;  %v6856_v54 = vld [vmem:[%s11444_s5 + $0x280] sm:$0xff] }
 0x5b2   : > { %4099 = vmatprep.mubr.f32.mxu1 %v11493_v55  ;;  %7599 = vmatpush1.bf16.msra.mxu1 %v7598_v60  ;;  %v7608_v60 = vpack.c.bf16 %v6845_v44, %v6843_v1  ;;  %v6858_v44 = vld [vmem:[%s11444_s5 + $0x290] sm:$0xff] }
 0x5b3   : > { %7601 = vmatprep.subr.bf16.mxu1 %v7600_v49 }
 0x5b5   : > { %6793 = vmatmul.mubr.msk.f32.gmra.mrb[90].mxu1 %vm3798_vm6, %v10010_v22  ;;  %v6824_v22 = vld [vmem:[%s11444_s5 + $0x200] sm:$0xf] }
 0x5b6   : > { %4105 = vmatprep.mubr.f32.mxu1 %v11493_v55  ;;  %7603 = vmatpush1.bf16.msra.mxu1 %v7602_v11  ;;  %v7618_v11 = vpack.c.bf16 %v6852_v20, %v6850_v2  ;;  %v6897_v2 = vld [vmem:[%s11444_s5 + $0x348] sm:$0xff] }
 0x5b7   : > { %7605 = vmatprep.subr.bf16.mxu1 %v7604_v43 }
 0x5b9   : > { %6794 = vmatmul.mubr.msk.f32.gmra.mrb[92].mxu1 %vm3798_vm6, %v10041_v5  ;;  %v6842_v5 = vld [vmem:[%s11444_s5 + $0x210] sm:$0xff] }
 0x5ba   : > { %4111 = vmatprep.mubr.f32.mxu1 %v11493_v55  ;;  %7607 = vmatpush1.bf16.msra.mxu1 %v7606_v57  ;;  %v6859_v57 = vld [vmem:[%s11444_s5 + $0x298] sm:$0xff] }
 0x5bb   : > { %6826 = vmatprep.subr.msk.mxu1 %vm2238_vm4, %v6825_v12  ;;  %v7622_v12 = vpack.c.bf16 %v6856_v54, %v6854_v35 }
 0x5bd   : > { %6795 = vmatmul.mubr.msk.f32.gmra.mrb[94].mxu1 %vm3798_vm6, %v10072_v28  ;;  %v6844_v28 = vld [vmem:[%s11444_s5 + $0x220] sm:$0xff] }
 0x5be   : > { %4117 = vmatprep.mubr.f32.mxu1 %v11493_v55  ;;  %6827 = vmatpush1.msk.msra.mxu1 %vm2238_vm4, %v6824_v22  ;;  %v6860_v22 = vld [vmem:[%s11444_s5 + $0x2a0] sm:$0xff] }
 0x5bf   : > { %7609 = vmatprep.subr.bf16.mxu1 %v7608_v60  ;;  %v6863_v60 = vld [vmem:[%s11444_s5 + $0x2b8] sm:$0xf] }
 0x5c1   : > { %6796 = vmatmul.mubr.msk.f32.gmra.mrb[96].mxu1 %vm3798_vm6, %v10091_v15  ;;  %v6847_v15 = vld [vmem:[%s11444_s5 + $0x238] sm:$0xff] }
 0x5c2   : > { %4123 = vmatprep.mubr.f32.mxu1 %v11493_v55 }
 0x5c5   : > { %6797 = vmatmul.mubr.msk.f32.gmra.mrb[98].mxu1 %vm3798_vm6, %v10123_v61  ;;  %v6849_v61 = vld [vmem:[%s11444_s5 + $0x248] sm:$0xff] }
 0x5c6   : > { %4129 = vmatprep.mubr.f32.mxu1 %v11493_v55 }
 0x5c9   : > { %6798 = vmatmul.mubr.msk.f32.gmra.mrb[100].mxu1 %vm3798_vm6, %v10143_v27  ;;  %v7610_v27 = vpack.c.bf16 %v6844_v28, %v6842_v5  ;;  %v6881_v5 = vld [vmem:[%s11444_s5 + $0x2c8] sm:$0xff]  ;;  %v6883_v28 = vld [vmem:[%s11444_s5 + $0x2d8] sm:$0xff] }
 0x5ca   : > { %4135 = vmatprep.mubr.f32.mxu1 %v11493_v55 }
 0x5cd   : > { %6799 = vmatmul.mubr.msk.f32.gmra.mrb[102].mxu1 %vm3798_vm6, %v10162_v39  ;;  %v7612_v39 = vpack.c.bf16 %v6849_v61, %v6847_v15  ;;  %v7628_v15 = vpack.c.bf16 %v6883_v28, %v6881_v5 }
 0x5ce   : > { %4141 = vmatprep.mubr.f32.mxu1 %v11493_v55 }
 0x5d1   : > { %6800 = vmatmul.mubr.msk.f32.gmra.mrb[104].mxu1 %vm3798_vm6, %v10181_v33  ;;  %v6846_v33 = vld [vmem:[%s11444_s5 + $0x230] sm:$0xff] }
 0x5d2   : > { %4147 = vmatprep.mubr.f32.mxu1 %v11493_v55 }
 0x5d5   : > { %6801 = vmatmul.mubr.msk.f32.gmra.mrb[106].mxu1 %vm3798_vm6, %v10200_v45  ;;  %v6848_v45 = vld [vmem:[%s11444_s5 + $0x240] sm:$0xff] }
 0x5d6   : > { %4153 = vmatprep.mubr.f32.mxu1 %v11493_v55  ;;  %v7614_v49 = vpack.c.bf16 %v6848_v45, %v6846_v33  ;;  %v6890_v33 = vld [vmem:[%s11444_s5 + $0x310] sm:$0xff]  ;;  %v6893_v45 = vld [vmem:[%s11444_s5 + $0x328] sm:$0xff] }
 0x5d9   : > { %6802 = vmatmul.mubr.msk.f32.gmra.mrb[108].mxu1 %vm3798_vm6, %v10219_v50  ;;  %v6851_v50 = vld [vmem:[%s11444_s5 + $0x258] sm:$0xff] }
 0x5da   : > { %4159 = vmatprep.mubr.f32.mxu1 %v11493_v55 }
 0x5dd   : > { %6803 = vmatmul.mubr.msk.f32.gmra.mrb[110].mxu1 %vm3798_vm6, %v10238_v13  ;;  %v6853_v13 = vld [vmem:[%s11444_s5 + $0x268] sm:$0xff] }
 0x5de   : > { %4318 = vmatprep.mubr.f32.mxu1 %v11493_v55  ;;  %v7616_v14 = vpack.c.bf16 %v6853_v13, %v6851_v50 }
 0x5e1   : > { %6828 = vmatmul.mubr.msk.f32.vlgmr.msra.gmra.mrb[84].mxu1 %vm3798_vm6, %v9985_v16  ;;  %v6857_v16 = vld [vmem:[%s11444_s5 + $0x288] sm:$0xff] }
 0x5e2   : > { %4324 = vmatprep.mubr.f32.mxu1 %v11493_v55  ;;  %7611 = vmatpush1.bf16.msra.mxu1 %v7610_v27  ;;  %v7620_v43 = vpack.c.bf16 %v6857_v16, %v6855_v53  ;;  %v6896_v16 = vld [vmem:[%s11444_s5 + $0x340] sm:$0xff] }
 0x5e3   : > { %7613 = vmatprep.subr.bf16.mxu1 %v7612_v39  ;;  %v6888_v39 = vld [vmem:[%s11444_s5 + $0x300] sm:$0xff] }
 0x5e4   : > { %v7638_v50 = vpack.c.bf16 %v6890_v33, %v6888_v39 }
 0x5e5   : > { %6829 = vmatmul.mubr.msk.f32.gmra.mrb[86].mxu1 %vm3798_vm6, %v10020_v41  ;;  %v6861_v41 = vld [vmem:[%s11444_s5 + $0x2a8] sm:$0xff] }
 0x5e6   : > { %4330 = vmatprep.mubr.f32.mxu1 %v11493_v55  ;;  %7615 = vmatpush1.bf16.msra.mxu1 %v7614_v49  ;;  %v7624_v1 = vpack.c.bf16 %v6861_v41, %v6859_v57  ;;  %v6892_v49 = vld [vmem:[%s11444_s5 + $0x320] sm:$0xff] }
 0x5e7   : > { %7617 = vmatprep.subr.bf16.mxu1 %v7616_v14  ;;  %v6894_v14 = vld [vmem:[%s11444_s5 + $0x330] sm:$0xff] }
 0x5e8   : > { %v7642_v20 = vpack.c.bf16 %v6894_v14, %v6892_v49 }
 0x5e9   : > { %6830 = vmatmul.mubr.msk.f32.gmra.mrb[88].mxu1 %vm3798_vm6, %v10051_v10  ;;  %v7626_v10 = vpack.c.bf16 %v6860_v22, %v6858_v44 }
 0x5ea   : > { %4336 = vmatprep.mubr.f32.mxu1 %v11493_v55  ;;  %7619 = vmatpush1.bf16.msra.mxu1 %v7618_v11  ;;  %v6898_v11 = vld [vmem:[%s11444_s5 + $0x350] sm:$0xff] }
 0x5eb   : > { %7621 = vmatprep.subr.bf16.mxu1 %v7620_v43  ;;  %v6901_v43 = vld [vmem:[%s11444_s5 + $0x368] sm:$0xf] }
 0x5ed   : > { %6831 = vmatmul.mubr.msk.f32.gmra.mrb[90].mxu1 %vm3798_vm6, %v10076_v26  ;;  %v6862_v26 = vld [vmem:[%s11444_s5 + $0x2b0] sm:$0xf] }
 0x5ee   : > { %4342 = vmatprep.mubr.f32.mxu1 %v11493_v55  ;;  %7623 = vmatpush1.bf16.msra.mxu1 %v7622_v12 }
 0x5ef   : > { %7625 = vmatprep.subr.bf16.mxu1 %v7624_v1 }
 0x5f1   : > { %6832 = vmatmul.mubr.msk.f32.gmra.mrb[92].mxu1 %vm3798_vm6, %v10104_v56  ;;  %v6880_v56 = vld [vmem:[%s11444_s5 + $0x2c0] sm:$0xff] }
 0x5f2   : > { %4348 = vmatprep.mubr.f32.mxu1 %v11493_v55  ;;  %7627 = vmatpush1.bf16.msra.mxu1 %v7626_v10 }
 0x5f3   : > { %6864 = vmatprep.subr.msk.mxu1 %vm2238_vm4, %v6863_v60 }
 0x5f5   : > { %6833 = vmatmul.mubr.msk.f32.gmra.mrb[94].mxu1 %vm3798_vm6, %v10127_v17  ;;  %v6882_v17 = vld [vmem:[%s11444_s5 + $0x2d0] sm:$0xff] }
 0x5f6   : > { %4354 = vmatprep.mubr.f32.mxu1 %v11493_v55  ;;  %6865 = vmatpush1.msk.msra.mxu1 %vm2238_vm4, %v6862_v26 }
 0x5f7   : > { %7629 = vmatprep.subr.bf16.mxu1 %v7628_v15 }
 0x5f9   : > { %6834 = vmatmul.mubr.msk.f32.gmra.mrb[96].mxu1 %vm3798_vm6, %v10147_v21  ;;  %v6885_v21 = vld [vmem:[%s11444_s5 + $0x2e8] sm:$0xff] }
 0x5fa   : > { %4360 = vmatprep.mubr.f32.mxu1 %v11493_v55 }
 0x5fd   : > { %6835 = vmatmul.mubr.msk.f32.gmra.mrb[98].mxu1 %vm3798_vm6, %v10166_v29  ;;  %v6887_v29 = vld [vmem:[%s11444_s5 + $0x2f8] sm:$0xff] }
 0x5fe   : > { %4366 = vmatprep.mubr.f32.mxu1 %v11493_v55 }
 0x601   : > { %6836 = vmatmul.mubr.msk.f32.gmra.mrb[100].mxu1 %vm3798_vm6, %v10185_v30  ;;  %v7630_v30 = vpack.c.bf16 %v6882_v17, %v6880_v56 }
 0x602   : > { %4372 = vmatprep.mubr.f32.mxu1 %v11493_v55 }
 0x605   : > { %6837 = vmatmul.mubr.msk.f32.gmra.mrb[102].mxu1 %vm3798_vm6, %v10204_v9  ;;  %v7632_v9 = vpack.c.bf16 %v6887_v29, %v6885_v21 }
 0x606   : > { %4378 = vmatprep.mubr.f32.mxu1 %v11493_v55 }
 0x609   : > { %6838 = vmatmul.mubr.msk.f32.gmra.mrb[104].mxu1 %vm3798_vm6, %v10223_v18  ;;  %v6884_v18 = vld [vmem:[%s11444_s5 + $0x2e0] sm:$0xff] }
 0x60a   : > { %4384 = vmatprep.mubr.f32.mxu1 %v11493_v55 }
 0x60d   : > { %6839 = vmatmul.mubr.msk.f32.gmra.mrb[106].mxu1 %vm3798_vm6, %v10242_v42  ;;  %v6886_v42 = vld [vmem:[%s11444_s5 + $0x2f0] sm:$0xff] }
 0x60e   : > { %4390 = vmatprep.mubr.f32.mxu1 %v11493_v55  ;;  %v7634_v61 = vpack.c.bf16 %v6886_v42, %v6884_v18 }
 0x611   : > { %6840 = vmatmul.mubr.msk.f32.gmra.mrb[108].mxu1 %vm3798_vm6, %v10261_v31  ;;  %v6889_v31 = vld [vmem:[%s11444_s5 + $0x308] sm:$0xff] }
 0x612   : > { %4396 = vmatprep.mubr.f32.mxu1 %v11493_v55 }
 0x615   : > { %6841 = vmatmul.mubr.msk.f32.gmra.mrb[110].mxu1 %vm3798_vm6, %v10266_v7  ;;  %v6891_v7 = vld [vmem:[%s11444_s5 + $0x318] sm:$0xff] }
 0x616   : > { %4583 = vmatprep.mubr.f32.mxu1 %v11493_v55  ;;  %v7636_v27 = vpack.c.bf16 %v6891_v7, %v6889_v31 }
 0x619   : > { %6866 = vmatmul.mubr.msk.f32.vlgmr.msra.gmra.mrb[84].mxu1 %vm3798_vm6, %v9990_v51  ;;  %v6895_v51 = vld [vmem:[%s11444_s5 + $0x338] sm:$0xff] }
 0x61a   : > { %4589 = vmatprep.mubr.f32.mxu1 %v11493_v55  ;;  %7631 = vmatpush1.bf16.msra.mxu1 %v7630_v30  ;;  %v7640_v13 = vpack.c.bf16 %v6895_v51, %v6893_v45 }
 0x61b   : > { %7633 = vmatprep.subr.bf16.mxu1 %v7632_v9 }
 0x61d   : > { %6867 = vmatmul.mubr.msk.f32.gmra.mrb[86].mxu1 %vm3798_vm6, %v10023_v32  ;;  %v6899_v32 = vld [vmem:[%s11444_s5 + $0x358] sm:$0xff] }
 0x61e   : > { %4595 = vmatprep.mubr.f32.mxu1 %v11493_v55  ;;  %7635 = vmatpush1.bf16.msra.mxu1 %v7634_v61  ;;  %v7644_v53 = vpack.c.bf16 %v6899_v32, %v6897_v2 }
 0x61f   : > { %7637 = vmatprep.subr.bf16.mxu1 %v7636_v27 }
 0x621   : > { %6868 = vmatmul.mubr.msk.f32.gmra.mrb[88].mxu1 %vm3798_vm6, %v10054_v48  ;;  %v7646_v48 = vpack.c.bf16 %v6898_v11, %v6896_v16 }
 0x622   : > { %4601 = vmatprep.mubr.f32.mxu1 %v11493_v55  ;;  %7639 = vmatpush1.bf16.msra.mxu1 %v7638_v50 }
 0x623   : > { %7641 = vmatprep.subr.bf16.mxu1 %v7640_v13 }
 0x625   : > { %6869 = vmatmul.mubr.msk.f32.gmra.mrb[90].mxu1 %vm3798_vm6, %v10079_v23  ;;  %v6900_v23 = vld [vmem:[%s11444_s5 + $0x360] sm:$0xf] }
 0x626   : > { %4607 = vmatprep.mubr.f32.mxu1 %v11493_v55  ;;  %7643 = vmatpush1.bf16.msra.mxu1 %v7642_v20 }
 0x627   : > { %7645 = vmatprep.subr.bf16.mxu1 %v7644_v53 }
 0x629   : > { %6870 = vmatmul.mubr.msk.f32.gmra.mrb[92].mxu1 %vm3798_vm6, %v10107_v36 }
 0x62a   : > { %4613 = vmatprep.mubr.f32.mxu1 %v11493_v55  ;;  %7647 = vmatpush1.bf16.msra.mxu1 %v7646_v48 }
 0x62b   : > { %6902 = vmatprep.subr.msk.mxu1 %vm2238_vm4, %v6901_v43 }
 0x62d   : > { %6871 = vmatmul.mubr.msk.f32.gmra.mrb[94].mxu1 %vm3798_vm6, %v10130_v24 }
 0x62e   : > { %4619 = vmatprep.mubr.f32.mxu1 %v11493_v55  ;;  %6903 = vmatpush1.msk.msra.mxu1 %vm2238_vm4, %v6900_v23 }
 0x631   : > { %6872 = vmatmul.mubr.msk.f32.gmra.mrb[96].mxu1 %vm3798_vm6, %v10150_v58 }
 0x632   : > { %4625 = vmatprep.mubr.f32.mxu1 %v11493_v55 }
 0x635   : > { %6873 = vmatmul.mubr.msk.f32.gmra.mrb[98].mxu1 %vm3798_vm6, %v10169_v52 }
 0x636   : > { %4631 = vmatprep.mubr.f32.mxu1 %v11493_v55 }
 0x639   : > { %6874 = vmatmul.mubr.msk.f32.gmra.mrb[100].mxu1 %vm3798_vm6, %v10188_v38 }
 0x63a   : > { %4637 = vmatprep.mubr.f32.mxu1 %v11493_v55 }
 0x63d   : > { %6875 = vmatmul.mubr.msk.f32.gmra.mrb[102].mxu1 %vm3798_vm6, %v10207_v46 }
 0x63e   : > { %4643 = vmatprep.mubr.f32.mxu1 %v11493_v55 }
 0x641   : > { %6876 = vmatmul.mubr.msk.f32.gmra.mrb[104].mxu1 %vm3798_vm6, %v10226_v6  ;;  %v11494_v6 = vld [vmem:[#allocation12_spill] sm:$0xff] }
 0x642   : > { %4649 = vmatprep.mubr.f32.mxu1 %v11493_v55 }
 0x645   : > { %6877 = vmatmul.mubr.msk.f32.gmra.mrb[106].mxu1 %vm3798_vm6, %v10245_v62  ;;  %v11496_v62 = vld [vmem:[#allocation14_spill] sm:$0xff] }
 0x646   : > { %4655 = vmatprep.mubr.f32.mxu1 %v11493_v55 }
 0x649   : > { %6878 = vmatmul.mubr.msk.f32.gmra.mrb[108].mxu1 %vm3798_vm6, %v10270_v59  ;;  %v11495_v59 = vld [vmem:[#allocation13_spill] sm:$0xff] }
 0x64a   : > { %4661 = vmatprep.mubr.f32.mxu1 %v11493_v55 }
 0x64d   : > { %6879 = vmatmul.mubr.msk.f32.gmra.mrb[110].mxu1 %vm3798_vm6, %v10275_v34 }
 0x64e   : > { %4848 = vmatprep.mubr.f32.mxu1 %v11493_v55 }
 0x651   : > { %6904 = vmatmul.mubr.msk.f32.vlgmr.msra.gmra.mrb[84].mxu1 %vm3798_vm6, %v9996_v19  ;;  %v11497_v19 = vld [vmem:[#allocation15_spill] sm:$0xff] }
 0x652   : > { %4854 = vmatprep.mubr.f32.mxu1 %v11493_v55 }
 0x655   : > { %6905 = vmatmul.mubr.msk.f32.gmra.mrb[86].mxu1 %vm3798_vm6, %v10027_v37  ;;  %v11498_v37 = vld [vmem:[#allocation11_spill] sm:$0xff] }
 0x656   : > { %4860 = vmatprep.mubr.f32.mxu1 %v11493_v55  ;;  %v11500_v36 = vsub.s32 1, %v11498_v37 }
 0x659   : > { %6906 = vmatmul.mubr.msk.f32.gmra.mrb[88].mxu1 %vm3798_vm6, %v10058_v4  ;;  %v11499_v4 = vsub.s32 0, %v11498_v37 }
 0x65a   : > { %4866 = vmatprep.mubr.f32.mxu1 %v11493_v55 }
 0x65d   : > { %6907 = vmatmul.mubr.msk.f32.gmra.mrb[90].mxu1 %vm3798_vm6, %v10083_v40 }
 0x65e   : > { %4872 = vmatprep.mubr.f32.mxu1 %v11493_v55 }
 0x661   : > { %6908 = vmatmul.mubr.msk.f32.gmra.mrb[92].mxu1 %vm3798_vm6, %v10111_v3 }
 0x662   : > { %4878 = vmatprep.mubr.f32.mxu1 %v11493_v55 }
 0x665   : > { %6909 = vmatmul.mubr.msk.f32.gmra.mrb[94].mxu1 %vm3798_vm6, %v10134_v25 }
 0x666   : > { %4884 = vmatprep.mubr.f32.mxu1 %v11493_v55 }
 0x669   : > { %6910 = vmatmul.mubr.msk.f32.gmra.mrb[96].mxu1 %vm3798_vm6, %v10154_v47 }
 0x66a   : > { %4890 = vmatprep.mubr.f32.mxu1 %v11493_v55 }
 0x66d   : > { %6911 = vmatmul.mubr.msk.f32.gmra.mrb[98].mxu1 %vm3798_vm6, %v10173_v8 }
 0x66e   : > { %4896 = vmatprep.mubr.f32.mxu1 %v11493_v55 }
 0x671   : > { %6912 = vmatmul.mubr.msk.f32.gmra.mrb[100].mxu1 %vm3798_vm6, %v10192_v0 }
 0x672   : > { %4902 = vmatprep.mubr.f32.mxu1 %v11493_v55 }
 0x675   : > { %6913 = vmatmul.mubr.msk.f32.gmra.mrb[102].mxu1 %vm3798_vm6, %v10211_v63  ;;  %v4961_v63 = vld [vmem:[%s11445_s6] sm:$0x3] }
 0x676   : > { %4908 = vmatprep.mubr.f32.mxu1 %v11493_v55  ;;  %v10659_v40 = vrot.slane %v4961_v63, %v11499_v4  ;;  %v10663_v3 = vrot.slane %v4961_v63, %v11500_v36 }
 0x679   : > { %6914 = vmatmul.mubr.msk.f32.gmra.mrb[104].mxu1 %vm3798_vm6, %v11494_v6 }
 0x67a   : > { %4914 = vmatprep.mubr.f32.mxu1 %v11493_v55 }
 0x67d   : > { %6915 = vmatmul.mubr.msk.f32.gmra.mrb[106].mxu1 %vm3798_vm6, %v11495_v59 }
 0x67e   : > { %4920 = vmatprep.mubr.f32.mxu1 %v11493_v55 }
 0x681   : > { %6916 = vmatmul.mubr.msk.f32.gmra.mrb[108].mxu1 %vm3798_vm6, %v11496_v62 }
 0x682   : > { %4926 = vmatprep.mubr.f32.mxu1 %v11493_v55 }
 0x685   : > { %6917 = vmatmul.mubr.msk.f32.gmra.mrb[110].mxu1 %vm3798_vm6, %v11497_v19 }
 0x686   : > { %5256 = vmatprep.mubr.f32.mxu1 %v11493_v55 }
 0x724   : > { %v4850_v24 = vpop.f32.mrb[84].mxu1 }
 0x725   : > { %v4973_v25 = vadd.f32 %v10659_v40, %v4850_v24  ;;  %v4852_v58 = vpop.f32.mrb[85].mxu1 }
 0x726   : > { %v4974_v47 = vadd.f32 %v10663_v3, %v4852_v58 }
 0x727   : > { %v5001_v8 = vmax.f32 %v4973_v25, 0.0 }
 0x728   : > { %v4856_v52 = vpop.f32.mrb[86].mxu1  ;;  %v5002_v46 = vmax.f32 %v4974_v47, 0.0 }
 0x729   : > { %v4975_v38 = vadd.f32 %v10659_v40, %v4856_v52  ;;  %v4858_v0 = vpop.f32.mrb[87].mxu1  ;;  %v10669_v41 = vrot.slane %v5001_v8, 1 }
 0x72a   : > { %v4976_v34 = vadd.f32 %v10663_v3, %v4858_v0  ;;  %v10672_v22 = vrot.slane %v5002_v46, 1 }
 0x72b   : > { %v5003_v35 = vmax.f32 %v4975_v38, 0.0 }
 0x72c   : > { %v5004_v54 = vmax.f32 %v4976_v34, 0.0  ;;  %v4862_v57 = vpop.f32.mrb[88].mxu1 }
 0x72d   : > { %v5058_v12 = vrot.slane %v5003_v35, 1  ;;  %v4977_v1 = vadd.f32 %v10659_v40, %v4862_v57  ;;  %v4864_v44 = vpop.f32.mrb[89].mxu1 }
 0x72e   : > { %v5061_v10 = vrot.slane %v5004_v54, 1  ;;  %v4978_v60 = vadd.f32 %v10663_v3, %v4864_v44 }
 0x72f   : > { %v5059_v5 = vsel %vm594_vm0, %v10669_v41, %v5058_v12  ;;  %v5005_v28 = vmax.f32 %v4977_v1, 0.0 }
 0x730   : > { %v5143_v26 = vmax.f32 %v5001_v8, %v5059_v5  ;;  %v5006_v15 = vmax.f32 %v4978_v60, 0.0  ;;  %v4868_v56 = vpop.f32.mrb[90].mxu1  ;;  %v5062_v17 = vsel %vm594_vm0, %v10672_v22, %v5061_v10 }
 0x731   : > { %v5063_v21 = vrot.slane %v5005_v28, 1  ;;  %v4979_v29 = vadd.f32 %v10659_v40, %v4868_v56  ;;  %v4870_v30 = vpop.f32.mrb[91].mxu1  ;;  %v5144_v9 = vmax.f32 %v5002_v46, %v5062_v17 }
 0x732   : > { %v5065_v18 = vrot.slane %v5006_v15, 1  ;;  %v4980_v42 = vadd.f32 %v10663_v3, %v4870_v30 }
 0x733   : > { %v5064_v31 = vsel %vm594_vm0, %v5058_v12, %v5063_v21  ;;  %v5007_v7 = vmax.f32 %v4979_v29, 0.0 }
 0x734   : > { %v5145_v61 = vmax.f32 %v5003_v35, %v5064_v31  ;;  %v5008_v27 = vmax.f32 %v4980_v42, 0.0  ;;  %v4874_v39 = vpop.f32.mrb[92].mxu1  ;;  %v5066_v33 = vsel %vm594_vm0, %v5061_v10, %v5065_v18 }
 0x735   : > { %v5067_v45 = vrot.slane %v5007_v7, 1  ;;  %v4981_v51 = vadd.f32 %v10659_v40, %v4874_v39  ;;  %v4876_v50 = vpop.f32.mrb[93].mxu1  ;;  %v5146_v13 = vmax.f32 %v5004_v54, %v5066_v33 }
 0x736   : > { %v5069_v49 = vrot.slane %v5008_v27, 1  ;;  %v4982_v14 = vadd.f32 %v10663_v3, %v4876_v50  ;;  %v7650_v2 = vpack.c.bf16 %v5145_v61, %v5143_v26 }
 0x737   : > { %v5068_v32 = vsel %vm594_vm0, %v5063_v21, %v5067_v45  ;;  %v5009_v20 = vmax.f32 %v4981_v51, 0.0  ;;  %v7648_v53 = vpack.c.bf16 %v5146_v13, %v5144_v9 }
 0x738   : > { %v5147_v16 = vmax.f32 %v5005_v28, %v5068_v32  ;;  %v5010_v11 = vmax.f32 %v4982_v14, 0.0  ;;  %v4880_v48 = vpop.f32.mrb[94].mxu1  ;;  %v5070_v43 = vsel %vm594_vm0, %v5065_v18, %v5069_v49 }
 0x739   : > { %v5071_v23 = vrot.slane %v5009_v20, 1  ;;  %v4983_v6 = vadd.f32 %v10659_v40, %v4880_v48  ;;  %v4882_v59 = vpop.f32.mrb[95].mxu1  ;;  %7649 = vmatprep.subr.bf16.mxu1 %v7648_v53  ;;  %v5148_v62 = vmax.f32 %v5006_v15, %v5070_v43 }
 0x73a   : > { %v5073_v19 = vrot.slane %v5010_v11, 1  ;;  %v4984_v63 = vadd.f32 %v10663_v3, %v4882_v59  ;;  %7651 = vmatpush1.bf16.msra.mxu1 %v7650_v2 }
 0x73b   : > { %v5072_v37 = vsel %vm594_vm0, %v5067_v45, %v5071_v23  ;;  %v5011_v4 = vmax.f32 %v4983_v6, 0.0 }
 0x73c   : > { %v5149_v36 = vmax.f32 %v5007_v7, %v5072_v37  ;;  %v5012_v24 = vmax.f32 %v4984_v63, 0.0  ;;  %v4886_v25 = vpop.f32.mrb[96].mxu1  ;;  %v5074_v58 = vsel %vm594_vm0, %v5069_v49, %v5073_v19 }
 0x73d   : > { %v5075_v47 = vrot.slane %v5011_v4, 1  ;;  %v4985_v52 = vadd.f32 %v10659_v40, %v4886_v25  ;;  %v4888_v8 = vpop.f32.mrb[97].mxu1  ;;  %v5150_v38 = vmax.f32 %v5008_v27, %v5074_v58 }
 0x73e   : > { %v5077_v0 = vrot.slane %v5012_v24, 1  ;;  %v4986_v46 = vadd.f32 %v10663_v3, %v4888_v8  ;;  %v7654_v34 = vpack.c.bf16 %v5149_v36, %v5147_v16 }
 0x73f   : > { %v5076_v35 = vsel %vm594_vm0, %v5071_v23, %v5075_v47  ;;  %v5013_v54 = vmax.f32 %v4985_v52, 0.0  ;;  %v7652_v57 = vpack.c.bf16 %v5150_v38, %v5148_v62 }
 0x740   : > { %v5151_v12 = vmax.f32 %v5009_v20, %v5076_v35  ;;  %v5014_v1 = vmax.f32 %v4986_v46, 0.0  ;;  %v4892_v44 = vpop.f32.mrb[98].mxu1  ;;  %v5078_v10 = vsel %vm594_vm0, %v5073_v19, %v5077_v0 }
 0x741   : > { %v5079_v60 = vrot.slane %v5013_v54, 1  ;;  %v4987_v5 = vadd.f32 %v10659_v40, %v4892_v44  ;;  %v4894_v28 = vpop.f32.mrb[99].mxu1  ;;  %7653 = vmatprep.subr.bf16.mxu1 %v7652_v57  ;;  %v5152_v26 = vmax.f32 %v5010_v11, %v5078_v10 }
 0x742   : > { %v5081_v15 = vrot.slane %v5014_v1, 1  ;;  %v4988_v56 = vadd.f32 %v10663_v3, %v4894_v28  ;;  %7655 = vmatpush1.bf16.msra.mxu1 %v7654_v34 }
 0x743   : > { %v5080_v17 = vsel %vm594_vm0, %v5075_v47, %v5079_v60  ;;  %v5015_v21 = vmax.f32 %v4987_v5, 0.0 }
 0x744   : > { %v5153_v29 = vmax.f32 %v5011_v4, %v5080_v17  ;;  %v5016_v30 = vmax.f32 %v4988_v56, 0.0  ;;  %v4898_v9 = vpop.f32.mrb[100].mxu1  ;;  %v5082_v18 = vsel %vm594_vm0, %v5077_v0, %v5081_v15 }
 0x745   : > { %v5083_v42 = vrot.slane %v5015_v21, 1  ;;  %v4989_v31 = vadd.f32 %v10659_v40, %v4898_v9  ;;  %v4900_v7 = vpop.f32.mrb[101].mxu1  ;;  %v5154_v61 = vmax.f32 %v5012_v24, %v5082_v18 }
 0x746   : > { %v5085_v27 = vrot.slane %v5016_v30, 1  ;;  %v4990_v39 = vadd.f32 %v10663_v3, %v4900_v7  ;;  %v7658_v33 = vpack.c.bf16 %v5153_v29, %v5151_v12 }
 0x747   : > { %v5084_v45 = vsel %vm594_vm0, %v5079_v60, %v5083_v42  ;;  %v5017_v51 = vmax.f32 %v4989_v31, 0.0  ;;  %v7656_v50 = vpack.c.bf16 %v5154_v61, %v5152_v26 }
 0x748   : > { %v5155_v13 = vmax.f32 %v5013_v54, %v5084_v45  ;;  %v5018_v49 = vmax.f32 %v4990_v39, 0.0  ;;  %v4904_v14 = vpop.f32.mrb[102].mxu1  ;;  %v5086_v2 = vsel %vm594_vm0, %v5081_v15, %v5085_v27 }
 0x749   : > { %v5087_v32 = vrot.slane %v5017_v51, 1  ;;  %v4991_v20 = vadd.f32 %v10659_v40, %v4904_v14  ;;  %v4906_v53 = vpop.f32.mrb[103].mxu1  ;;  %7657 = vmatprep.subr.bf16.mxu1 %v7656_v50  ;;  %v5156_v16 = vmax.f32 %v5014_v1, %v5086_v2 }
 0x74a   : > { %v5089_v11 = vrot.slane %v5018_v49, 1  ;;  %v4992_v48 = vadd.f32 %v10663_v3, %v4906_v53  ;;  %7659 = vmatpush1.bf16.msra.mxu1 %v7658_v33 }
 0x74b   : > { %v5088_v43 = vsel %vm594_vm0, %v5083_v42, %v5087_v32  ;;  %v5019_v23 = vmax.f32 %v4991_v20, 0.0 }
 0x74c   : > { %v5157_v6 = vmax.f32 %v5015_v21, %v5088_v43  ;;  %v5020_v59 = vmax.f32 %v4992_v48, 0.0  ;;  %v4910_v62 = vpop.f32.mrb[104].mxu1  ;;  %v5090_v19 = vsel %vm594_vm0, %v5085_v27, %v5089_v11 }
 0x74d   : > { %v5091_v63 = vrot.slane %v5019_v23, 1  ;;  %v4993_v37 = vadd.f32 %v10659_v40, %v4910_v62  ;;  %v4912_v4 = vpop.f32.mrb[105].mxu1  ;;  %v5158_v36 = vmax.f32 %v5016_v30, %v5090_v19 }
 0x74e   : > { %v5093_v24 = vrot.slane %v5020_v59, 1  ;;  %v4994_v25 = vadd.f32 %v10663_v3, %v4912_v4  ;;  %v7662_v58 = vpack.c.bf16 %v5157_v6, %v5155_v13 }
 0x74f   : > { %v5092_v47 = vsel %vm594_vm0, %v5087_v32, %v5091_v63  ;;  %v5021_v52 = vmax.f32 %v4993_v37, 0.0  ;;  %v7660_v8 = vpack.c.bf16 %v5158_v36, %v5156_v16 }
 0x750   : > { %v5159_v38 = vmax.f32 %v5017_v51, %v5092_v47  ;;  %v5022_v0 = vmax.f32 %v4994_v25, 0.0  ;;  %v4916_v46 = vpop.f32.mrb[106].mxu1  ;;  %v5094_v34 = vsel %vm594_vm0, %v5089_v11, %v5093_v24  ;;  %v5287_v25 = vld [vmem:[%s11447_s8] sm:$0xff]  ;;  %v11501_v47 = vmov 0.0|0.0  }
 0x751   : > { %v5095_v35 = vrot.slane %v5021_v52, 1  ;;  %v4995_v54 = vadd.f32 %v10659_v40, %v4916_v46  ;;  %v4918_v57 = vpop.f32.mrb[107].mxu1  ;;  %7661 = vmatprep.subr.bf16.mxu1 %v7660_v8  ;;  %v5160_v12 = vmax.f32 %v5018_v49, %v5094_v34  ;;  %v5290_v8 = vld [vmem:[%s11447_s8 + $0x18] sm:$0xff]  ;;  %v5291_v46 = vld [vmem:[%s11447_s8 + $0x20] sm:$0xff]  ;;  %v5292_v34 = vld [vmem:[%s11447_s8 + $0x28] sm:$0xff] }
 0x752   : > { %v5097_v1 = vrot.slane %v5022_v0, 1  ;;  %v4996_v44 = vadd.f32 %v10663_v3, %v4918_v57  ;;  %7663 = vmatpush1.bf16.msra.mxu1 %v7662_v58  ;;  %v5293_v57 = vld [vmem:[%s11447_s8 + $0x30] sm:$0xff] }
 0x753   : > { %v5096_v10 = vsel %vm594_vm0, %v5091_v63, %v5095_v35  ;;  %v5023_v60 = vmax.f32 %v4995_v54, 0.0  ;;  %v7683_v54 = vpack.c.bf16 %v5292_v34, %v5291_v46  ;;  %v6945_v46 = vld [vmem:[%s11447_s8 + $0x128] sm:$0xff] }
 0x754   : > { %v5161_v5 = vmax.f32 %v5019_v23, %v5096_v10  ;;  %v5024_v28 = vmax.f32 %v4996_v44, 0.0  ;;  %v4922_v26 = vpop.f32.mrb[108].mxu1  ;;  %v5098_v15 = vsel %vm594_vm0, %v5093_v24, %v5097_v1  ;;  %v5295_v10 = vld [vmem:[%s11447_s8 + $0x40] sm:$0xff] }
 0x755   : > { %v5099_v56 = vrot.slane %v5023_v60, 1  ;;  %v4997_v17 = vadd.f32 %v10659_v40, %v4922_v26  ;;  %v4924_v21 = vpop.f32.mrb[109].mxu1  ;;  %v5162_v29 = vmax.f32 %v5020_v59, %v5098_v15  ;;  %v5297_v26 = vld [vmem:[%s11447_s8 + $0x50] sm:$0xff]  ;;  %v5298_v15 = vld [vmem:[%s11447_s8 + $0x58] sm:$0xff] }
 0x756   : > { %v5101_v30 = vrot.slane %v5024_v28, 1  ;;  %v4998_v9 = vadd.f32 %v10663_v3, %v4924_v21  ;;  %v7666_v18 = vpack.c.bf16 %v5161_v5, %v5159_v38  ;;  %v5172_v38 = vld [vmem:[%s11446_s7 + $0x8] sm:$0xff]  ;;  %v5175_v5 = vld [vmem:[%s11446_s7 + $0x20] sm:$0xff] }
 0x757   : > { %v5100_v42 = vsel %vm594_vm0, %v5095_v35, %v5099_v56  ;;  %v5025_v31 = vmax.f32 %v4997_v17, 0.0  ;;  %v7664_v7 = vpack.c.bf16 %v5162_v29, %v5160_v12  ;;  %v5173_v35 = vld [vmem:[%s11446_s7 + $0x10] sm:$0xff]  ;;  %v5294_v12 = vld [vmem:[%s11447_s8 + $0x38] sm:$0xff]  ;;  %v5299_v17 = vld [vmem:[%s11447_s8 + $0x60] sm:$0xff] }
 0x758   : > { %v5163_v61 = vmax.f32 %v5021_v52, %v5100_v42  ;;  %v5026_v27 = vmax.f32 %v4998_v9, 0.0  ;;  %v4928_v39 = vpop.f32.mrb[110].mxu1  ;;  %v5102_v33 = vsel %vm594_vm0, %v5097_v1, %v5101_v30  ;;  %v5289_v52 = vld [vmem:[%s11447_s8 + $0x10] sm:$0xff]  ;;  %v5174_v1 = vld [vmem:[%s11446_s7 + $0x18] sm:$0xff]  ;;  %v7686_v44 = vpack.c.bf16 %v5294_v12, %v5293_v57  ;;  %v5300_v21 = vld [vmem:[%s11447_s8 + $0x68] sm:$0xff] }
 0x759   : > { %v5103_v45 = vrot.slane %v5025_v31, 1  ;;  %v4999_v51 = vadd.f32 %v10659_v40, %v4928_v39  ;;  %v4930_v50 = vpop.f32.mrb[111].mxu1  ;;  %7665 = vmatprep.subr.bf16.mxu1 %v7664_v7  ;;  %v5164_v13 = vmax.f32 %v5022_v0, %v5102_v33  ;;  %v7680_v0 = vpack.c.bf16 %v5290_v8, %v5289_v52  ;;  %v5302_v9 = vld [vmem:[%s11447_s8 + $0x78] sm:$0xff]  ;;  %v5303_v42 = vld [vmem:[%s11447_s8 + $0x80] sm:$0xff]  ;;  %v6942_v52 = vld [vmem:[%s11447_s8 + $0x110] sm:$0xff] }
 0x75a   : > { %v5105_v49 = vrot.slane %v5026_v27, 1  ;;  %v5000_v14 = vadd.f32 %v10663_v3, %v4930_v50  ;;  %7667 = vmatpush1.bf16.msra.mxu1 %v7666_v18  ;;  %v7695_v29 = vpack.c.bf16 %v5300_v21, %v5299_v17  ;;  %v6928_v33 = vld [vmem:[%s11447_s8 + $0xa0] sm:$0xff]  ;;  %v6943_v8 = vld [vmem:[%s11447_s8 + $0x118] sm:$0xff]  ;;  %v6953_v12 = vld [vmem:[%s11449_s10 + $0x50] sm:$0xff] }
 0x75b   : > { %v5104_v2 = vsel %vm594_vm0, %v5099_v56, %v5103_v45  ;;  %v5027_v32 = vmax.f32 %v4999_v51, 0.0  ;;  %v7692_v56 = vpack.c.bf16 %v5298_v15, %v5297_v26  ;;  %v6958_v26 = vld [vmem:[%s11449_s10 + $0x78] sm:$0xff]  ;;  %v6960_v17 = vld [vmem:[%s11449_s10 + $0x88] sm:$0xff] }
 0x75c   : > { %v5165_v20 = vmax.f32 %v5023_v60, %v5104_v2  ;;  %v5028_v53 = vmax.f32 %v5000_v14, 0.0  ;;  %v5106_v16 = vsel %vm594_vm0, %v5101_v30, %v5105_v49  ;;  %v5296_v60 = vld [vmem:[%s11447_s8 + $0x48] sm:$0xff]  ;;  %v5301_v30 = vld [vmem:[%s11447_s8 + $0x70] sm:$0xff]  ;;  %v6931_v14 = vld [vmem:[%s11447_s8 + $0xb8] sm:$0xff] }
 0x75d   : > { %v5107_v11 = vrot.slane %v5027_v32, 1  ;;  %v5166_v48 = vmax.f32 %v5024_v28, %v5106_v16  ;;  %v7689_v28 = vpack.c.bf16 %v5296_v60, %v5295_v10  ;;  %v7698_v18 = vpack.c.bf16 %v5302_v9, %v5301_v30  ;;  %v6933_v16 = vld [vmem:[%s11447_s8 + $0xc8] sm:$0xff]  ;;  %v6955_v10 = vld [vmem:[%s11449_s10 + $0x60] sm:$0xff]  ;;  %v6962_v30 = vld [vmem:[%s11449_s10 + $0x98] sm:$0xff] }
 0x75e   : > { %v5109_v43 = vrot.slane %v5028_v53, 1  ;;  %v7670_v23 = vpack.c.bf16 %v5165_v20, %v5163_v61  ;;  %v5305_v61 = vld [vmem:[%s11447_s8 + $0x90] sm:$0xff]  ;;  %v6956_v60 = vld [vmem:[%s11449_s10 + $0x68] sm:$0xff] }
 0x75f   : > { %v5108_v40 = vsel %vm594_vm0, %v5103_v45, %v5107_v11  ;;  %v5141_v6 = vsel %vm594_vm0, %v5107_v11, %v10669_v41  ;;  %v7668_v59 = vpack.c.bf16 %v5166_v48, %v5164_v13  ;;  %v5288_v41 = vld [vmem:[%s11447_s8 + $0x8] sm:$0xff] }
 0x760   : > { %v5167_v62 = vmax.f32 %v5025_v31, %v5108_v40  ;;  %v5169_v3 = vmax.f32 %v5027_v32, %v5141_v6  ;;  %v5142_v19 = vsel %vm594_vm0, %v5109_v43, %v10672_v22  ;;  %v5110_v63 = vsel %vm594_vm0, %v5105_v49, %v5109_v43  ;;  %v5171_v22 = vld [vmem:[%s11446_s7] sm:$0xff]  ;;  %v5304_v31 = vld [vmem:[%s11447_s8 + $0x88] sm:$0xff]  ;;  %v6930_v49 = vld [vmem:[%s11447_s8 + $0xb0] sm:$0xff] }
 0x761   : > { %v5170_v37 = vmax.f32 %v5028_v53, %v5142_v19  ;;  %7669 = vmatprep.subr.bf16.mxu1 %v7668_v59  ;;  %v5168_v4 = vmax.f32 %v5026_v27, %v5110_v63  ;;  %v7677_v58 = vpack.c.bf16 %v5288_v41, %v5287_v25  ;;  %v7701_v7 = vpack.c.bf16 %v5304_v31, %v5303_v42  ;;  %v5306_v27 = vld [vmem:[%s11447_s8 + $0x98] sm:$0xff]  ;;  %v6929_v45 = vld [vmem:[%s11447_s8 + $0xa8] sm:$0xff]  ;;  %v6932_v53 = vld [vmem:[%s11447_s8 + $0xc0] sm:$0xff] }
 0x762   : > { %v7674_v36 = vpack.c.bf16 %v5169_v3, %v5167_v62  ;;  %7671 = vmatpush1.bf16.msra.mxu1 %v7670_v23  ;;  %v7704_v39 = vpack.c.bf16 %v5306_v27, %v5305_v61  ;;  %v7707_v50 = vpack.c.bf16 %v6929_v45, %v6928_v33  ;;  %v7710_v32 = vpack.c.bf16 %v6931_v14, %v6930_v49  ;;  %v6934_v23 = vld [vmem:[%s11447_s8 + $0xd0] sm:$0xff]  ;;  %v6935_v40 = vld [vmem:[%s11447_s8 + $0xd8] sm:$0xff]  ;;  %v6936_v3 = vld [vmem:[%s11447_s8 + $0xe0] sm:$0xff] }
 0x763   : > { %v7672_v24 = vpack.c.bf16 %v5170_v37, %v5168_v4  ;;  %v7713_v48 = vpack.c.bf16 %v6933_v16, %v6932_v53  ;;  %v7716_v59 = vpack.c.bf16 %v6935_v40, %v6934_v23  ;;  %v6937_v19 = vld [vmem:[%s11447_s8 + $0xe8] sm:$0xff]  ;;  %v6940_v41 = vld [vmem:[%s11447_s8 + $0x100] sm:$0xff]  ;;  %v5530_v40 = vld [vmem:[%s11449_s10 + $0x10] sm:$0xff] }
 0x764   : > { %v7719_v37 = vpack.c.bf16 %v6937_v19, %v6936_v3  ;;  %v5528_v14 = vld [vmem:[%s11449_s10] sm:$0xff] }
 0x765   : > { %7673 = vmatprep.subr.bf16.mxu1 %v7672_v24  ;;  %v6939_v24 = vld [vmem:[%s11447_s8 + $0xf8] sm:$0xff] }
 0x766   : > { %7675 = vmatpush1.bf16.msra.mxu1 %v7674_v36  ;;  %v6938_v36 = vld [vmem:[%s11447_s8 + $0xf0] sm:$0xff] }
 0x767   : > { %7676 = vmatprep.subr.bf16.mxu1 %v11501_v47  ;;  %v7722_v25 = vpack.c.bf16 %v6939_v24, %v6938_v36 }
 0x769   : > { %6918 = vmatmul.mubr.msk.f32.vlgmr.msra.gmra.mrb[112].mxu1 %vm5176_vm7, %v5171_v22  ;;  %v6941_v22 = vld [vmem:[%s11447_s8 + $0x108] sm:$0xff] }
 0x76a   : > { %5262 = vmatprep.mubr.f32.mxu1 %v11493_v55  ;;  %7678 = vmatpush1.bf16.msra.mxu1 %v7677_v58  ;;  %v7725_v58 = vpack.c.bf16 %v6941_v22, %v6940_v41 }
 0x76b   : > { %7679 = vmatprep.subr.bf16.mxu1 %v11501_v47 }
 0x76d   : > { %6919 = vmatmul.mubr.msk.f32.gmra.mrb[114].mxu1 %vm5176_vm7, %v5172_v38  ;;  %v7728_v38 = vpack.c.bf16 %v6943_v8, %v6942_v52  ;;  %v5532_v52 = vld [vmem:[%s11449_s10 + $0x20] sm:$0xff]  ;;  %v5533_v8 = vld [vmem:[%s11449_s10 + $0x28] sm:$0xff] }
 0x76e   : > { %5268 = vmatprep.mubr.f32.mxu1 %v11493_v55  ;;  %7681 = vmatpush1.bf16.msra.mxu1 %v7680_v0  ;;  %v6944_v0 = vld [vmem:[%s11447_s8 + $0x120] sm:$0xff] }
 0x76f   : > { %7682 = vmatprep.subr.bf16.mxu1 %v11501_v47  ;;  %v7731_v34 = vpack.c.bf16 %v6945_v46, %v6944_v0 }
 0x771   : > { %6920 = vmatmul.mubr.msk.f32.gmra.mrb[116].mxu1 %vm5176_vm7, %v5173_v35  ;;  %v6946_v35 = vld [vmem:[%s11447_s8 + $0x130] sm:$0xff] }
 0x772   : > { %5274 = vmatprep.mubr.f32.mxu1 %v11493_v55  ;;  %7684 = vmatpush1.bf16.msra.mxu1 %v7683_v54  ;;  %v6947_v54 = vld [vmem:[%s11447_s8 + $0x138] sm:$0xff] }
 0x773   : > { %7685 = vmatprep.subr.bf16.mxu1 %v11501_v47  ;;  %v7734_v57 = vpack.c.bf16 %v6947_v54, %v6946_v35 }
 0x775   : > { %6921 = vmatmul.mubr.msk.f32.gmra.mrb[118].mxu1 %vm5176_vm7, %v5174_v1  ;;  %v6954_v1 = vld [vmem:[%s11449_s10 + $0x58] sm:$0xff] }
 0x776   : > { %5280 = vmatprep.mubr.f32.mxu1 %v11493_v55  ;;  %7687 = vmatpush1.bf16.msra.mxu1 %v7686_v44  ;;  %v7737_v44 = vpack.c.bf16 %v6954_v1, %v6953_v12 }
 0x777   : > { %7688 = vmatprep.subr.bf16.mxu1 %v11501_v47 }
 0x779   : > { %6922 = vmatmul.mubr.msk.f32.gmra.mrb[120].mxu1 %vm5176_vm7, %v5175_v5  ;;  %v6957_v5 = vld [vmem:[%s11449_s10 + $0x70] sm:$0xff] }
 0x77a   : > { %7690 = vmatpush1.bf16.msra.mxu1 %v7689_v28  ;;  %v7740_v28 = vpack.c.bf16 %v6956_v60, %v6955_v10  ;;  %v7743_v15 = vpack.c.bf16 %v6958_v26, %v6957_v5  ;;  %v5534_v5 = vld [vmem:[%s11449_s10 + $0x30] sm:$0xff] }
 0x77b   : > { %7691 = vmatprep.subr.bf16.mxu1 %v11501_v47 }
 0x77e   : > { %7693 = vmatpush1.bf16.msra.mxu1 %v7692_v56  ;;  %v6959_v56 = vld [vmem:[%s11449_s10 + $0x80] sm:$0xff] }
 0x77f   : > { %7694 = vmatprep.subr.bf16.mxu1 %v11501_v47  ;;  %v7746_v21 = vpack.c.bf16 %v6960_v17, %v6959_v56 }
 0x782   : > { %7696 = vmatpush1.bf16.msra.mxu1 %v7695_v29  ;;  %v6961_v29 = vld [vmem:[%s11449_s10 + $0x90] sm:$0xff] }
 0x783   : > { %7697 = vmatprep.subr.bf16.mxu1 %v11501_v47  ;;  %v7749_v9 = vpack.c.bf16 %v6962_v30, %v6961_v29 }
 0x786   : > { %7699 = vmatpush1.bf16.msra.mxu1 %v7698_v18 }
 0x787   : > { %7700 = vmatprep.subr.bf16.mxu1 %v11501_v47 }
 0x78a   : > { %7702 = vmatpush1.bf16.msra.mxu1 %v7701_v7 }
 0x78b   : > { %7703 = vmatprep.subr.bf16.mxu1 %v11501_v47 }
 0x78e   : > { %7705 = vmatpush1.bf16.msra.mxu1 %v7704_v39 }
 0x78f   : > { %7706 = vmatprep.subr.bf16.mxu1 %v11501_v47 }
 0x83c   : > { %v10830_v51 = vpop.f32.mrb[112].mxu1 }
 0x83d   : > { %v5260_v13 = vpop.f32.mrb[113].mxu1 }
 0x83e   : > { %6923 = vmatprep.mubr.msk.f32.mxu1 %vm670_vm1, %v5260_v13 }
 0x83f   : > { %5387 = vmatmul.mubr.f32.vlgmr.msra.gmra.mrb[122].mxu1 %v10830_v51 }
 0x840   : > { %7708 = vmatpush1.bf16.msra.mxu1 %v7707_v50  ;;  %v10840_v2 = vpop.f32.mrb[114].mxu1 }
 0x841   : > { %v5266_v20 = vpop.f32.mrb[115].mxu1  ;;  %7709 = vmatprep.subr.bf16.mxu1 %v11501_v47 }
 0x842   : > { %6924 = vmatprep.mubr.msk.f32.mxu1 %vm670_vm1, %v5266_v20 }
 0x843   : > { %5392 = vmatmul.mubr.f32.gmra.mrb[124].mxu1 %v10840_v2 }
 0x844   : > { %7711 = vmatpush1.bf16.msra.mxu1 %v7710_v32  ;;  %v5270_v11 = vpop.f32.mrb[116].mxu1 }
 0x845   : > { %v5272_v43 = vpop.f32.mrb[117].mxu1  ;;  %7712 = vmatprep.subr.bf16.mxu1 %v11501_v47 }
 0x846   : > { %6925 = vmatprep.mubr.msk.f32.mxu1 %vm670_vm1, %v5272_v43 }
 0x847   : > { %5397 = vmatmul.mubr.f32.gmra.mrb[126].mxu1 %v5270_v11 }
 0x848   : > { %7714 = vmatpush1.bf16.msra.mxu1 %v7713_v48  ;;  %v5276_v6 = vpop.f32.mrb[118].mxu1 }
 0x849   : > { %v5278_v62 = vpop.f32.mrb[119].mxu1  ;;  %7715 = vmatprep.subr.bf16.mxu1 %v11501_v47 }
 0x84a   : > { %6926 = vmatprep.mubr.msk.f32.mxu1 %vm670_vm1, %v5278_v62 }
 0x84b   : > { %5402 = vmatmul.mubr.f32.gmra.mrb[128].mxu1 %v5276_v6 }
 0x84c   : > { %7717 = vmatpush1.bf16.msra.mxu1 %v7716_v59  ;;  %v5282_v63 = vpop.f32.mrb[120].mxu1 }
 0x84d   : > { %v5284_v4 = vpop.f32.mrb[121].mxu1  ;;  %7718 = vmatprep.subr.bf16.mxu1 %v11501_v47 }
 0x84e   : > { %6927 = vmatprep.mubr.msk.f32.mxu1 %vm670_vm1, %v5284_v4 }
 0x84f   : > { %5407 = vmatmul.mubr.f32.gmra.mrb[130].mxu1 %v5282_v63 }
 0x850   : > { %7720 = vmatpush1.bf16.msra.mxu1 %v7719_v37  ;;  %6948 = vmatprep.mubr.msk.f32.mxu1 %vm670_vm1, %v5260_v13 }
 0x851   : > { %7721 = vmatprep.subr.bf16.mxu1 %v11501_v47 }
 0x854   : > { %7723 = vmatpush1.bf16.msra.mxu1 %v7722_v25 }
 0x855   : > { %7724 = vmatprep.subr.bf16.mxu1 %v11501_v47 }
 0x858   : > { %7726 = vmatpush1.bf16.msra.mxu1 %v7725_v58 }
 0x859   : > { %7727 = vmatprep.subr.bf16.mxu1 %v11501_v47 }
 0x85c   : > { %7729 = vmatpush1.bf16.msra.mxu1 %v7728_v38 }
 0x85d   : > { %7730 = vmatprep.subr.bf16.mxu1 %v11501_v47 }
 0x860   : > { %7732 = vmatpush1.bf16.msra.mxu1 %v7731_v34 }
 0x861   : > { %7733 = vmatprep.subr.bf16.mxu1 %v11501_v47 }
 0x864   : > { %7735 = vmatpush1.bf16.msra.mxu1 %v7734_v57 }
 0x865   : > { %7736 = vmatprep.subr.bf16.mxu1 %v11501_v47 }
 0x867   : > { %5498 = vmatmul.mubr.f32.vlgmr.msra.gmra.mrb[132].mxu1 %v10830_v51 }
 0x868   : > { %6949 = vmatprep.mubr.msk.f32.mxu1 %vm670_vm1, %v5266_v20  ;;  %7738 = vmatpush3.bf16.msra.mxu1 %v7737_v44  ;;  %v7758_v44 = vpack.c.bf16 %v5533_v8, %v5532_v52  ;;  %v6990_v8 = vld [vmem:[%s11449_s10 + $0x100] sm:$0xff] }
 0x869   : > { %7739 = vmatprep.subr.bf16.mxu1 %v11501_v47 }
 0x86b   : > { %5503 = vmatmul.mubr.f32.gmra.mrb[134].mxu1 %v10840_v2  ;;  %v5529_v2 = vld [vmem:[%s11449_s10 + $0x8] sm:$0xff] }
 0x86c   : > { %6950 = vmatprep.mubr.msk.f32.mxu1 %vm670_vm1, %v5272_v43  ;;  %7741 = vmatpush3.bf16.msra.mxu1 %v7740_v28  ;;  %v5535_v28 = vld [vmem:[%s11449_s10 + $0x38] sm:$0xff] }
 0x86d   : > { %7742 = vmatprep.subr.bf16.mxu1 %v11501_v47 }
 0x86f   : > { %5508 = vmatmul.mubr.f32.gmra.mrb[136].mxu1 %v5270_v11  ;;  %v7752_v11 = vpack.c.bf16 %v5529_v2, %v5528_v14 }
 0x870   : > { %6951 = vmatprep.mubr.msk.f32.mxu1 %vm670_vm1, %v5278_v62  ;;  %7744 = vmatpush3.bf16.msra.mxu1 %v7743_v15 }
 0x871   : > { %7745 = vmatprep.subr.bf16.mxu1 %v11501_v47 }
 0x873   : > { %5513 = vmatmul.mubr.f32.gmra.mrb[138].mxu1 %v5276_v6  ;;  %v5531_v6 = vld [vmem:[%s11449_s10 + $0x18] sm:$0xff] }
 0x874   : > { %6952 = vmatprep.mubr.msk.f32.mxu1 %vm670_vm1, %v5284_v4  ;;  %7747 = vmatpush3.bf16.msra.mxu1 %v7746_v21  ;;  %v7755_v41 = vpack.c.bf16 %v5531_v6, %v5530_v40  ;;  %v6975_v40 = vld [vmem:[%s11449_s10 + $0xb0] sm:$0xff]  ;;  %v6976_v6 = vld [vmem:[%s11449_s10 + $0xb8] sm:$0xff] }
 0x875   : > { %7748 = vmatprep.subr.bf16.mxu1 %v11501_v47 }
 0x877   : > { %5518 = vmatmul.mubr.f32.gmra.mrb[140].mxu1 %v5282_v63 }
 0x878   : > { %7750 = vmatpush3.bf16.msra.mxu1 %v7749_v9  ;;  %7158 = vmatprep.mubr.msk.f32.mxu1 %vm8392_vm8, %v11493_v55 }
 0x879   : > { %7751 = vmatprep.subr.bf16.mxu1 %v11501_v47 }
 0x912   : > { %v5388_v18 = vpop.f32.mrb[122].mxu1 }
 0x913   : > { %v5390_v42 = vpop.f32.mrb[123].mxu1 }
 0x914   : > { %v7761_v42 = vpack.c.bf16 %v5535_v28, %v5534_v5  ;;  %v7003_v5 = vld [vmem:[%s11449_s10 + $0x140] sm:$0xff]  ;;  %v7004_v28 = vld [vmem:[%s11449_s10 + $0x148] sm:$0xff] }
 0x916   : > { %v5393_v31 = vpop.f32.mrb[124].mxu1 }
 0x917   : > { %v5395_v7 = vpop.f32.mrb[125].mxu1 }
 0x91a   : > { %v5398_v61 = vpop.f32.mrb[126].mxu1 }
 0x91b   : > { %v5400_v27 = vpop.f32.mrb[127].mxu1 }
 0x91e   : > { %v5403_v39 = vpop.f32.mrb[128].mxu1 }
 0x91f   : > { %v5405_v33 = vpop.f32.mrb[129].mxu1 }
 0x920   : > { %v5536_v33 = vld [vmem:[%s11449_s10 + $0x40] sm:$0xff] }
 0x922   : > { %v5408_v45 = vpop.f32.mrb[130].mxu1 }
 0x923   : > { %v5410_v51 = vpop.f32.mrb[131].mxu1 }
 0x93a   : > { %v5499_v50 = vpop.f32.mrb[132].mxu1 }
 0x93b   : > { %v10951_v13 = vmax.f32 %v5388_v18, %v5499_v50  ;;  %v5501_v49 = vpop.f32.mrb[133].mxu1 }
 0x93d   : > { %v5543_v16 = vrot.slane %v10951_v13, 1  ;;  %v5768_v48 = vrot.slane %v10951_v13, 2  ;;  %v5897_v43 = vrot.slane %v10951_v13, 3  ;;  %v6026_v63 = vrot.slane %v10951_v13, 4 }
 0x93e   : > { %v5504_v32 = vpop.f32.mrb[134].mxu1 }
 0x93f   : > { %v10959_v20 = vmax.f32 %v5393_v31, %v5504_v32  ;;  %v5506_v53 = vpop.f32.mrb[135].mxu1 }
 0x941   : > { %v5544_v23 = vrot.slane %v10959_v20, 1  ;;  %v5769_v59 = vrot.slane %v10959_v20, 2  ;;  %v5898_v62 = vrot.slane %v10959_v20, 3  ;;  %v6027_v3 = vrot.slane %v10959_v20, 4 }
 0x942   : > { %v5509_v19 = vpop.f32.mrb[136].mxu1 }
 0x943   : > { %v10975_v37 = vmax.f32 %v5398_v61, %v5509_v19  ;;  %v5511_v4 = vpop.f32.mrb[137].mxu1  ;;  %v5545_v36 = vsel %vm594_vm0, %v5543_v16, %v5544_v23  ;;  %v10983_v24 = vsel %vm1314_vm2, %v5768_v48, %v5769_v59  ;;  %v10988_v25 = vsel %vm1776_vm3, %v5897_v43, %v5898_v62  ;;  %v6979_v19 = vld [vmem:[%s11449_s10 + $0xd0] sm:$0xff] }
 0x944   : > { %7159 = vmatmul.mubr.msk.f32.vlgmr.msra.gmra.mrb[142].mxu1 %vm5566_vm9, %v5545_v36  ;;  %v10994_v22 = vsel %vm2238_vm4, %v6026_v63, %v6027_v3  ;;  %v6981_v4 = vld [vmem:[%s11449_s10 + $0xe0] sm:$0xff]  ;;  %v6982_v36 = vld [vmem:[%s11449_s10 + $0xe8] sm:$0xff] }
 0x945   : > { %7753 = vmatpush3.bf16.msra.mxu1 %v7752_v11  ;;  %7161 = vmatprep.mubr.msk.f32.mxu1 %vm8392_vm8, %v11493_v55  ;;  %v5546_v58 = vrot.slane %v10975_v37, 1  ;;  %v5771_v38 = vrot.slane %v10975_v37, 2  ;;  %v5900_v0 = vrot.slane %v10975_v37, 3  ;;  %v6029_v46 = vrot.slane %v10975_v37, 4 }
 0x946   : > { %v5514_v34 = vpop.f32.mrb[138].mxu1  ;;  %7754 = vmatprep.subr.bf16.mxu1 %v11501_v47 }
 0x947   : > { %v11009_v35 = vmax.f32 %v5403_v39, %v5514_v34  ;;  %v5516_v54 = vpop.f32.mrb[139].mxu1  ;;  %v5547_v57 = vsel %vm594_vm0, %v5544_v23, %v5546_v58  ;;  %v11013_v12 = vsel %vm1314_vm2, %v5769_v59, %v5771_v38  ;;  %v11016_v1 = vsel %vm1776_vm3, %v5898_v62, %v5900_v0  ;;  %v6977_v62 = vld [vmem:[%s11449_s10 + $0xc0] sm:$0xff]  ;;  %v6993_v34 = vld [vmem:[%s11449_s10 + $0x118] sm:$0xff] }
 0x948   : > { %7162 = vmatmul.mubr.msk.f32.gmra.mrb[144].mxu1 %vm5566_vm9, %v5547_v57  ;;  %v11020_v10 = vsel %vm2238_vm4, %v6027_v3, %v6029_v46  ;;  %v7770_v59 = vpack.c.bf16 %v6976_v6, %v6975_v40  ;;  %v6978_v3 = vld [vmem:[%s11449_s10 + $0xc8] sm:$0xff] }
 0x949   : > { %7756 = vmatpush3.bf16.msra.mxu1 %v7755_v41  ;;  %7164 = vmatprep.mubr.msk.f32.mxu1 %vm8392_vm8, %v11493_v55  ;;  %v5548_v60 = vrot.slane %v11009_v35, 1  ;;  %v5773_v26 = vrot.slane %v11009_v35, 2  ;;  %v5902_v15 = vrot.slane %v11009_v35, 3  ;;  %v6031_v56 = vrot.slane %v11009_v35, 4  ;;  %v6988_v41 = vld [vmem:[%s11449_s10 + $0xf0] sm:$0xff]  ;;  %v6995_v54 = vld [vmem:[%s11449_s10 + $0x128] sm:$0xff] }
 0x94a   : > { %v5519_v17 = vpop.f32.mrb[140].mxu1  ;;  %7757 = vmatprep.subr.bf16.mxu1 %v11501_v47  ;;  %v6242_v40 = vld [vmem:[%s11451_s12 + $0x28] sm:$0xff] }
 0x94b   : > { %v11035_v21 = vmax.f32 %v5408_v45, %v5519_v17  ;;  %v5521_v29 = vpop.f32.mrb[141].mxu1  ;;  %v5549_v30 = vsel %vm594_vm0, %v5546_v58, %v5548_v60  ;;  %v11039_v9 = vsel %vm1314_vm2, %v5771_v38, %v5773_v26  ;;  %v11042_v18 = vsel %vm1776_vm3, %v5900_v0, %v5902_v15  ;;  %v5537_v45 = vld [vmem:[%s11449_s10 + $0x48] sm:$0xff]  ;;  %v6989_v58 = vld [vmem:[%s11449_s10 + $0xf8] sm:$0xff] }
 0x94c   : > { %7165 = vmatmul.mubr.msk.f32.gmra.mrb[146].mxu1 %vm5566_vm9, %v5549_v30  ;;  %v11046_v31 = vsel %vm2238_vm4, %v6029_v46, %v6031_v56  ;;  %v7764_v11 = vpack.c.bf16 %v5537_v45, %v5536_v33  ;;  %v7782_v52 = vpack.c.bf16 %v6989_v58, %v6988_v41  ;;  %v6991_v38 = vld [vmem:[%s11449_s10 + $0x108] sm:$0xff]  ;;  %v6992_v46 = vld [vmem:[%s11449_s10 + $0x110] sm:$0xff] }
 0x94d   : > { %7759 = vmatpush3.bf16.msra.mxu1 %v7758_v44  ;;  %7167 = vmatprep.mubr.msk.f32.mxu1 %vm8392_vm8, %v11493_v55  ;;  %v5550_v7 = vrot.slane %v11035_v21, 1  ;;  %v5775_v61 = vrot.slane %v11035_v21, 2  ;;  %v5904_v27 = vrot.slane %v11035_v21, 3  ;;  %v6033_v39 = vrot.slane %v11035_v21, 4  ;;  %v6997_v44 = vld [vmem:[%s11449_s10 + $0x138] sm:$0xff]  ;;  %v7008_v29 = vld [vmem:[%s11449_s10 + $0x168] sm:$0xff] }
 0x94e   : > { %7760 = vmatprep.subr.bf16.mxu1 %v11501_v47  ;;  %v7785_v0 = vpack.c.bf16 %v6991_v38, %v6990_v8  ;;  %v7009_v30 = vld [vmem:[%s11449_s10 + $0x170] sm:$0xff]  ;;  %v6250_v41 = vld [vmem:[%s11451_s12 + $0x68] sm:$0xff]  ;;  %v7018_v8 = vld [vmem:[%s11450_s11] ss:$0 sm:$0xff] }
 0x94f   : > { %v5551_v51 = vsel %vm594_vm0, %v5548_v60, %v5550_v7  ;;  %v5554_v50 = vsel %vm594_vm0, %v5550_v7, %v5543_v16  ;;  %v11066_v49 = vsel %vm1314_vm2, %v5773_v26, %v5775_v61  ;;  %v11071_v14 = vsel %vm1314_vm2, %v5775_v61, %v5768_v48  ;;  %v6973_v48 = vld [vmem:[%s11449_s10 + $0xa0] sm:$0xff]  ;;  %v7012_v7 = vld [vmem:[%s11449_s10 + $0x188] sm:$0xff] }
 0x950   : > { %7168 = vmatmul.mubr.msk.f32.gmra.mrb[148].mxu1 %vm5566_vm9, %v5551_v51  ;;  %v11075_v2 = vsel %vm1776_vm3, %v5902_v15, %v5904_v27  ;;  %v11080_v32 = vsel %vm1776_vm3, %v5904_v27, %v5897_v43  ;;  %v11083_v53 = vsel %vm2238_vm4, %v6031_v56, %v6033_v39  ;;  %v11088_v16 = vsel %vm2238_vm4, %v6033_v39, %v6026_v63  ;;  %v6974_v43 = vld [vmem:[%s11449_s10 + $0xa8] sm:$0xff]  ;;  %v6980_v63 = vld [vmem:[%s11449_s10 + $0xd8] sm:$0xff]  ;;  %v7005_v15 = vld [vmem:[%s11449_s10 + $0x150] sm:$0xff] }
 0x951   : > { %7762 = vmatpush3.bf16.msra.mxu1 %v7761_v42  ;;  %7170 = vmatprep.mubr.msk.f32.mxu1 %vm8392_vm8, %v11493_v55  ;;  %v7767_v23 = vpack.c.bf16 %v6974_v43, %v6973_v48  ;;  %v7797_v26 = vpack.c.bf16 %v7004_v28, %v7003_v5  ;;  %v7006_v56 = vld [vmem:[%s11449_s10 + $0x158] sm:$0xff]  ;;  %v7011_v42 = vld [vmem:[%s11449_s10 + $0x180] sm:$0xff]  ;;  %v6339_v5 = vld [vmem:[%s11453_s14 + $0x28] sm:$0xff] }
 0x952   : > { %7763 = vmatprep.subr.bf16.mxu1 %v11501_v47  ;;  %v7800_v17 = vpack.c.bf16 %v7006_v56, %v7005_v15  ;;  %v6240_v48 = vld [vmem:[%s11451_s12 + $0x18] sm:$0xff]  ;;  %v6334_v38 = vld [vmem:[%s11453_s14] sm:$0xff] }
 0x953   : > { %v6341_v15 = vld [vmem:[%s11453_s14 + $0x38] sm:$0xff] }
 0x954   : > { %7171 = vmatmul.mubr.msk.f32.gmra.mrb[150].mxu1 %vm5566_vm9, %v5554_v50 }
 0x955   : > { %7765 = vmatpush3.bf16.msra.mxu1 %v7764_v11  ;;  %7193 = vmatprep.mubr.msk.f32.mxu1 %vm8392_vm8, %v11493_v55  ;;  %v6239_v11 = vld [vmem:[%s11451_s12 + $0x10] sm:$0xff] }
 0x956   : > { %7766 = vmatprep.subr.bf16.mxu1 %v11501_v47  ;;  %v7821_v43 = vpack.c.bf16 %v6240_v48, %v6239_v11 }
 0x958   : > { %7194 = vmatmul.mubr.msk.f32.vlgmr.msra.gmra.mrb[142].mxu1 %vm5566_vm9, %v10951_v13  ;;  %v7773_v13 = vpack.c.bf16 %v6978_v3, %v6977_v62  ;;  %v6244_v62 = vld [vmem:[%s11451_s12 + $0x38] sm:$0xff] }
 0x959   : > { %7768 = vmatpush3.bf16.msra.mxu1 %v7767_v23  ;;  %7196 = vmatprep.mubr.msk.f32.mxu1 %vm8392_vm8, %v11493_v55  ;;  %v6241_v23 = vld [vmem:[%s11451_s12 + $0x20] sm:$0xff] }
 0x95a   : > { %7769 = vmatprep.subr.bf16.mxu1 %v11501_v47  ;;  %v7824_v6 = vpack.c.bf16 %v6242_v40, %v6241_v23 }
 0x95c   : > { %7197 = vmatmul.mubr.msk.f32.gmra.mrb[144].mxu1 %vm5566_vm9, %v10959_v20  ;;  %v7776_v20 = vpack.c.bf16 %v6980_v63, %v6979_v19  ;;  %v6246_v19 = vld [vmem:[%s11451_s12 + $0x48] sm:$0xff] }
 0x95d   : > { %7771 = vmatpush3.bf16.msra.mxu1 %v7770_v59  ;;  %7199 = vmatprep.mubr.msk.f32.mxu1 %vm8392_vm8, %v11493_v55  ;;  %v6243_v59 = vld [vmem:[%s11451_s12 + $0x30] sm:$0xff] }
 0x95e   : > { %7772 = vmatprep.subr.bf16.mxu1 %v11501_v47  ;;  %v7827_v3 = vpack.c.bf16 %v6244_v62, %v6243_v59 }
 0x960   : > { %7200 = vmatmul.mubr.msk.f32.gmra.mrb[146].mxu1 %vm5566_vm9, %v10975_v37  ;;  %v7779_v37 = vpack.c.bf16 %v6982_v36, %v6981_v4  ;;  %v6248_v4 = vld [vmem:[%s11451_s12 + $0x58] sm:$0xff] }
 0x961   : > { %7774 = vmatpush3.bf16.msra.mxu1 %v7773_v13  ;;  %7202 = vmatprep.mubr.msk.f32.mxu1 %vm8392_vm8, %v11493_v55  ;;  %v6245_v13 = vld [vmem:[%s11451_s12 + $0x40] sm:$0xff] }
 0x962   : > { %7775 = vmatprep.subr.bf16.mxu1 %v11501_v47  ;;  %v7830_v63 = vpack.c.bf16 %v6246_v19, %v6245_v13 }
 0x964   : > { %7203 = vmatmul.mubr.msk.f32.gmra.mrb[148].mxu1 %vm5566_vm9, %v11009_v35  ;;  %v6994_v35 = vld [vmem:[%s11449_s10 + $0x120] sm:$0xff] }
 0x965   : > { %7777 = vmatpush3.bf16.msra.mxu1 %v7776_v20  ;;  %7205 = vmatprep.mubr.msk.f32.mxu1 %vm8392_vm8, %v11493_v55  ;;  %v7791_v57 = vpack.c.bf16 %v6995_v54, %v6994_v35  ;;  %v6247_v20 = vld [vmem:[%s11451_s12 + $0x50] sm:$0xff] }
 0x966   : > { %7778 = vmatprep.subr.bf16.mxu1 %v11501_v47  ;;  %v7833_v36 = vpack.c.bf16 %v6248_v4, %v6247_v20 }
 0x968   : > { %7206 = vmatmul.mubr.msk.f32.gmra.mrb[150].mxu1 %vm5566_vm9, %v11035_v21  ;;  %v7007_v21 = vld [vmem:[%s11449_s10 + $0x160] sm:$0xff] }
 0x969   : > { %7780 = vmatpush3.bf16.msra.mxu1 %v7779_v37  ;;  %7228 = vmatprep.mubr.msk.f32.mxu1 %vm8392_vm8, %v11493_v55  ;;  %v6249_v37 = vld [vmem:[%s11451_s12 + $0x60] sm:$0xff] }
 0x96a   : > { %7781 = vmatprep.subr.bf16.mxu1 %v11501_v47  ;;  %v7836_v58 = vpack.c.bf16 %v6250_v41, %v6249_v37 }
 0x96c   : > { %7229 = vmatmul.mubr.msk.f32.vlgmr.msra.gmra.mrb[142].mxu1 %vm5566_vm9, %v10983_v24  ;;  %v7788_v24 = vpack.c.bf16 %v6993_v34, %v6992_v46 }
 0x96d   : > { %7783 = vmatpush3.bf16.msra.mxu1 %v7782_v52  ;;  %7231 = vmatprep.mubr.msk.f32.mxu1 %vm8392_vm8, %v11493_v55  ;;  %v6251_v52 = vld [vmem:[%s11451_s12 + $0x70] sm:$0xff] }
 0x96e   : > { %7784 = vmatprep.subr.bf16.mxu1 %v11501_v47 }
 0x970   : > { %7232 = vmatmul.mubr.msk.f32.gmra.mrb[144].mxu1 %vm5566_vm9, %v11013_v12  ;;  %v6996_v12 = vld [vmem:[%s11449_s10 + $0x130] sm:$0xff] }
 0x971   : > { %7786 = vmatpush3.bf16.msra.mxu1 %v7785_v0  ;;  %7234 = vmatprep.mubr.msk.f32.mxu1 %vm8392_vm8, %v11493_v55  ;;  %v7794_v60 = vpack.c.bf16 %v6997_v44, %v6996_v12  ;;  %v6335_v0 = vld [vmem:[%s11453_s14 + $0x8] sm:$0xff]  ;;  %v6337_v12 = vld [vmem:[%s11453_s14 + $0x18] sm:$0xff] }
 0x972   : > { %7787 = vmatprep.subr.bf16.mxu1 %v11501_v47  ;;  %v7839_v35 = vpack.c.bf16 %v6335_v0, %v6334_v38 }
 0x974   : > { %7235 = vmatmul.mubr.msk.f32.gmra.mrb[146].mxu1 %vm5566_vm9, %v11039_v9  ;;  %v7010_v9 = vld [vmem:[%s11449_s10 + $0x178] sm:$0xff] }
 0x975   : > { %7789 = vmatpush3.bf16.msra.mxu1 %v7788_v24  ;;  %7237 = vmatprep.mubr.msk.f32.mxu1 %vm8392_vm8, %v11493_v55 }
 0x976   : > { %7790 = vmatprep.subr.bf16.mxu1 %v11501_v47 }
 0x978   : > { %7238 = vmatmul.mubr.msk.f32.gmra.mrb[148].mxu1 %vm5566_vm9, %v11066_v49  ;;  %v6237_v49 = vld [vmem:[%s11451_s12] sm:$0xff] }
 0x979   : > { %7792 = vmatpush3.bf16.msra.mxu1 %v7791_v57  ;;  %7240 = vmatprep.mubr.msk.f32.mxu1 %vm8392_vm8, %v11493_v55  ;;  %v6336_v57 = vld [vmem:[%s11453_s14 + $0x10] sm:$0xff] }
 0x97a   : > { %7793 = vmatprep.subr.bf16.mxu1 %v11501_v47  ;;  %v7842_v44 = vpack.c.bf16 %v6337_v12, %v6336_v57 }
 0x97c   : > { %7241 = vmatmul.mubr.msk.f32.gmra.mrb[150].mxu1 %vm5566_vm9, %v11071_v14  ;;  %v6238_v14 = vld [vmem:[%s11451_s12 + $0x8] sm:$0xff] }
 0x97d   : > { %7795 = vmatpush3.bf16.msra.mxu1 %v7794_v60  ;;  %7263 = vmatprep.mubr.msk.f32.mxu1 %vm8392_vm8, %v11493_v55  ;;  %v6338_v60 = vld [vmem:[%s11453_s14 + $0x20] sm:$0xff] }
 0x97e   : > { %7796 = vmatprep.subr.bf16.mxu1 %v11501_v47  ;;  %v7845_v28 = vpack.c.bf16 %v6339_v5, %v6338_v60 }
 0x980   : > { %7264 = vmatmul.mubr.msk.f32.vlgmr.msra.gmra.mrb[142].mxu1 %vm5566_vm9, %v10988_v25  ;;  %v7803_v25 = vpack.c.bf16 %v7008_v29, %v7007_v21  ;;  %v6343_v21 = vld [vmem:[%s11453_s14 + $0x48] sm:$0xff] }
 0x981   : > { %7798 = vmatpush3.bf16.msra.mxu1 %v7797_v26  ;;  %7266 = vmatprep.mubr.msk.f32.mxu1 %vm8392_vm8, %v11493_v55  ;;  %v6340_v26 = vld [vmem:[%s11453_s14 + $0x30] sm:$0xff] }
 0x982   : > { %7799 = vmatprep.subr.bf16.mxu1 %v11501_v47  ;;  %v7848_v56 = vpack.c.bf16 %v6341_v15, %v6340_v26 }
 0x984   : > { %7267 = vmatmul.mubr.msk.f32.gmra.mrb[144].mxu1 %vm5566_vm9, %v11016_v1  ;;  %v7806_v1 = vpack.c.bf16 %v7010_v9, %v7009_v30 }
 0x985   : > { %7801 = vmatpush3.bf16.msra.mxu1 %v7800_v17  ;;  %7269 = vmatprep.mubr.msk.f32.mxu1 %vm8392_vm8, %v11493_v55  ;;  %v6342_v17 = vld [vmem:[%s11453_s14 + $0x40] sm:$0xff] }
 0x986   : > { %7802 = vmatprep.subr.bf16.mxu1 %v11501_v47  ;;  %v7851_v29 = vpack.c.bf16 %v6343_v21, %v6342_v17 }
 0x988   : > { %7270 = vmatmul.mubr.msk.f32.gmra.mrb[146].mxu1 %vm5566_vm9, %v11042_v18  ;;  %v7809_v18 = vpack.c.bf16 %v7012_v7, %v7011_v42 }
 0x989   : > { %7804 = vmatpush3.bf16.msra.mxu1 %v7803_v25  ;;  %7272 = vmatprep.mubr.msk.f32.mxu1 %vm8392_vm8, %v11493_v55  ;;  %v6344_v25 = vld [vmem:[%s11453_s14 + $0x50] sm:$0xf] }
 0x98a   : > { %7805 = vmatprep.subr.bf16.mxu1 %v11501_v47 }
 0x98c   : > { %7273 = vmatmul.mubr.msk.f32.gmra.mrb[148].mxu1 %vm5566_vm9, %v11075_v2 }
 0x98d   : > { %7807 = vmatpush3.bf16.msra.mxu1 %v7806_v1  ;;  %7275 = vmatprep.mubr.msk.f32.mxu1 %vm8392_vm8, %v11493_v55 }
 0x98e   : > { %7808 = vmatprep.subr.bf16.mxu1 %v11501_v47 }
 0x990   : > { %7276 = vmatmul.mubr.msk.f32.gmra.mrb[150].mxu1 %vm5566_vm9, %v11080_v32 }
 0x991   : > { %7810 = vmatpush3.bf16.msra.mxu1 %v7809_v18  ;;  %7298 = vmatprep.mubr.msk.f32.mxu1 %vm8392_vm8, %v11493_v55 }
 0x994   : > { %7299 = vmatmul.mubr.msk.f32.vlgmr.msra.gmra.mrb[142].mxu1 %vm5566_vm9, %v10994_v22 }
 0x995   : > { %7301 = vmatprep.mubr.msk.f32.mxu1 %vm8392_vm8, %v11493_v55 }
 0x998   : > { %7302 = vmatmul.mubr.msk.f32.gmra.mrb[144].mxu1 %vm5566_vm9, %v11020_v10 }
 0x999   : > { %7304 = vmatprep.mubr.msk.f32.mxu1 %vm8392_vm8, %v11493_v55 }
 0x99c   : > { %7305 = vmatmul.mubr.msk.f32.gmra.mrb[146].mxu1 %vm5566_vm9, %v11046_v31 }
 0x99d   : > { %7307 = vmatprep.mubr.msk.f32.mxu1 %vm8392_vm8, %v11493_v55 }
 0x9a0   : > { %7308 = vmatmul.mubr.msk.f32.gmra.mrb[148].mxu1 %vm5566_vm9, %v11083_v53  ;;  %v6155_v53 = vld [vmem:[%s11448_s9] sm:$0xff] }
 0x9a1   : > { %7310 = vmatprep.mubr.msk.f32.mxu1 %vm8392_vm8, %v11493_v55 }
 0x9a4   : > { %7311 = vmatmul.mubr.msk.f32.gmra.mrb[150].mxu1 %vm5566_vm9, %v11088_v16  ;;  %v7818_v16 = vpack.c.bf16 %v6238_v14, %v6237_v49 }
 0xa67   : > { %v6126_v22 = vpop.f32.mrb[142].mxu1 }
 0xa68   : > { %v7300_v10 = vpop.f32.mrb[143].mxu1 }
 0xa6b   : > { %v6131_v61 = vpop.f32.mrb[144].mxu1 }
 0xa6c   : > { %v7812_v27 = vpack.c.bf16 %v6131_v61, %v6126_v22  ;;  %v7303_v39 = vpop.f32.mrb[145].mxu1 }
 0xa6e   : > { %7813 = vmatpush3.bf16.msra.mxu0 %v7812_v27 }
 0xa6f   : > { %v6136_v33 = vpop.f32.mrb[146].mxu1  ;;  %7814 = vmatprep.subr.bf16.mxu0 %v11501_v47 }
 0xa70   : > { %v7306_v31 = vpop.f32.mrb[147].mxu1 }
 0xa73   : > { %v6141_v45 = vpop.f32.mrb[148].mxu1 }
 0xa74   : > { %v7815_v51 = vpack.c.bf16 %v6141_v45, %v6136_v33  ;;  %v7309_v50 = vpop.f32.mrb[149].mxu1 }
 0xa76   : > { %7816 = vmatpush3.bf16.msra.mxu0 %v7815_v51 }
 0xa77   : > { %v6146_v2 = vpop.f32.mrb[150].mxu1  ;;  %7321 = vmatprep.subr.mxu0 %v11493_v55 }
 0xa78   : > { %v7312_v32 = vpop.f32.mrb[151].mxu1 }
 0xa7a   : > { %7322 = vmatpush3.msra.mxu0 %v6146_v2 }
 0xa7b   : > { %7324 = vmatmul.mubr.msk.f32.vlgmr.msra.gmra.mrb[64].mxu0 %vm3360_vm5, %v6155_v53  ;;  %7817 = vmatprep.subr.bf16.mxu0 %v11501_v47 }
 0xa7c   : > { %7819 = vmatpush3.bf16.msra.mxu0 %v7818_v16  ;;  %7356 = vmatprep.mubr.msk.f32.mxu0 %vm8392_vm8, %v11493_v55 }
 0xa7d   : > { %7820 = vmatprep.subr.bf16.mxu0 %v11501_v47 }
 0xa80   : > { %7822 = vmatpush3.bf16.msra.mxu0 %v7821_v43 }
 0xa81   : > { %7823 = vmatprep.subr.bf16.mxu0 %v11501_v47 }
 0xa84   : > { %7825 = vmatpush3.bf16.msra.mxu0 %v7824_v6 }
 0xa85   : > { %7826 = vmatprep.subr.bf16.mxu0 %v11501_v47 }
 0xa88   : > { %7828 = vmatpush3.bf16.msra.mxu0 %v7827_v3 }
 0xa89   : > { %7829 = vmatprep.subr.bf16.mxu0 %v11501_v47 }
 0xa8c   : > { %7831 = vmatpush3.bf16.msra.mxu0 %v7830_v63 }
 0xa8d   : > { %7832 = vmatprep.subr.bf16.mxu0 %v11501_v47 }
 0xa90   : > { %7834 = vmatpush3.bf16.msra.mxu0 %v7833_v36 }
 0xa91   : > { %7835 = vmatprep.subr.bf16.mxu0 %v11501_v47 }
 0xa94   : > { %7837 = vmatpush3.bf16.msra.mxu0 %v7836_v58 }
 0xa95   : > { %7354 = vmatprep.subr.mxu0 %v11493_v55 }
 0xa98   : > { %7355 = vmatpush3.msra.mxu0 %v6251_v52 }
 0xa99   : > { %7838 = vmatprep.subr.bf16.mxu0 %v11501_v47 }
 0xb4e   : > { %v6232_v46 = vpop.f32.mrb[64].mxu0 }
 0xb4f   : > { %v6233_v34 = vadd.f32 %v7018_v8, %v6232_v46  ;;  %v7325_v24 = vpop.f32.mrb[65].mxu0 }
 0xb51   : > { %v6236_v54 = vmax.f32 %v6233_v34, 0.0 }
 0xb53   : > { %7357 = vmatmul.mubr.msk.f32.vlgmr.msra.gmra.mrb[66].mxu0 %vm6259_vm10, %v6236_v54 }
 0xb54   : > { %7840 = vmatpush3.bf16.msra.mxu0 %v7839_v35  ;;  %7381 = vmatprep.mubr.msk.f32.mxu0 %vm8392_vm8, %v11493_v55 }
 0xb55   : > { %7841 = vmatprep.subr.bf16.mxu0 %v11501_v47 }
 0xb58   : > { %7843 = vmatpush3.bf16.msra.mxu0 %v7842_v44 }
 0xb59   : > { %7844 = vmatprep.subr.bf16.mxu0 %v11501_v47 }
 0xb5c   : > { %7846 = vmatpush3.bf16.msra.mxu0 %v7845_v28 }
 0xb5d   : > { %7847 = vmatprep.subr.bf16.mxu0 %v11501_v47 }
 0xb60   : > { %7849 = vmatpush3.bf16.msra.mxu0 %v7848_v56 }
 0xb61   : > { %7850 = vmatprep.subr.bf16.mxu0 %v11501_v47  ;;  %v7020_v47 = vld [vmem:[%s11452_s13] ss:$0 sm:$0xff] }
 0xb64   : > { %7852 = vmatpush3.bf16.msra.mxu0 %v7851_v29 }
 0xb65   : > { %7379 = vmatprep.subr.mxu0 %v11493_v55  ;;  %v7022_v55 = vld [vmem:[%s11454_s15] ss:$0 sm:$0xff] }
 0xb68   : > { %7380 = vmatpush3.msk.msra.mxu0 %vm2238_vm4, %v6344_v25 }
 0xc26   : > { %v6329_v30 = vpop.f32.mrb[66].mxu0 }
 0xc27   : > { %v6330_v9 = vadd.f32 %v7020_v47, %v6329_v30  ;;  %v7358_v1 = vpop.f32.mrb[67].mxu0 }
 0xc29   : > { %v6333_v42 = vmax.f32 %v6330_v9, 0.0 }
 0xc2b   : > { %7382 = vmatmul.mubr.msk.f32.vlgmr.msra.gmra.mrb[68].mxu0 %vm3798_vm6, %v6333_v42 }
 0xcfe   : > { %v6424_v7 = vpop.f32.mrb[68].mxu0 }
 0xcff   : > { %v6425_v18 = vadd.f32 %v7022_v55, %v6424_v7  ;;  %v7383_v22 = vpop.f32.mrb[69].mxu0 }
 0xd01   : > { %6428 = vst [vmem:[%s515_s20] sm:$0xff] %v6425_v18 }
 0xd02   : > { %8339 = shalt.err (!%p8336_p3)
}
 0xd03   : > { %s8340_s24 = scalar_lea.hbm %s11397_s21, 128  ;;  %s8344_s20 = scalar_lea.hbm %s11455_s16, 256 }
 0xd04   : > { %p8341_p4 = scmp.ne.s32.totalorder %s11397_s21, %s8340_s24  ;;  %p8345_p9 = scmp.lt.u32.totalorder %s11397_s21, %s11455_s16 }
 0xd05   : > { %p8346_p10 = scmp.lt.u32.totalorder %s8344_s20, %s8340_s24  ;;  %p8348_p12 = scmp.lt.u32.totalorder %s8340_s24, %s11397_s21 }
 0xd06   : > { %p8342_p7 = pnand %p8341_p4, %p8517_p5 }
 0xd07   : > { %p8347_p11 = por %p8346_p10, %p8345_p9 }
 0xd08   : > { %p8343_p8 = pneg %p8342_p7 }
 0xd09   : > { %p8349_p13 = por %p8348_p12, %p8347_p11 }
 0xd0b   : > { %p8350_p0 = pnand %p8349_p13, %p8343_p8 }
 0xd0d   : > { %8353 = shalt.err (!%p8350_p0)
}
 0xd0e   : > { %8261 = dma.vmem_to_hbm [thread:$0]  (%p8517_p5), %s11399_s26, 128, %s11397_s21, %s6430_s17  }
 0xd0f PF: > { %s11502_s28 = sld [smem:[#allocation7_spill]]  ;;  %s11503_s25 = sld [smem:[#allocation5_spill]] }
 0xd15   : > { %p8267_p1 = scmp.ge.s32.totalorder %s11502_s28, 2  ;;  %s6455_s30 = sand.u32 1, %s11503_s25  }
 0xd16   : > { %s6456_s19 = scalar_lea.sflag [#allocation3], %s6455_s30 }
 0xd17   : > { %p8264_p2 = pnand %p8267_p1, %p8521_p6 }
 0xd19   : > { %8371 = dma.done.wait (!%p8264_p2), %s6456_s19, 128  }
 0xd1a   : > { %8373 = vsyncadd (!%p8264_p2), %s6456_s19, 4294967168  ;;  %s11505_s24 = sld [smem:[#allocation8_spill]]  ;;  %s11506_s18 = sld [smem:[#allocation6_spill]] }
 0xd1b   : > { %s11507_s23 = sld [smem:[#allocation9_spill]]  ;;  %s11508_s21 = smov %s8380_s22 }
 0xd20   : > { %p26_p3 = scmp.ge.s32.totalorder %s11505_s24, 4   ;;  %s11509_s22 = smov %s11506_s18 }
 0xd22   :  { %28 = sbr.rel (!%p26_p3) target bundleno = 5 (0x5), region = 133 }
 0xd29   :  { %6461 = vsyncpa [#allocation3], 1 }
 0xd2a   :  { %6463 = vsyncpa [#allocation3 + $0x1], 1 }

</bundles_post_ra>
